<compile_context>
chip_gen: v5e
topology: v5e:2x2
jax: 0.10.0
libtpu: 0.0.40
codegen_flags: <defaults>
</compile_context>

<pallas_src>
import functools

import jax
import jax.numpy as jnp
from jax.experimental import pallas as pl
from jax.experimental.pallas import tpu as pltpu


_VMEM = pl.BlockSpec(memory_space=pltpu.MemorySpace.VMEM)


def _dot(a, b):
    return jnp.dot(a, b, preferred_element_type=jnp.float32)


# ----------------------------------------------------------------------------
# Fused per-graph MPNN forward kernel
# ----------------------------------------------------------------------------
def _mpnn_fused_kernel(
        x_ref, ea_ref, gsrc_ref, tmean_ref, bgn_ref, bng_ref,
        proj_w_ref, proj_b_ref, e1_w_ref, e1_b_ref, e2_w_ref, e2_b_ref,
        root_w_ref, conv_b_ref,
        gru_wih_ref, gru_whh_ref, gru_bih_ref, gru_bhh_ref,
        lstm_wih_q_ref, lstm_wih_r_ref, lstm_whh_ref, lstm_b_ref,
        emb_wq_ref, emb_wr_ref, emb_b_ref,
        out_ref, *, hidden, mp_steps, s2s_steps):
    H = hidden

    # ---- node projection + ReLU (this is also the initial GRU hidden) ----
    h = jnp.maximum(_dot(x_ref[...], proj_w_ref[...]) + proj_b_ref[...], 0.0)   # (N, H)

    # ---- edge network (edge_attr is loop-invariant -> compute once) ----
    eh = jnp.maximum(_dot(ea_ref[...], e1_w_ref[...]) + e1_b_ref[...], 0.0)     # (E, 2H)
    we = _dot(eh, e2_w_ref[...]) + e2_b_ref[...]                                # (E, H*H)
    # column block k*H:(k+1)*H of row e == W_e[k, :] (matches NNConv's
    # nn(edge_attr).view(-1, in_channels, out_channels), row-major)

    gsrc = gsrc_ref[...]                                                        # (E, N)
    tmean = tmean_ref[...]                                                      # (N, E)

    # ---- hoisted weight / bias loads (no re-load inside the step loop) ----
    root_w = root_w_ref[...]
    conv_b = conv_b_ref[...]
    wih = [gru_wih_ref[g] for g in range(3)]    # per-gate (H, H), order r, z, n
    whh = [gru_whh_ref[g] for g in range(3)]
    bih = [gru_bih_ref[g] for g in range(3)]    # (1, H)
    bhh = [gru_bhh_ref[g] for g in range(3)]

    for _ in range(mp_steps):
        # --- NNConv with mean aggregation ---
        x_src = _dot(gsrc, h)                                                   # (E, H) gather sources
        # per-edge matmul via H-step broadcast FMA (VPU, no block-diag blowup)
        msgs = x_src[:, 0:1] * we[:, 0:H]
        for k in range(1, H):
            msgs = msgs + x_src[:, k:k + 1] * we[:, k * H:(k + 1) * H]          # (E, H)
        agg = _dot(tmean, msgs)                                                 # (N, H) mean over in-edges
        m = jnp.maximum(agg + _dot(h, root_w) + conv_b, 0.0)                    # ReLU(conv)

        # --- GRU cell (seq_len==1 => output == new hidden); gate order r,z,n ---
        r = jax.nn.sigmoid(_dot(m, wih[0]) + bih[0] + _dot(h, whh[0]) + bhh[0])
        z = jax.nn.sigmoid(_dot(m, wih[1]) + bih[1] + _dot(h, whh[1]) + bhh[1])
        n = jnp.tanh(_dot(m, wih[2]) + bih[2] + r * (_dot(h, whh[2]) + bhh[2]))
        h = (1.0 - z) * n + z * h

    # ---- Set2Set pooling (LSTM + per-graph softmax attention) ----
    bgn = bgn_ref[...]                                                          # (G, N)
    bng = bng_ref[...]                                                          # (N, G)
    G = bgn.shape[0]
    wih_q = [lstm_wih_q_ref[g] for g in range(4)]   # per-gate (H, H), order i,f,g,o
    wih_r = [lstm_wih_r_ref[g] for g in range(4)]
    l_whh = [lstm_whh_ref[g] for g in range(4)]
    l_b = [lstm_b_ref[g] for g in range(4)]         # (1, H), b_ih + b_hh fused

    q = jnp.zeros((G, H), jnp.float32)       # first half of q_star
    r_pool = jnp.zeros((G, H), jnp.float32)  # second half of q_star
    hs = jnp.zeros((G, H), jnp.float32)
    cs = jnp.zeros((G, H), jnp.float32)
    neg_big = jnp.float32(-1e30)             # finite sentinel (f32-safe)

    for _ in range(s2s_steps):
        # LSTM cell on q_star = [q | r_pool]
        def gate(g):
            return (_dot(q, wih_q[g]) + _dot(r_pool, wih_r[g])
                    + _dot(hs, l_whh[g]) + l_b[g])
        i_g = jax.nn.sigmoid(gate(0))
        f_g = jax.nn.sigmoid(gate(1))
        g_g = jnp.tanh(gate(2))
        o_g = jax.nn.sigmoid(gate(3))
        cs = f_g * cs + i_g * g_g
        hs = o_g * jnp.tanh(cs)
        q = hs                                                                  # (G, H)

        # attention: e_n = <h_n, q_{batch[n]}>, softmax within each graph
        q_per_node = _dot(bng, q)                                               # (N, H)
        e = jnp.sum(h * q_per_node, axis=1, keepdims=True)                      # (N, 1)
        e_ng = jnp.where(bng > 0.5, e, neg_big)                                 # (N, G)
        m_row = jnp.max(e_ng, axis=0, keepdims=True)                            # (1, G)
        m_per_node = jnp.sum(bng * m_row, axis=1, keepdims=True)                # (N, 1)
        num = jnp.exp(e - m_per_node)                                           # (N, 1)
        denom_row = jnp.sum(bng * num, axis=0, keepdims=True)                   # (1, G)
        denom_per_node = jnp.sum(bng * denom_row, axis=1, keepdims=True)        # (N, 1)
        a = num / denom_per_node                                                # (N, 1)
        r_pool = _dot(bgn, a * h)                                               # (G, H) weighted segment-sum

    # ---- embed (+ReLU) on q_star = [q | r_pool]; split weights -> no concat
    emb = _dot(q, emb_wq_ref[...]) + _dot(r_pool, emb_wr_ref[...]) + emb_b_ref[...]
    out_ref[...] = jnp.maximum(emb, 0.0)


def mpnn_forward(params, x, edge_attr, edge_src, edge_tgt, batch,
                 num_graphs, steps):
    N = x.shape[0]
    H = params['proj_w'].shape[1]
    embed = params['emb_wq'].shape[1]
    G = num_graphs

    # --- graph structure as small dense matrices (plain-JAX glue) ---
    gsrc = jax.nn.one_hot(edge_src, N, dtype=jnp.float32)                       # (E, N)
    onehot_tgt = jax.nn.one_hot(edge_tgt, N, dtype=jnp.float32)                 # (E, N)
    deg = jnp.clip(jnp.sum(onehot_tgt, axis=0), 1.0, None)                      # (N,)
    tmean = (onehot_tgt / deg[None, :]).T                                       # (N, E)
    b_ng = jax.nn.one_hot(batch, G, dtype=jnp.float32)                          # (N, G)
    b_gn = b_ng.T                                                               # (G, N)

    kernel = functools.partial(_mpnn_fused_kernel,
                               hidden=H, mp_steps=steps, s2s_steps=3)
    return pl.pallas_call(
        kernel,
        out_shape=jax.ShapeDtypeStruct((G, embed), jnp.float32),
        in_specs=[_VMEM] * 25,
        out_specs=_VMEM,
    )(x, edge_attr, gsrc, tmean, b_gn, b_ng,
      params['proj_w'], params['proj_b'],
      params['edge1_w'], params['edge1_b'],
      params['edge2_w'], params['edge2_b'],
      params['conv_root_w'], params['conv_b'],
      params['gru_wih'], params['gru_whh'], params['gru_bih'], params['gru_bhh'],
      params['lstm_wih_q'], params['lstm_wih_r'], params['lstm_whh'], params['lstm_b'],
      params['emb_wq'], params['emb_wr'], params['emb_b'])


# ----------------------------------------------------------------------------
# Fused predictor: Linear -> ReLU -> Linear on concat([emb_s, emb_e]).
# Concat avoided by splitting pred1_w into its substrate/enzyme column blocks.
# ----------------------------------------------------------------------------
def _predict_kernel(es_ref, ee_ref, w1s_ref, w1e_ref, b1_ref, w2_ref, b2_ref,
                    o_ref):
    h1 = jnp.maximum(_dot(es_ref[...], w1s_ref[...])
                     + _dot(ee_ref[...], w1e_ref[...]) + b1_ref[...], 0.0)
    o_ref[...] = _dot(h1, w2_ref[...]) + b2_ref[...]


def model_forward(params, substrate, enzyme):
    emb_s = mpnn_forward(params['substrate'], *substrate)
    emb_e = mpnn_forward(params['enzyme'], *enzyme)
    G = emb_s.shape[0]
    return pl.pallas_call(
        _predict_kernel,
        out_shape=jax.ShapeDtypeStruct((G, 1), jnp.float32),
        in_specs=[_VMEM] * 7,
        out_specs=_VMEM,
    )(emb_s, emb_e,
      params['pred1_w_s'], params['pred1_w_e'], params['pred1_b'],
      params['pred2_w'], params['pred2_b'])


# ----------------------------------------------------------------------------
# Deterministic parameter initialization (shapes follow the PyTorch __init__,
# GRU/LSTM weights stored per-gate for lane-aligned in-kernel dots).
# ----------------------------------------------------------------------------
def init_linear(key, fan_in, fan_out, zero_bias=False):
    kw, kb = jax.random.split(key)
    bound = 1.0 / (fan_in ** 0.5)
    w = jax.random.uniform(kw, (fan_in, fan_out), jnp.float32, -bound, bound)
    if zero_bias:
        b = jnp.zeros((1, fan_out), jnp.float32)
    else:
        b = jax.random.uniform(kb, (1, fan_out), jnp.float32, -bound, bound)
    return w, b


def init_mpnn(key, in_nodes, in_edges, hidden, embed):
    keys = jax.random.split(key, 16)
    bound = 1.0 / (hidden ** 0.5)
    u = lambda k, shape: jax.random.uniform(k, shape, jnp.float32, -bound, bound)
    p = {}
    p['proj_w'], p['proj_b'] = init_linear(keys[0], in_nodes, hidden)
    p['edge1_w'], p['edge1_b'] = init_linear(keys[1], in_edges, 2 * hidden)
    p['edge2_w'], p['edge2_b'] = init_linear(keys[2], 2 * hidden, hidden * hidden)
    p['conv_root_w'], _ = init_linear(keys[3], hidden, hidden)     # NNConv root (no bias)
    p['conv_b'] = jnp.zeros((1, hidden), jnp.float32)              # NNConv bias (zero-init)
    # GRU, per-gate (r, z, n): weights (3, H, H), biases (3, 1, H)
    p['gru_wih'] = u(keys[4], (3, hidden, hidden))
    p['gru_whh'] = u(keys[5], (3, hidden, hidden))
    p['gru_bih'] = u(keys[6], (3, 1, hidden))
    p['gru_bhh'] = u(keys[7], (3, 1, hidden))
    # Set2Set LSTM (input 2H split into [q | r] halves, hidden H), per-gate
    # (i, f, g, o); the two biases are fused into one.
    p['lstm_wih_q'] = u(keys[8], (4, hidden, hidden))
    p['lstm_wih_r'] = u(keys[9], (4, hidden, hidden))
    p['lstm_whh'] = u(keys[10], (4, hidden, hidden))
    p['lstm_b'] = u(keys[11], (4, 1, hidden)) + u(keys[12], (4, 1, hidden))
    # embed: weight split over the [q | r] halves of q_star (avoids concat)
    ew, eb = init_linear(keys[13], 2 * hidden, embed)
    p['emb_wq'] = ew[:hidden, :]
    p['emb_wr'] = ew[hidden:, :]
    p['emb_b'] = eb
    return p


if __name__ == "__main__":
    key = jax.random.PRNGKey(0)

    # hyperparameters (small, consistent with the module's constructor args)
    H_S, H_E = 16, 16
    EMB_S, EMB_E = 12, 12
    FN_S, FE_S = 7, 5        # substrate node / edge feature dims
    FN_E, FE_E = 9, 4        # enzyme node / edge feature dims
    STEPS = 3
    NUM_GRAPHS = 2

    k_ps, k_pe, k_pred, k_data = jax.random.split(key, 4)
    params = {
        'substrate': init_mpnn(k_ps, FN_S, FE_S, H_S, EMB_S),
        'enzyme':    init_mpnn(k_pe, FN_E, FE_E, H_E, EMB_E),
    }
    total = EMB_S + EMB_E
    kp1, kp2 = jax.random.split(k_pred)
    pred1_w, params['pred1_b'] = init_linear(kp1, total, total // 2)
    params['pred1_w_s'] = pred1_w[:EMB_S, :]
    params['pred1_w_e'] = pred1_w[EMB_S:, :]
    params['pred2_w'], params['pred2_b'] = init_linear(kp2, total // 2, 1)

    def make_graph(k, n_nodes, n_edges, feat_nodes, feat_edges, num_graphs):
        k1, k2, k3, k4 = jax.random.split(k, 4)
        x = jax.random.normal(k1, (n_nodes, feat_nodes), jnp.float32)
        edge_attr = jax.random.normal(k2, (n_edges, feat_edges), jnp.float32)
        half_n, half_e = n_nodes // num_graphs, n_edges // num_graphs
        src0 = jax.random.randint(k3, (half_e,), 0, half_n)
        tgt0 = jax.random.randint(k4, (half_e,), 0, half_n)
        src1 = jax.random.randint(jax.random.fold_in(k3, 1), (n_edges - half_e,), half_n, n_nodes)
        tgt1 = jax.random.randint(jax.random.fold_in(k4, 1), (n_edges - half_e,), half_n, n_nodes)
        edge_src = jnp.concatenate([src0, src1]).astype(jnp.int32)
        edge_tgt = jnp.concatenate([tgt0, tgt1]).astype(jnp.int32)
        batch = jnp.concatenate([jnp.zeros((half_n,), jnp.int32),
                                 jnp.ones((n_nodes - half_n,), jnp.int32)])
        return (x, edge_attr, edge_src, edge_tgt, batch)

    kd1, kd2 = jax.random.split(k_data)
    substrate = make_graph(kd1, 12, 24, FN_S, FE_S, NUM_GRAPHS) + (NUM_GRAPHS, STEPS)
    enzyme = make_graph(kd2, 10, 20, FN_E, FE_E, NUM_GRAPHS) + (NUM_GRAPHS, STEPS)

    out = model_forward(params, substrate, enzyme)
    out = jax.block_until_ready(out)
    assert out.shape == (NUM_GRAPHS, 1) and out.dtype == jnp.float32
    print("KERNEL_OK")
</pallas_src>

<mosaic_0001>
module attributes {stable_mosaic.version = 11 : i64} {
  func.func @_mpnn_fused_kernel(%arg0: memref<12x7xf32, #tpu.memory_space<vmem>>, %arg1: memref<24x5xf32, #tpu.memory_space<vmem>>, %arg2: memref<24x12xf32, #tpu.memory_space<vmem>>, %arg3: memref<12x24xf32, #tpu.memory_space<vmem>>, %arg4: memref<2x12xf32, #tpu.memory_space<vmem>>, %arg5: memref<12x2xf32, #tpu.memory_space<vmem>>, %arg6: memref<7x16xf32, #tpu.memory_space<vmem>>, %arg7: memref<1x16xf32, #tpu.memory_space<vmem>>, %arg8: memref<5x32xf32, #tpu.memory_space<vmem>>, %arg9: memref<1x32xf32, #tpu.memory_space<vmem>>, %arg10: memref<32x256xf32, #tpu.memory_space<vmem>>, %arg11: memref<1x256xf32, #tpu.memory_space<vmem>>, %arg12: memref<16x16xf32, #tpu.memory_space<vmem>>, %arg13: memref<1x16xf32, #tpu.memory_space<vmem>>, %arg14: memref<3x16x16xf32, #tpu.memory_space<vmem>>, %arg15: memref<3x16x16xf32, #tpu.memory_space<vmem>>, %arg16: memref<3x1x16xf32, #tpu.memory_space<vmem>>, %arg17: memref<3x1x16xf32, #tpu.memory_space<vmem>>, %arg18: memref<4x16x16xf32, #tpu.memory_space<vmem>>, %arg19: memref<4x16x16xf32, #tpu.memory_space<vmem>>, %arg20: memref<4x16x16xf32, #tpu.memory_space<vmem>>, %arg21: memref<4x1x16xf32, #tpu.memory_space<vmem>>, %arg22: memref<16x12xf32, #tpu.memory_space<vmem>>, %arg23: memref<16x12xf32, #tpu.memory_space<vmem>>, %arg24: memref<1x12xf32, #tpu.memory_space<vmem>>, %arg25: memref<2x12xf32, #tpu.memory_space<vmem>>) attributes {dimension_semantics = [], scalar_prefetch = 0 : i64, scratch_operands = 0 : i64, tpu.core_type = #tpu.core_type<tc>} {
    %c0 = arith.constant 0 : index
    %c0_0 = arith.constant 0 : index
    %0 = vector.load %arg0[%c0, %c0_0] : memref<12x7xf32, #tpu.memory_space<vmem>>, vector<12x7xf32>
    %c0_1 = arith.constant 0 : index
    %c0_2 = arith.constant 0 : index
    %1 = vector.load %arg6[%c0_1, %c0_2] : memref<7x16xf32, #tpu.memory_space<vmem>>, vector<7x16xf32>
    %cst = arith.constant dense<0.000000e+00> : vector<12x16xf32>
    %2 = tpu.matmul %0, %1, %cst {dimension_numbers = #tpu.dot_dimension_numbers<[1], [0], [0], [1], [0, 0, 1, 1], [], []>} : vector<12x7xf32>, vector<7x16xf32>, vector<12x16xf32> -> vector<12x16xf32>
    %c0_3 = arith.constant 0 : index
    %c0_4 = arith.constant 0 : index
    %3 = vector.load %arg7[%c0_3, %c0_4] : memref<1x16xf32, #tpu.memory_space<vmem>>, vector<1x16xf32>
    %4 = vector.broadcast %3 : vector<1x16xf32> to vector<12x16xf32>
    %5 = arith.addf %2, %4 : vector<12x16xf32>
    %cst_5 = arith.constant 0.000000e+00 : f32
    %6 = vector.broadcast %cst_5 : f32 to vector<12x16xf32>
    %7 = arith.maximumf %5, %6 : vector<12x16xf32>
    %c0_6 = arith.constant 0 : index
    %c0_7 = arith.constant 0 : index
    %8 = vector.load %arg1[%c0_6, %c0_7] : memref<24x5xf32, #tpu.memory_space<vmem>>, vector<24x5xf32>
    %c0_8 = arith.constant 0 : index
    %c0_9 = arith.constant 0 : index
    %9 = vector.load %arg8[%c0_8, %c0_9] : memref<5x32xf32, #tpu.memory_space<vmem>>, vector<5x32xf32>
    %cst_10 = arith.constant dense<0.000000e+00> : vector<24x32xf32>
    %10 = tpu.matmul %8, %9, %cst_10 {dimension_numbers = #tpu.dot_dimension_numbers<[1], [0], [0], [1], [0, 0, 1, 1], [], []>} : vector<24x5xf32>, vector<5x32xf32>, vector<24x32xf32> -> vector<24x32xf32>
    %c0_11 = arith.constant 0 : index
    %c0_12 = arith.constant 0 : index
    %11 = vector.load %arg9[%c0_11, %c0_12] : memref<1x32xf32, #tpu.memory_space<vmem>>, vector<1x32xf32>
    %12 = vector.broadcast %11 : vector<1x32xf32> to vector<24x32xf32>
    %13 = arith.addf %10, %12 : vector<24x32xf32>
    %cst_13 = arith.constant 0.000000e+00 : f32
    %14 = vector.broadcast %cst_13 : f32 to vector<24x32xf32>
    %15 = arith.maximumf %13, %14 : vector<24x32xf32>
    %c0_14 = arith.constant 0 : index
    %c0_15 = arith.constant 0 : index
    %16 = vector.load %arg10[%c0_14, %c0_15] : memref<32x256xf32, #tpu.memory_space<vmem>>, vector<32x256xf32>
    %cst_16 = arith.constant dense<0.000000e+00> : vector<24x256xf32>
    %17 = tpu.matmul %15, %16, %cst_16 {dimension_numbers = #tpu.dot_dimension_numbers<[1], [0], [0], [1], [0, 0, 1, 1], [], []>} : vector<24x32xf32>, vector<32x256xf32>, vector<24x256xf32> -> vector<24x256xf32>
    %c0_17 = arith.constant 0 : index
    %c0_18 = arith.constant 0 : index
    %18 = vector.load %arg11[%c0_17, %c0_18] : memref<1x256xf32, #tpu.memory_space<vmem>>, vector<1x256xf32>
    %19 = vector.broadcast %18 : vector<1x256xf32> to vector<24x256xf32>
    %20 = arith.addf %17, %19 : vector<24x256xf32>
    %c0_19 = arith.constant 0 : index
    %c0_20 = arith.constant 0 : index
    %21 = vector.load %arg2[%c0_19, %c0_20] : memref<24x12xf32, #tpu.memory_space<vmem>>, vector<24x12xf32>
    %c0_21 = arith.constant 0 : index
    %c0_22 = arith.constant 0 : index
    %22 = vector.load %arg3[%c0_21, %c0_22] : memref<12x24xf32, #tpu.memory_space<vmem>>, vector<12x24xf32>
    %c0_23 = arith.constant 0 : index
    %c0_24 = arith.constant 0 : index
    %23 = vector.load %arg12[%c0_23, %c0_24] : memref<16x16xf32, #tpu.memory_space<vmem>>, vector<16x16xf32>
    %c0_25 = arith.constant 0 : index
    %c0_26 = arith.constant 0 : index
    %24 = vector.load %arg13[%c0_25, %c0_26] : memref<1x16xf32, #tpu.memory_space<vmem>>, vector<1x16xf32>
    %c0_27 = arith.constant 0 : index
    %c0_28 = arith.constant 0 : index
    %c0_29 = arith.constant 0 : index
    %25 = vector.load %arg14[%c0_27, %c0_28, %c0_29] : memref<3x16x16xf32, #tpu.memory_space<vmem>>, vector<1x16x16xf32>
    %26 = vector.shape_cast %25 : vector<1x16x16xf32> to vector<16x16xf32>
    %c1 = arith.constant 1 : index
    %c0_30 = arith.constant 0 : index
    %c0_31 = arith.constant 0 : index
    %27 = vector.load %arg14[%c1, %c0_30, %c0_31] : memref<3x16x16xf32, #tpu.memory_space<vmem>>, vector<1x16x16xf32>
    %28 = vector.shape_cast %27 : vector<1x16x16xf32> to vector<16x16xf32>
    %c2 = arith.constant 2 : index
    %c0_32 = arith.constant 0 : index
    %c0_33 = arith.constant 0 : index
    %29 = vector.load %arg14[%c2, %c0_32, %c0_33] : memref<3x16x16xf32, #tpu.memory_space<vmem>>, vector<1x16x16xf32>
    %30 = vector.shape_cast %29 : vector<1x16x16xf32> to vector<16x16xf32>
    %c0_34 = arith.constant 0 : index
    %c0_35 = arith.constant 0 : index
    %c0_36 = arith.constant 0 : index
    %31 = vector.load %arg15[%c0_34, %c0_35, %c0_36] : memref<3x16x16xf32, #tpu.memory_space<vmem>>, vector<1x16x16xf32>
    %32 = vector.shape_cast %31 : vector<1x16x16xf32> to vector<16x16xf32>
    %c1_37 = arith.constant 1 : index
    %c0_38 = arith.constant 0 : index
    %c0_39 = arith.constant 0 : index
    %33 = vector.load %arg15[%c1_37, %c0_38, %c0_39] : memref<3x16x16xf32, #tpu.memory_space<vmem>>, vector<1x16x16xf32>
    %34 = vector.shape_cast %33 : vector<1x16x16xf32> to vector<16x16xf32>
    %c2_40 = arith.constant 2 : index
    %c0_41 = arith.constant 0 : index
    %c0_42 = arith.constant 0 : index
    %35 = vector.load %arg15[%c2_40, %c0_41, %c0_42] : memref<3x16x16xf32, #tpu.memory_space<vmem>>, vector<1x16x16xf32>
    %36 = vector.shape_cast %35 : vector<1x16x16xf32> to vector<16x16xf32>
    %c0_43 = arith.constant 0 : index
    %c0_44 = arith.constant 0 : index
    %c0_45 = arith.constant 0 : index
    %37 = vector.load %arg16[%c0_43, %c0_44, %c0_45] : memref<3x1x16xf32, #tpu.memory_space<vmem>>, vector<1x1x16xf32>
    %38 = vector.shape_cast %37 : vector<1x1x16xf32> to vector<1x16xf32>
    %c1_46 = arith.constant 1 : index
    %c0_47 = arith.constant 0 : index
    %c0_48 = arith.constant 0 : index
    %39 = vector.load %arg16[%c1_46, %c0_47, %c0_48] : memref<3x1x16xf32, #tpu.memory_space<vmem>>, vector<1x1x16xf32>
    %40 = vector.shape_cast %39 : vector<1x1x16xf32> to vector<1x16xf32>
    %c2_49 = arith.constant 2 : index
    %c0_50 = arith.constant 0 : index
    %c0_51 = arith.constant 0 : index
    %41 = vector.load %arg16[%c2_49, %c0_50, %c0_51] : memref<3x1x16xf32, #tpu.memory_space<vmem>>, vector<1x1x16xf32>
    %42 = vector.shape_cast %41 : vector<1x1x16xf32> to vector<1x16xf32>
    %c0_52 = arith.constant 0 : index
    %c0_53 = arith.constant 0 : index
    %c0_54 = arith.constant 0 : index
    %43 = vector.load %arg17[%c0_52, %c0_53, %c0_54] : memref<3x1x16xf32, #tpu.memory_space<vmem>>, vector<1x1x16xf32>
    %44 = vector.shape_cast %43 : vector<1x1x16xf32> to vector<1x16xf32>
    %c1_55 = arith.constant 1 : index
    %c0_56 = arith.constant 0 : index
    %c0_57 = arith.constant 0 : index
    %45 = vector.load %arg17[%c1_55, %c0_56, %c0_57] : memref<3x1x16xf32, #tpu.memory_space<vmem>>, vector<1x1x16xf32>
    %46 = vector.shape_cast %45 : vector<1x1x16xf32> to vector<1x16xf32>
    %c2_58 = arith.constant 2 : index
    %c0_59 = arith.constant 0 : index
    %c0_60 = arith.constant 0 : index
    %47 = vector.load %arg17[%c2_58, %c0_59, %c0_60] : memref<3x1x16xf32, #tpu.memory_space<vmem>>, vector<1x1x16xf32>
    %48 = vector.shape_cast %47 : vector<1x1x16xf32> to vector<1x16xf32>
    %cst_61 = arith.constant dense<0.000000e+00> : vector<24x16xf32>
    %49 = tpu.matmul %21, %7, %cst_61 {dimension_numbers = #tpu.dot_dimension_numbers<[1], [0], [0], [1], [0, 0, 1, 1], [], []>} : vector<24x12xf32>, vector<12x16xf32>, vector<24x16xf32> -> vector<24x16xf32>
    %50 = vector.extract_strided_slice %49 {offsets = [0, 0], sizes = [24, 1], strides = [1, 1]} : vector<24x16xf32> to vector<24x1xf32>
    %51 = vector.extract_strided_slice %20 {offsets = [0, 0], sizes = [24, 16], strides = [1, 1]} : vector<24x256xf32> to vector<24x16xf32>
    %52 = vector.broadcast %50 : vector<24x1xf32> to vector<24x16xf32>
    %53 = arith.mulf %52, %51 : vector<24x16xf32>
    %54 = vector.extract_strided_slice %49 {offsets = [0, 1], sizes = [24, 1], strides = [1, 1]} : vector<24x16xf32> to vector<24x1xf32>
    %55 = vector.extract_strided_slice %20 {offsets = [0, 16], sizes = [24, 16], strides = [1, 1]} : vector<24x256xf32> to vector<24x16xf32>
    %56 = vector.broadcast %54 : vector<24x1xf32> to vector<24x16xf32>
    %57 = arith.mulf %56, %55 : vector<24x16xf32>
    %58 = arith.addf %53, %57 : vector<24x16xf32>
    %59 = vector.extract_strided_slice %49 {offsets = [0, 2], sizes = [24, 1], strides = [1, 1]} : vector<24x16xf32> to vector<24x1xf32>
    %60 = vector.extract_strided_slice %20 {offsets = [0, 32], sizes = [24, 16], strides = [1, 1]} : vector<24x256xf32> to vector<24x16xf32>
    %61 = vector.broadcast %59 : vector<24x1xf32> to vector<24x16xf32>
    %62 = arith.mulf %61, %60 : vector<24x16xf32>
    %63 = arith.addf %58, %62 : vector<24x16xf32>
    %64 = vector.extract_strided_slice %49 {offsets = [0, 3], sizes = [24, 1], strides = [1, 1]} : vector<24x16xf32> to vector<24x1xf32>
    %65 = vector.extract_strided_slice %20 {offsets = [0, 48], sizes = [24, 16], strides = [1, 1]} : vector<24x256xf32> to vector<24x16xf32>
    %66 = vector.broadcast %64 : vector<24x1xf32> to vector<24x16xf32>
    %67 = arith.mulf %66, %65 : vector<24x16xf32>
    %68 = arith.addf %63, %67 : vector<24x16xf32>
    %69 = vector.extract_strided_slice %49 {offsets = [0, 4], sizes = [24, 1], strides = [1, 1]} : vector<24x16xf32> to vector<24x1xf32>
    %70 = vector.extract_strided_slice %20 {offsets = [0, 64], sizes = [24, 16], strides = [1, 1]} : vector<24x256xf32> to vector<24x16xf32>
    %71 = vector.broadcast %69 : vector<24x1xf32> to vector<24x16xf32>
    %72 = arith.mulf %71, %70 : vector<24x16xf32>
    %73 = arith.addf %68, %72 : vector<24x16xf32>
    %74 = vector.extract_strided_slice %49 {offsets = [0, 5], sizes = [24, 1], strides = [1, 1]} : vector<24x16xf32> to vector<24x1xf32>
    %75 = vector.extract_strided_slice %20 {offsets = [0, 80], sizes = [24, 16], strides = [1, 1]} : vector<24x256xf32> to vector<24x16xf32>
    %76 = vector.broadcast %74 : vector<24x1xf32> to vector<24x16xf32>
    %77 = arith.mulf %76, %75 : vector<24x16xf32>
    %78 = arith.addf %73, %77 : vector<24x16xf32>
    %79 = vector.extract_strided_slice %49 {offsets = [0, 6], sizes = [24, 1], strides = [1, 1]} : vector<24x16xf32> to vector<24x1xf32>
    %80 = vector.extract_strided_slice %20 {offsets = [0, 96], sizes = [24, 16], strides = [1, 1]} : vector<24x256xf32> to vector<24x16xf32>
    %81 = vector.broadcast %79 : vector<24x1xf32> to vector<24x16xf32>
    %82 = arith.mulf %81, %80 : vector<24x16xf32>
    %83 = arith.addf %78, %82 : vector<24x16xf32>
    %84 = vector.extract_strided_slice %49 {offsets = [0, 7], sizes = [24, 1], strides = [1, 1]} : vector<24x16xf32> to vector<24x1xf32>
    %85 = vector.extract_strided_slice %20 {offsets = [0, 112], sizes = [24, 16], strides = [1, 1]} : vector<24x256xf32> to vector<24x16xf32>
    %86 = vector.broadcast %84 : vector<24x1xf32> to vector<24x16xf32>
    %87 = arith.mulf %86, %85 : vector<24x16xf32>
    %88 = arith.addf %83, %87 : vector<24x16xf32>
    %89 = vector.extract_strided_slice %49 {offsets = [0, 8], sizes = [24, 1], strides = [1, 1]} : vector<24x16xf32> to vector<24x1xf32>
    %90 = vector.extract_strided_slice %20 {offsets = [0, 128], sizes = [24, 16], strides = [1, 1]} : vector<24x256xf32> to vector<24x16xf32>
    %91 = vector.broadcast %89 : vector<24x1xf32> to vector<24x16xf32>
    %92 = arith.mulf %91, %90 : vector<24x16xf32>
    %93 = arith.addf %88, %92 : vector<24x16xf32>
    %94 = vector.extract_strided_slice %49 {offsets = [0, 9], sizes = [24, 1], strides = [1, 1]} : vector<24x16xf32> to vector<24x1xf32>
    %95 = vector.extract_strided_slice %20 {offsets = [0, 144], sizes = [24, 16], strides = [1, 1]} : vector<24x256xf32> to vector<24x16xf32>
    %96 = vector.broadcast %94 : vector<24x1xf32> to vector<24x16xf32>
    %97 = arith.mulf %96, %95 : vector<24x16xf32>
    %98 = arith.addf %93, %97 : vector<24x16xf32>
    %99 = vector.extract_strided_slice %49 {offsets = [0, 10], sizes = [24, 1], strides = [1, 1]} : vector<24x16xf32> to vector<24x1xf32>
    %100 = vector.extract_strided_slice %20 {offsets = [0, 160], sizes = [24, 16], strides = [1, 1]} : vector<24x256xf32> to vector<24x16xf32>
    %101 = vector.broadcast %99 : vector<24x1xf32> to vector<24x16xf32>
    %102 = arith.mulf %101, %100 : vector<24x16xf32>
    %103 = arith.addf %98, %102 : vector<24x16xf32>
    %104 = vector.extract_strided_slice %49 {offsets = [0, 11], sizes = [24, 1], strides = [1, 1]} : vector<24x16xf32> to vector<24x1xf32>
    %105 = vector.extract_strided_slice %20 {offsets = [0, 176], sizes = [24, 16], strides = [1, 1]} : vector<24x256xf32> to vector<24x16xf32>
    %106 = vector.broadcast %104 : vector<24x1xf32> to vector<24x16xf32>
    %107 = arith.mulf %106, %105 : vector<24x16xf32>
    %108 = arith.addf %103, %107 : vector<24x16xf32>
    %109 = vector.extract_strided_slice %49 {offsets = [0, 12], sizes = [24, 1], strides = [1, 1]} : vector<24x16xf32> to vector<24x1xf32>
    %110 = vector.extract_strided_slice %20 {offsets = [0, 192], sizes = [24, 16], strides = [1, 1]} : vector<24x256xf32> to vector<24x16xf32>
    %111 = vector.broadcast %109 : vector<24x1xf32> to vector<24x16xf32>
    %112 = arith.mulf %111, %110 : vector<24x16xf32>
    %113 = arith.addf %108, %112 : vector<24x16xf32>
    %114 = vector.extract_strided_slice %49 {offsets = [0, 13], sizes = [24, 1], strides = [1, 1]} : vector<24x16xf32> to vector<24x1xf32>
    %115 = vector.extract_strided_slice %20 {offsets = [0, 208], sizes = [24, 16], strides = [1, 1]} : vector<24x256xf32> to vector<24x16xf32>
    %116 = vector.broadcast %114 : vector<24x1xf32> to vector<24x16xf32>
    %117 = arith.mulf %116, %115 : vector<24x16xf32>
    %118 = arith.addf %113, %117 : vector<24x16xf32>
    %119 = vector.extract_strided_slice %49 {offsets = [0, 14], sizes = [24, 1], strides = [1, 1]} : vector<24x16xf32> to vector<24x1xf32>
    %120 = vector.extract_strided_slice %20 {offsets = [0, 224], sizes = [24, 16], strides = [1, 1]} : vector<24x256xf32> to vector<24x16xf32>
    %121 = vector.broadcast %119 : vector<24x1xf32> to vector<24x16xf32>
    %122 = arith.mulf %121, %120 : vector<24x16xf32>
    %123 = arith.addf %118, %122 : vector<24x16xf32>
    %124 = vector.extract_strided_slice %49 {offsets = [0, 15], sizes = [24, 1], strides = [1, 1]} : vector<24x16xf32> to vector<24x1xf32>
    %125 = vector.extract_strided_slice %20 {offsets = [0, 240], sizes = [24, 16], strides = [1, 1]} : vector<24x256xf32> to vector<24x16xf32>
    %126 = vector.broadcast %124 : vector<24x1xf32> to vector<24x16xf32>
    %127 = arith.mulf %126, %125 : vector<24x16xf32>
    %128 = arith.addf %123, %127 : vector<24x16xf32>
    %cst_62 = arith.constant dense<0.000000e+00> : vector<12x16xf32>
    %129 = tpu.matmul %22, %128, %cst_62 {dimension_numbers = #tpu.dot_dimension_numbers<[1], [0], [0], [1], [0, 0, 1, 1], [], []>} : vector<12x24xf32>, vector<24x16xf32>, vector<12x16xf32> -> vector<12x16xf32>
    %cst_63 = arith.constant dense<0.000000e+00> : vector<12x16xf32>
    %130 = tpu.matmul %7, %23, %cst_63 {dimension_numbers = #tpu.dot_dimension_numbers<[1], [0], [0], [1], [0, 0, 1, 1], [], []>} : vector<12x16xf32>, vector<16x16xf32>, vector<12x16xf32> -> vector<12x16xf32>
    %131 = arith.addf %129, %130 : vector<12x16xf32>
    %132 = vector.broadcast %24 : vector<1x16xf32> to vector<12x16xf32>
    %133 = arith.addf %131, %132 : vector<12x16xf32>
    %cst_64 = arith.constant 0.000000e+00 : f32
    %134 = vector.broadcast %cst_64 : f32 to vector<12x16xf32>
    %135 = arith.maximumf %133, %134 : vector<12x16xf32>
    %cst_65 = arith.constant dense<0.000000e+00> : vector<12x16xf32>
    %136 = tpu.matmul %135, %26, %cst_65 {dimension_numbers = #tpu.dot_dimension_numbers<[1], [0], [0], [1], [0, 0, 1, 1], [], []>} : vector<12x16xf32>, vector<16x16xf32>, vector<12x16xf32> -> vector<12x16xf32>
    %137 = vector.broadcast %38 : vector<1x16xf32> to vector<12x16xf32>
    %138 = arith.addf %136, %137 : vector<12x16xf32>
    %cst_66 = arith.constant dense<0.000000e+00> : vector<12x16xf32>
    %139 = tpu.matmul %7, %32, %cst_66 {dimension_numbers = #tpu.dot_dimension_numbers<[1], [0], [0], [1], [0, 0, 1, 1], [], []>} : vector<12x16xf32>, vector<16x16xf32>, vector<12x16xf32> -> vector<12x16xf32>
    %140 = arith.addf %138, %139 : vector<12x16xf32>
    %141 = vector.broadcast %44 : vector<1x16xf32> to vector<12x16xf32>
    %142 = arith.addf %140, %141 : vector<12x16xf32>
    %143 = arith.negf %142 : vector<12x16xf32>
    %144 = math.exp %143 : vector<12x16xf32>
    %cst_67 = arith.constant 1.000000e+00 : f32
    %145 = vector.broadcast %cst_67 : f32 to vector<12x16xf32>
    %146 = arith.addf %145, %144 : vector<12x16xf32>
    %147 = arith.divf %145, %146 : vector<12x16xf32>
    %cst_68 = arith.constant dense<0.000000e+00> : vector<12x16xf32>
    %148 = tpu.matmul %135, %28, %cst_68 {dimension_numbers = #tpu.dot_dimension_numbers<[1], [0], [0], [1], [0, 0, 1, 1], [], []>} : vector<12x16xf32>, vector<16x16xf32>, vector<12x16xf32> -> vector<12x16xf32>
    %149 = vector.broadcast %40 : vector<1x16xf32> to vector<12x16xf32>
    %150 = arith.addf %148, %149 : vector<12x16xf32>
    %cst_69 = arith.constant dense<0.000000e+00> : vector<12x16xf32>
    %151 = tpu.matmul %7, %34, %cst_69 {dimension_numbers = #tpu.dot_dimension_numbers<[1], [0], [0], [1], [0, 0, 1, 1], [], []>} : vector<12x16xf32>, vector<16x16xf32>, vector<12x16xf32> -> vector<12x16xf32>
    %152 = arith.addf %150, %151 : vector<12x16xf32>
    %153 = vector.broadcast %46 : vector<1x16xf32> to vector<12x16xf32>
    %154 = arith.addf %152, %153 : vector<12x16xf32>
    %155 = arith.negf %154 : vector<12x16xf32>
    %156 = math.exp %155 : vector<12x16xf32>
    %cst_70 = arith.constant 1.000000e+00 : f32
    %157 = vector.broadcast %cst_70 : f32 to vector<12x16xf32>
    %158 = arith.addf %157, %156 : vector<12x16xf32>
    %159 = arith.divf %157, %158 : vector<12x16xf32>
    %cst_71 = arith.constant dense<0.000000e+00> : vector<12x16xf32>
    %160 = tpu.matmul %135, %30, %cst_71 {dimension_numbers = #tpu.dot_dimension_numbers<[1], [0], [0], [1], [0, 0, 1, 1], [], []>} : vector<12x16xf32>, vector<16x16xf32>, vector<12x16xf32> -> vector<12x16xf32>
    %161 = vector.broadcast %42 : vector<1x16xf32> to vector<12x16xf32>
    %162 = arith.addf %160, %161 : vector<12x16xf32>
    %cst_72 = arith.constant dense<0.000000e+00> : vector<12x16xf32>
    %163 = tpu.matmul %7, %36, %cst_72 {dimension_numbers = #tpu.dot_dimension_numbers<[1], [0], [0], [1], [0, 0, 1, 1], [], []>} : vector<12x16xf32>, vector<16x16xf32>, vector<12x16xf32> -> vector<12x16xf32>
    %164 = vector.broadcast %48 : vector<1x16xf32> to vector<12x16xf32>
    %165 = arith.addf %163, %164 : vector<12x16xf32>
    %166 = arith.mulf %147, %165 : vector<12x16xf32>
    %167 = arith.addf %162, %166 : vector<12x16xf32>
    %168 = math.tanh %167 : vector<12x16xf32>
    %cst_73 = arith.constant 1.000000e+00 : f32
    %169 = vector.broadcast %cst_73 : f32 to vector<12x16xf32>
    %170 = arith.subf %169, %159 : vector<12x16xf32>
    %171 = arith.mulf %170, %168 : vector<12x16xf32>
    %172 = arith.mulf %159, %7 : vector<12x16xf32>
    %173 = arith.addf %171, %172 : vector<12x16xf32>
    %cst_74 = arith.constant dense<0.000000e+00> : vector<24x16xf32>
    %174 = tpu.matmul %21, %173, %cst_74 {dimension_numbers = #tpu.dot_dimension_numbers<[1], [0], [0], [1], [0, 0, 1, 1], [], []>} : vector<24x12xf32>, vector<12x16xf32>, vector<24x16xf32> -> vector<24x16xf32>
    %175 = vector.extract_strided_slice %174 {offsets = [0, 0], sizes = [24, 1], strides = [1, 1]} : vector<24x16xf32> to vector<24x1xf32>
    %176 = vector.extract_strided_slice %20 {offsets = [0, 0], sizes = [24, 16], strides = [1, 1]} : vector<24x256xf32> to vector<24x16xf32>
    %177 = vector.broadcast %175 : vector<24x1xf32> to vector<24x16xf32>
    %178 = arith.mulf %177, %176 : vector<24x16xf32>
    %179 = vector.extract_strided_slice %174 {offsets = [0, 1], sizes = [24, 1], strides = [1, 1]} : vector<24x16xf32> to vector<24x1xf32>
    %180 = vector.extract_strided_slice %20 {offsets = [0, 16], sizes = [24, 16], strides = [1, 1]} : vector<24x256xf32> to vector<24x16xf32>
    %181 = vector.broadcast %179 : vector<24x1xf32> to vector<24x16xf32>
    %182 = arith.mulf %181, %180 : vector<24x16xf32>
    %183 = arith.addf %178, %182 : vector<24x16xf32>
    %184 = vector.extract_strided_slice %174 {offsets = [0, 2], sizes = [24, 1], strides = [1, 1]} : vector<24x16xf32> to vector<24x1xf32>
    %185 = vector.extract_strided_slice %20 {offsets = [0, 32], sizes = [24, 16], strides = [1, 1]} : vector<24x256xf32> to vector<24x16xf32>
    %186 = vector.broadcast %184 : vector<24x1xf32> to vector<24x16xf32>
    %187 = arith.mulf %186, %185 : vector<24x16xf32>
    %188 = arith.addf %183, %187 : vector<24x16xf32>
    %189 = vector.extract_strided_slice %174 {offsets = [0, 3], sizes = [24, 1], strides = [1, 1]} : vector<24x16xf32> to vector<24x1xf32>
    %190 = vector.extract_strided_slice %20 {offsets = [0, 48], sizes = [24, 16], strides = [1, 1]} : vector<24x256xf32> to vector<24x16xf32>
    %191 = vector.broadcast %189 : vector<24x1xf32> to vector<24x16xf32>
    %192 = arith.mulf %191, %190 : vector<24x16xf32>
    %193 = arith.addf %188, %192 : vector<24x16xf32>
    %194 = vector.extract_strided_slice %174 {offsets = [0, 4], sizes = [24, 1], strides = [1, 1]} : vector<24x16xf32> to vector<24x1xf32>
    %195 = vector.extract_strided_slice %20 {offsets = [0, 64], sizes = [24, 16], strides = [1, 1]} : vector<24x256xf32> to vector<24x16xf32>
    %196 = vector.broadcast %194 : vector<24x1xf32> to vector<24x16xf32>
    %197 = arith.mulf %196, %195 : vector<24x16xf32>
    %198 = arith.addf %193, %197 : vector<24x16xf32>
    %199 = vector.extract_strided_slice %174 {offsets = [0, 5], sizes = [24, 1], strides = [1, 1]} : vector<24x16xf32> to vector<24x1xf32>
    %200 = vector.extract_strided_slice %20 {offsets = [0, 80], sizes = [24, 16], strides = [1, 1]} : vector<24x256xf32> to vector<24x16xf32>
    %201 = vector.broadcast %199 : vector<24x1xf32> to vector<24x16xf32>
    %202 = arith.mulf %201, %200 : vector<24x16xf32>
    %203 = arith.addf %198, %202 : vector<24x16xf32>
    %204 = vector.extract_strided_slice %174 {offsets = [0, 6], sizes = [24, 1], strides = [1, 1]} : vector<24x16xf32> to vector<24x1xf32>
    %205 = vector.extract_strided_slice %20 {offsets = [0, 96], sizes = [24, 16], strides = [1, 1]} : vector<24x256xf32> to vector<24x16xf32>
    %206 = vector.broadcast %204 : vector<24x1xf32> to vector<24x16xf32>
    %207 = arith.mulf %206, %205 : vector<24x16xf32>
    %208 = arith.addf %203, %207 : vector<24x16xf32>
    %209 = vector.extract_strided_slice %174 {offsets = [0, 7], sizes = [24, 1], strides = [1, 1]} : vector<24x16xf32> to vector<24x1xf32>
    %210 = vector.extract_strided_slice %20 {offsets = [0, 112], sizes = [24, 16], strides = [1, 1]} : vector<24x256xf32> to vector<24x16xf32>
    %211 = vector.broadcast %209 : vector<24x1xf32> to vector<24x16xf32>
    %212 = arith.mulf %211, %210 : vector<24x16xf32>
    %213 = arith.addf %208, %212 : vector<24x16xf32>
    %214 = vector.extract_strided_slice %174 {offsets = [0, 8], sizes = [24, 1], strides = [1, 1]} : vector<24x16xf32> to vector<24x1xf32>
    %215 = vector.extract_strided_slice %20 {offsets = [0, 128], sizes = [24, 16], strides = [1, 1]} : vector<24x256xf32> to vector<24x16xf32>
    %216 = vector.broadcast %214 : vector<24x1xf32> to vector<24x16xf32>
    %217 = arith.mulf %216, %215 : vector<24x16xf32>
    %218 = arith.addf %213, %217 : vector<24x16xf32>
    %219 = vector.extract_strided_slice %174 {offsets = [0, 9], sizes = [24, 1], strides = [1, 1]} : vector<24x16xf32> to vector<24x1xf32>
    %220 = vector.extract_strided_slice %20 {offsets = [0, 144], sizes = [24, 16], strides = [1, 1]} : vector<24x256xf32> to vector<24x16xf32>
    %221 = vector.broadcast %219 : vector<24x1xf32> to vector<24x16xf32>
    %222 = arith.mulf %221, %220 : vector<24x16xf32>
    %223 = arith.addf %218, %222 : vector<24x16xf32>
    %224 = vector.extract_strided_slice %174 {offsets = [0, 10], sizes = [24, 1], strides = [1, 1]} : vector<24x16xf32> to vector<24x1xf32>
    %225 = vector.extract_strided_slice %20 {offsets = [0, 160], sizes = [24, 16], strides = [1, 1]} : vector<24x256xf32> to vector<24x16xf32>
    %226 = vector.broadcast %224 : vector<24x1xf32> to vector<24x16xf32>
    %227 = arith.mulf %226, %225 : vector<24x16xf32>
    %228 = arith.addf %223, %227 : vector<24x16xf32>
    %229 = vector.extract_strided_slice %174 {offsets = [0, 11], sizes = [24, 1], strides = [1, 1]} : vector<24x16xf32> to vector<24x1xf32>
    %230 = vector.extract_strided_slice %20 {offsets = [0, 176], sizes = [24, 16], strides = [1, 1]} : vector<24x256xf32> to vector<24x16xf32>
    %231 = vector.broadcast %229 : vector<24x1xf32> to vector<24x16xf32>
    %232 = arith.mulf %231, %230 : vector<24x16xf32>
    %233 = arith.addf %228, %232 : vector<24x16xf32>
    %234 = vector.extract_strided_slice %174 {offsets = [0, 12], sizes = [24, 1], strides = [1, 1]} : vector<24x16xf32> to vector<24x1xf32>
    %235 = vector.extract_strided_slice %20 {offsets = [0, 192], sizes = [24, 16], strides = [1, 1]} : vector<24x256xf32> to vector<24x16xf32>
    %236 = vector.broadcast %234 : vector<24x1xf32> to vector<24x16xf32>
    %237 = arith.mulf %236, %235 : vector<24x16xf32>
    %238 = arith.addf %233, %237 : vector<24x16xf32>
    %239 = vector.extract_strided_slice %174 {offsets = [0, 13], sizes = [24, 1], strides = [1, 1]} : vector<24x16xf32> to vector<24x1xf32>
    %240 = vector.extract_strided_slice %20 {offsets = [0, 208], sizes = [24, 16], strides = [1, 1]} : vector<24x256xf32> to vector<24x16xf32>
    %241 = vector.broadcast %239 : vector<24x1xf32> to vector<24x16xf32>
    %242 = arith.mulf %241, %240 : vector<24x16xf32>
    %243 = arith.addf %238, %242 : vector<24x16xf32>
    %244 = vector.extract_strided_slice %174 {offsets = [0, 14], sizes = [24, 1], strides = [1, 1]} : vector<24x16xf32> to vector<24x1xf32>
    %245 = vector.extract_strided_slice %20 {offsets = [0, 224], sizes = [24, 16], strides = [1, 1]} : vector<24x256xf32> to vector<24x16xf32>
    %246 = vector.broadcast %244 : vector<24x1xf32> to vector<24x16xf32>
    %247 = arith.mulf %246, %245 : vector<24x16xf32>
    %248 = arith.addf %243, %247 : vector<24x16xf32>
    %249 = vector.extract_strided_slice %174 {offsets = [0, 15], sizes = [24, 1], strides = [1, 1]} : vector<24x16xf32> to vector<24x1xf32>
    %250 = vector.extract_strided_slice %20 {offsets = [0, 240], sizes = [24, 16], strides = [1, 1]} : vector<24x256xf32> to vector<24x16xf32>
    %251 = vector.broadcast %249 : vector<24x1xf32> to vector<24x16xf32>
    %252 = arith.mulf %251, %250 : vector<24x16xf32>
    %253 = arith.addf %248, %252 : vector<24x16xf32>
    %cst_75 = arith.constant dense<0.000000e+00> : vector<12x16xf32>
    %254 = tpu.matmul %22, %253, %cst_75 {dimension_numbers = #tpu.dot_dimension_numbers<[1], [0], [0], [1], [0, 0, 1, 1], [], []>} : vector<12x24xf32>, vector<24x16xf32>, vector<12x16xf32> -> vector<12x16xf32>
    %cst_76 = arith.constant dense<0.000000e+00> : vector<12x16xf32>
    %255 = tpu.matmul %173, %23, %cst_76 {dimension_numbers = #tpu.dot_dimension_numbers<[1], [0], [0], [1], [0, 0, 1, 1], [], []>} : vector<12x16xf32>, vector<16x16xf32>, vector<12x16xf32> -> vector<12x16xf32>
    %256 = arith.addf %254, %255 : vector<12x16xf32>
    %257 = vector.broadcast %24 : vector<1x16xf32> to vector<12x16xf32>
    %258 = arith.addf %256, %257 : vector<12x16xf32>
    %cst_77 = arith.constant 0.000000e+00 : f32
    %259 = vector.broadcast %cst_77 : f32 to vector<12x16xf32>
    %260 = arith.maximumf %258, %259 : vector<12x16xf32>
    %cst_78 = arith.constant dense<0.000000e+00> : vector<12x16xf32>
    %261 = tpu.matmul %260, %26, %cst_78 {dimension_numbers = #tpu.dot_dimension_numbers<[1], [0], [0], [1], [0, 0, 1, 1], [], []>} : vector<12x16xf32>, vector<16x16xf32>, vector<12x16xf32> -> vector<12x16xf32>
    %262 = vector.broadcast %38 : vector<1x16xf32> to vector<12x16xf32>
    %263 = arith.addf %261, %262 : vector<12x16xf32>
    %cst_79 = arith.constant dense<0.000000e+00> : vector<12x16xf32>
    %264 = tpu.matmul %173, %32, %cst_79 {dimension_numbers = #tpu.dot_dimension_numbers<[1], [0], [0], [1], [0, 0, 1, 1], [], []>} : vector<12x16xf32>, vector<16x16xf32>, vector<12x16xf32> -> vector<12x16xf32>
    %265 = arith.addf %263, %264 : vector<12x16xf32>
    %266 = vector.broadcast %44 : vector<1x16xf32> to vector<12x16xf32>
    %267 = arith.addf %265, %266 : vector<12x16xf32>
    %268 = arith.negf %267 : vector<12x16xf32>
    %269 = math.exp %268 : vector<12x16xf32>
    %cst_80 = arith.constant 1.000000e+00 : f32
    %270 = vector.broadcast %cst_80 : f32 to vector<12x16xf32>
    %271 = arith.addf %270, %269 : vector<12x16xf32>
    %272 = arith.divf %270, %271 : vector<12x16xf32>
    %cst_81 = arith.constant dense<0.000000e+00> : vector<12x16xf32>
    %273 = tpu.matmul %260, %28, %cst_81 {dimension_numbers = #tpu.dot_dimension_numbers<[1], [0], [0], [1], [0, 0, 1, 1], [], []>} : vector<12x16xf32>, vector<16x16xf32>, vector<12x16xf32> -> vector<12x16xf32>
    %274 = vector.broadcast %40 : vector<1x16xf32> to vector<12x16xf32>
    %275 = arith.addf %273, %274 : vector<12x16xf32>
    %cst_82 = arith.constant dense<0.000000e+00> : vector<12x16xf32>
    %276 = tpu.matmul %173, %34, %cst_82 {dimension_numbers = #tpu.dot_dimension_numbers<[1], [0], [0], [1], [0, 0, 1, 1], [], []>} : vector<12x16xf32>, vector<16x16xf32>, vector<12x16xf32> -> vector<12x16xf32>
    %277 = arith.addf %275, %276 : vector<12x16xf32>
    %278 = vector.broadcast %46 : vector<1x16xf32> to vector<12x16xf32>
    %279 = arith.addf %277, %278 : vector<12x16xf32>
    %280 = arith.negf %279 : vector<12x16xf32>
    %281 = math.exp %280 : vector<12x16xf32>
    %cst_83 = arith.constant 1.000000e+00 : f32
    %282 = vector.broadcast %cst_83 : f32 to vector<12x16xf32>
    %283 = arith.addf %282, %281 : vector<12x16xf32>
    %284 = arith.divf %282, %283 : vector<12x16xf32>
    %cst_84 = arith.constant dense<0.000000e+00> : vector<12x16xf32>
    %285 = tpu.matmul %260, %30, %cst_84 {dimension_numbers = #tpu.dot_dimension_numbers<[1], [0], [0], [1], [0, 0, 1, 1], [], []>} : vector<12x16xf32>, vector<16x16xf32>, vector<12x16xf32> -> vector<12x16xf32>
    %286 = vector.broadcast %42 : vector<1x16xf32> to vector<12x16xf32>
    %287 = arith.addf %285, %286 : vector<12x16xf32>
    %cst_85 = arith.constant dense<0.000000e+00> : vector<12x16xf32>
    %288 = tpu.matmul %173, %36, %cst_85 {dimension_numbers = #tpu.dot_dimension_numbers<[1], [0], [0], [1], [0, 0, 1, 1], [], []>} : vector<12x16xf32>, vector<16x16xf32>, vector<12x16xf32> -> vector<12x16xf32>
    %289 = vector.broadcast %48 : vector<1x16xf32> to vector<12x16xf32>
    %290 = arith.addf %288, %289 : vector<12x16xf32>
    %291 = arith.mulf %272, %290 : vector<12x16xf32>
    %292 = arith.addf %287, %291 : vector<12x16xf32>
    %293 = math.tanh %292 : vector<12x16xf32>
    %cst_86 = arith.constant 1.000000e+00 : f32
    %294 = vector.broadcast %cst_86 : f32 to vector<12x16xf32>
    %295 = arith.subf %294, %284 : vector<12x16xf32>
    %296 = arith.mulf %295, %293 : vector<12x16xf32>
    %297 = arith.mulf %284, %173 : vector<12x16xf32>
    %298 = arith.addf %296, %297 : vector<12x16xf32>
    %cst_87 = arith.constant dense<0.000000e+00> : vector<24x16xf32>
    %299 = tpu.matmul %21, %298, %cst_87 {dimension_numbers = #tpu.dot_dimension_numbers<[1], [0], [0], [1], [0, 0, 1, 1], [], []>} : vector<24x12xf32>, vector<12x16xf32>, vector<24x16xf32> -> vector<24x16xf32>
    %300 = vector.extract_strided_slice %299 {offsets = [0, 0], sizes = [24, 1], strides = [1, 1]} : vector<24x16xf32> to vector<24x1xf32>
    %301 = vector.extract_strided_slice %20 {offsets = [0, 0], sizes = [24, 16], strides = [1, 1]} : vector<24x256xf32> to vector<24x16xf32>
    %302 = vector.broadcast %300 : vector<24x1xf32> to vector<24x16xf32>
    %303 = arith.mulf %302, %301 : vector<24x16xf32>
    %304 = vector.extract_strided_slice %299 {offsets = [0, 1], sizes = [24, 1], strides = [1, 1]} : vector<24x16xf32> to vector<24x1xf32>
    %305 = vector.extract_strided_slice %20 {offsets = [0, 16], sizes = [24, 16], strides = [1, 1]} : vector<24x256xf32> to vector<24x16xf32>
    %306 = vector.broadcast %304 : vector<24x1xf32> to vector<24x16xf32>
    %307 = arith.mulf %306, %305 : vector<24x16xf32>
    %308 = arith.addf %303, %307 : vector<24x16xf32>
    %309 = vector.extract_strided_slice %299 {offsets = [0, 2], sizes = [24, 1], strides = [1, 1]} : vector<24x16xf32> to vector<24x1xf32>
    %310 = vector.extract_strided_slice %20 {offsets = [0, 32], sizes = [24, 16], strides = [1, 1]} : vector<24x256xf32> to vector<24x16xf32>
    %311 = vector.broadcast %309 : vector<24x1xf32> to vector<24x16xf32>
    %312 = arith.mulf %311, %310 : vector<24x16xf32>
    %313 = arith.addf %308, %312 : vector<24x16xf32>
    %314 = vector.extract_strided_slice %299 {offsets = [0, 3], sizes = [24, 1], strides = [1, 1]} : vector<24x16xf32> to vector<24x1xf32>
    %315 = vector.extract_strided_slice %20 {offsets = [0, 48], sizes = [24, 16], strides = [1, 1]} : vector<24x256xf32> to vector<24x16xf32>
    %316 = vector.broadcast %314 : vector<24x1xf32> to vector<24x16xf32>
    %317 = arith.mulf %316, %315 : vector<24x16xf32>
    %318 = arith.addf %313, %317 : vector<24x16xf32>
    %319 = vector.extract_strided_slice %299 {offsets = [0, 4], sizes = [24, 1], strides = [1, 1]} : vector<24x16xf32> to vector<24x1xf32>
    %320 = vector.extract_strided_slice %20 {offsets = [0, 64], sizes = [24, 16], strides = [1, 1]} : vector<24x256xf32> to vector<24x16xf32>
    %321 = vector.broadcast %319 : vector<24x1xf32> to vector<24x16xf32>
    %322 = arith.mulf %321, %320 : vector<24x16xf32>
    %323 = arith.addf %318, %322 : vector<24x16xf32>
    %324 = vector.extract_strided_slice %299 {offsets = [0, 5], sizes = [24, 1], strides = [1, 1]} : vector<24x16xf32> to vector<24x1xf32>
    %325 = vector.extract_strided_slice %20 {offsets = [0, 80], sizes = [24, 16], strides = [1, 1]} : vector<24x256xf32> to vector<24x16xf32>
    %326 = vector.broadcast %324 : vector<24x1xf32> to vector<24x16xf32>
    %327 = arith.mulf %326, %325 : vector<24x16xf32>
    %328 = arith.addf %323, %327 : vector<24x16xf32>
    %329 = vector.extract_strided_slice %299 {offsets = [0, 6], sizes = [24, 1], strides = [1, 1]} : vector<24x16xf32> to vector<24x1xf32>
    %330 = vector.extract_strided_slice %20 {offsets = [0, 96], sizes = [24, 16], strides = [1, 1]} : vector<24x256xf32> to vector<24x16xf32>
    %331 = vector.broadcast %329 : vector<24x1xf32> to vector<24x16xf32>
    %332 = arith.mulf %331, %330 : vector<24x16xf32>
    %333 = arith.addf %328, %332 : vector<24x16xf32>
    %334 = vector.extract_strided_slice %299 {offsets = [0, 7], sizes = [24, 1], strides = [1, 1]} : vector<24x16xf32> to vector<24x1xf32>
    %335 = vector.extract_strided_slice %20 {offsets = [0, 112], sizes = [24, 16], strides = [1, 1]} : vector<24x256xf32> to vector<24x16xf32>
    %336 = vector.broadcast %334 : vector<24x1xf32> to vector<24x16xf32>
    %337 = arith.mulf %336, %335 : vector<24x16xf32>
    %338 = arith.addf %333, %337 : vector<24x16xf32>
    %339 = vector.extract_strided_slice %299 {offsets = [0, 8], sizes = [24, 1], strides = [1, 1]} : vector<24x16xf32> to vector<24x1xf32>
    %340 = vector.extract_strided_slice %20 {offsets = [0, 128], sizes = [24, 16], strides = [1, 1]} : vector<24x256xf32> to vector<24x16xf32>
    %341 = vector.broadcast %339 : vector<24x1xf32> to vector<24x16xf32>
    %342 = arith.mulf %341, %340 : vector<24x16xf32>
    %343 = arith.addf %338, %342 : vector<24x16xf32>
    %344 = vector.extract_strided_slice %299 {offsets = [0, 9], sizes = [24, 1], strides = [1, 1]} : vector<24x16xf32> to vector<24x1xf32>
    %345 = vector.extract_strided_slice %20 {offsets = [0, 144], sizes = [24, 16], strides = [1, 1]} : vector<24x256xf32> to vector<24x16xf32>
    %346 = vector.broadcast %344 : vector<24x1xf32> to vector<24x16xf32>
    %347 = arith.mulf %346, %345 : vector<24x16xf32>
    %348 = arith.addf %343, %347 : vector<24x16xf32>
    %349 = vector.extract_strided_slice %299 {offsets = [0, 10], sizes = [24, 1], strides = [1, 1]} : vector<24x16xf32> to vector<24x1xf32>
    %350 = vector.extract_strided_slice %20 {offsets = [0, 160], sizes = [24, 16], strides = [1, 1]} : vector<24x256xf32> to vector<24x16xf32>
    %351 = vector.broadcast %349 : vector<24x1xf32> to vector<24x16xf32>
    %352 = arith.mulf %351, %350 : vector<24x16xf32>
    %353 = arith.addf %348, %352 : vector<24x16xf32>
    %354 = vector.extract_strided_slice %299 {offsets = [0, 11], sizes = [24, 1], strides = [1, 1]} : vector<24x16xf32> to vector<24x1xf32>
    %355 = vector.extract_strided_slice %20 {offsets = [0, 176], sizes = [24, 16], strides = [1, 1]} : vector<24x256xf32> to vector<24x16xf32>
    %356 = vector.broadcast %354 : vector<24x1xf32> to vector<24x16xf32>
    %357 = arith.mulf %356, %355 : vector<24x16xf32>
    %358 = arith.addf %353, %357 : vector<24x16xf32>
    %359 = vector.extract_strided_slice %299 {offsets = [0, 12], sizes = [24, 1], strides = [1, 1]} : vector<24x16xf32> to vector<24x1xf32>
    %360 = vector.extract_strided_slice %20 {offsets = [0, 192], sizes = [24, 16], strides = [1, 1]} : vector<24x256xf32> to vector<24x16xf32>
    %361 = vector.broadcast %359 : vector<24x1xf32> to vector<24x16xf32>
    %362 = arith.mulf %361, %360 : vector<24x16xf32>
    %363 = arith.addf %358, %362 : vector<24x16xf32>
    %364 = vector.extract_strided_slice %299 {offsets = [0, 13], sizes = [24, 1], strides = [1, 1]} : vector<24x16xf32> to vector<24x1xf32>
    %365 = vector.extract_strided_slice %20 {offsets = [0, 208], sizes = [24, 16], strides = [1, 1]} : vector<24x256xf32> to vector<24x16xf32>
    %366 = vector.broadcast %364 : vector<24x1xf32> to vector<24x16xf32>
    %367 = arith.mulf %366, %365 : vector<24x16xf32>
    %368 = arith.addf %363, %367 : vector<24x16xf32>
    %369 = vector.extract_strided_slice %299 {offsets = [0, 14], sizes = [24, 1], strides = [1, 1]} : vector<24x16xf32> to vector<24x1xf32>
    %370 = vector.extract_strided_slice %20 {offsets = [0, 224], sizes = [24, 16], strides = [1, 1]} : vector<24x256xf32> to vector<24x16xf32>
    %371 = vector.broadcast %369 : vector<24x1xf32> to vector<24x16xf32>
    %372 = arith.mulf %371, %370 : vector<24x16xf32>
    %373 = arith.addf %368, %372 : vector<24x16xf32>
    %374 = vector.extract_strided_slice %299 {offsets = [0, 15], sizes = [24, 1], strides = [1, 1]} : vector<24x16xf32> to vector<24x1xf32>
    %375 = vector.extract_strided_slice %20 {offsets = [0, 240], sizes = [24, 16], strides = [1, 1]} : vector<24x256xf32> to vector<24x16xf32>
    %376 = vector.broadcast %374 : vector<24x1xf32> to vector<24x16xf32>
    %377 = arith.mulf %376, %375 : vector<24x16xf32>
    %378 = arith.addf %373, %377 : vector<24x16xf32>
    %cst_88 = arith.constant dense<0.000000e+00> : vector<12x16xf32>
    %379 = tpu.matmul %22, %378, %cst_88 {dimension_numbers = #tpu.dot_dimension_numbers<[1], [0], [0], [1], [0, 0, 1, 1], [], []>} : vector<12x24xf32>, vector<24x16xf32>, vector<12x16xf32> -> vector<12x16xf32>
    %cst_89 = arith.constant dense<0.000000e+00> : vector<12x16xf32>
    %380 = tpu.matmul %298, %23, %cst_89 {dimension_numbers = #tpu.dot_dimension_numbers<[1], [0], [0], [1], [0, 0, 1, 1], [], []>} : vector<12x16xf32>, vector<16x16xf32>, vector<12x16xf32> -> vector<12x16xf32>
    %381 = arith.addf %379, %380 : vector<12x16xf32>
    %382 = vector.broadcast %24 : vector<1x16xf32> to vector<12x16xf32>
    %383 = arith.addf %381, %382 : vector<12x16xf32>
    %cst_90 = arith.constant 0.000000e+00 : f32
    %384 = vector.broadcast %cst_90 : f32 to vector<12x16xf32>
    %385 = arith.maximumf %383, %384 : vector<12x16xf32>
    %cst_91 = arith.constant dense<0.000000e+00> : vector<12x16xf32>
    %386 = tpu.matmul %385, %26, %cst_91 {dimension_numbers = #tpu.dot_dimension_numbers<[1], [0], [0], [1], [0, 0, 1, 1], [], []>} : vector<12x16xf32>, vector<16x16xf32>, vector<12x16xf32> -> vector<12x16xf32>
    %387 = vector.broadcast %38 : vector<1x16xf32> to vector<12x16xf32>
    %388 = arith.addf %386, %387 : vector<12x16xf32>
    %cst_92 = arith.constant dense<0.000000e+00> : vector<12x16xf32>
    %389 = tpu.matmul %298, %32, %cst_92 {dimension_numbers = #tpu.dot_dimension_numbers<[1], [0], [0], [1], [0, 0, 1, 1], [], []>} : vector<12x16xf32>, vector<16x16xf32>, vector<12x16xf32> -> vector<12x16xf32>
    %390 = arith.addf %388, %389 : vector<12x16xf32>
    %391 = vector.broadcast %44 : vector<1x16xf32> to vector<12x16xf32>
    %392 = arith.addf %390, %391 : vector<12x16xf32>
    %393 = arith.negf %392 : vector<12x16xf32>
    %394 = math.exp %393 : vector<12x16xf32>
    %cst_93 = arith.constant 1.000000e+00 : f32
    %395 = vector.broadcast %cst_93 : f32 to vector<12x16xf32>
    %396 = arith.addf %395, %394 : vector<12x16xf32>
    %397 = arith.divf %395, %396 : vector<12x16xf32>
    %cst_94 = arith.constant dense<0.000000e+00> : vector<12x16xf32>
    %398 = tpu.matmul %385, %28, %cst_94 {dimension_numbers = #tpu.dot_dimension_numbers<[1], [0], [0], [1], [0, 0, 1, 1], [], []>} : vector<12x16xf32>, vector<16x16xf32>, vector<12x16xf32> -> vector<12x16xf32>
    %399 = vector.broadcast %40 : vector<1x16xf32> to vector<12x16xf32>
    %400 = arith.addf %398, %399 : vector<12x16xf32>
    %cst_95 = arith.constant dense<0.000000e+00> : vector<12x16xf32>
    %401 = tpu.matmul %298, %34, %cst_95 {dimension_numbers = #tpu.dot_dimension_numbers<[1], [0], [0], [1], [0, 0, 1, 1], [], []>} : vector<12x16xf32>, vector<16x16xf32>, vector<12x16xf32> -> vector<12x16xf32>
    %402 = arith.addf %400, %401 : vector<12x16xf32>
    %403 = vector.broadcast %46 : vector<1x16xf32> to vector<12x16xf32>
    %404 = arith.addf %402, %403 : vector<12x16xf32>
    %405 = arith.negf %404 : vector<12x16xf32>
    %406 = math.exp %405 : vector<12x16xf32>
    %cst_96 = arith.constant 1.000000e+00 : f32
    %407 = vector.broadcast %cst_96 : f32 to vector<12x16xf32>
    %408 = arith.addf %407, %406 : vector<12x16xf32>
    %409 = arith.divf %407, %408 : vector<12x16xf32>
    %cst_97 = arith.constant dense<0.000000e+00> : vector<12x16xf32>
    %410 = tpu.matmul %385, %30, %cst_97 {dimension_numbers = #tpu.dot_dimension_numbers<[1], [0], [0], [1], [0, 0, 1, 1], [], []>} : vector<12x16xf32>, vector<16x16xf32>, vector<12x16xf32> -> vector<12x16xf32>
    %411 = vector.broadcast %42 : vector<1x16xf32> to vector<12x16xf32>
    %412 = arith.addf %410, %411 : vector<12x16xf32>
    %cst_98 = arith.constant dense<0.000000e+00> : vector<12x16xf32>
    %413 = tpu.matmul %298, %36, %cst_98 {dimension_numbers = #tpu.dot_dimension_numbers<[1], [0], [0], [1], [0, 0, 1, 1], [], []>} : vector<12x16xf32>, vector<16x16xf32>, vector<12x16xf32> -> vector<12x16xf32>
    %414 = vector.broadcast %48 : vector<1x16xf32> to vector<12x16xf32>
    %415 = arith.addf %413, %414 : vector<12x16xf32>
    %416 = arith.mulf %397, %415 : vector<12x16xf32>
    %417 = arith.addf %412, %416 : vector<12x16xf32>
    %418 = math.tanh %417 : vector<12x16xf32>
    %cst_99 = arith.constant 1.000000e+00 : f32
    %419 = vector.broadcast %cst_99 : f32 to vector<12x16xf32>
    %420 = arith.subf %419, %409 : vector<12x16xf32>
    %421 = arith.mulf %420, %418 : vector<12x16xf32>
    %422 = arith.mulf %409, %298 : vector<12x16xf32>
    %423 = arith.addf %421, %422 : vector<12x16xf32>
    %c0_100 = arith.constant 0 : index
    %c0_101 = arith.constant 0 : index
    %424 = vector.load %arg4[%c0_100, %c0_101] : memref<2x12xf32, #tpu.memory_space<vmem>>, vector<2x12xf32>
    %c0_102 = arith.constant 0 : index
    %c0_103 = arith.constant 0 : index
    %425 = vector.load %arg5[%c0_102, %c0_103] : memref<12x2xf32, #tpu.memory_space<vmem>>, vector<12x2xf32>
    %c0_104 = arith.constant 0 : index
    %c0_105 = arith.constant 0 : index
    %c0_106 = arith.constant 0 : index
    %426 = vector.load %arg18[%c0_104, %c0_105, %c0_106] : memref<4x16x16xf32, #tpu.memory_space<vmem>>, vector<1x16x16xf32>
    %427 = vector.shape_cast %426 : vector<1x16x16xf32> to vector<16x16xf32>
    %c1_107 = arith.constant 1 : index
    %c0_108 = arith.constant 0 : index
    %c0_109 = arith.constant 0 : index
    %428 = vector.load %arg18[%c1_107, %c0_108, %c0_109] : memref<4x16x16xf32, #tpu.memory_space<vmem>>, vector<1x16x16xf32>
    %429 = vector.shape_cast %428 : vector<1x16x16xf32> to vector<16x16xf32>
    %c2_110 = arith.constant 2 : index
    %c0_111 = arith.constant 0 : index
    %c0_112 = arith.constant 0 : index
    %430 = vector.load %arg18[%c2_110, %c0_111, %c0_112] : memref<4x16x16xf32, #tpu.memory_space<vmem>>, vector<1x16x16xf32>
    %431 = vector.shape_cast %430 : vector<1x16x16xf32> to vector<16x16xf32>
    %c3 = arith.constant 3 : index
    %c0_113 = arith.constant 0 : index
    %c0_114 = arith.constant 0 : index
    %432 = vector.load %arg18[%c3, %c0_113, %c0_114] : memref<4x16x16xf32, #tpu.memory_space<vmem>>, vector<1x16x16xf32>
    %433 = vector.shape_cast %432 : vector<1x16x16xf32> to vector<16x16xf32>
    %c0_115 = arith.constant 0 : index
    %c0_116 = arith.constant 0 : index
    %c0_117 = arith.constant 0 : index
    %434 = vector.load %arg19[%c0_115, %c0_116, %c0_117] : memref<4x16x16xf32, #tpu.memory_space<vmem>>, vector<1x16x16xf32>
    %435 = vector.shape_cast %434 : vector<1x16x16xf32> to vector<16x16xf32>
    %c1_118 = arith.constant 1 : index
    %c0_119 = arith.constant 0 : index
    %c0_120 = arith.constant 0 : index
    %436 = vector.load %arg19[%c1_118, %c0_119, %c0_120] : memref<4x16x16xf32, #tpu.memory_space<vmem>>, vector<1x16x16xf32>
    %437 = vector.shape_cast %436 : vector<1x16x16xf32> to vector<16x16xf32>
    %c2_121 = arith.constant 2 : index
    %c0_122 = arith.constant 0 : index
    %c0_123 = arith.constant 0 : index
    %438 = vector.load %arg19[%c2_121, %c0_122, %c0_123] : memref<4x16x16xf32, #tpu.memory_space<vmem>>, vector<1x16x16xf32>
    %439 = vector.shape_cast %438 : vector<1x16x16xf32> to vector<16x16xf32>
    %c3_124 = arith.constant 3 : index
    %c0_125 = arith.constant 0 : index
    %c0_126 = arith.constant 0 : index
    %440 = vector.load %arg19[%c3_124, %c0_125, %c0_126] : memref<4x16x16xf32, #tpu.memory_space<vmem>>, vector<1x16x16xf32>
    %441 = vector.shape_cast %440 : vector<1x16x16xf32> to vector<16x16xf32>
    %c0_127 = arith.constant 0 : index
    %c0_128 = arith.constant 0 : index
    %c0_129 = arith.constant 0 : index
    %442 = vector.load %arg20[%c0_127, %c0_128, %c0_129] : memref<4x16x16xf32, #tpu.memory_space<vmem>>, vector<1x16x16xf32>
    %443 = vector.shape_cast %442 : vector<1x16x16xf32> to vector<16x16xf32>
    %c1_130 = arith.constant 1 : index
    %c0_131 = arith.constant 0 : index
    %c0_132 = arith.constant 0 : index
    %444 = vector.load %arg20[%c1_130, %c0_131, %c0_132] : memref<4x16x16xf32, #tpu.memory_space<vmem>>, vector<1x16x16xf32>
    %445 = vector.shape_cast %444 : vector<1x16x16xf32> to vector<16x16xf32>
    %c2_133 = arith.constant 2 : index
    %c0_134 = arith.constant 0 : index
    %c0_135 = arith.constant 0 : index
    %446 = vector.load %arg20[%c2_133, %c0_134, %c0_135] : memref<4x16x16xf32, #tpu.memory_space<vmem>>, vector<1x16x16xf32>
    %447 = vector.shape_cast %446 : vector<1x16x16xf32> to vector<16x16xf32>
    %c3_136 = arith.constant 3 : index
    %c0_137 = arith.constant 0 : index
    %c0_138 = arith.constant 0 : index
    %448 = vector.load %arg20[%c3_136, %c0_137, %c0_138] : memref<4x16x16xf32, #tpu.memory_space<vmem>>, vector<1x16x16xf32>
    %449 = vector.shape_cast %448 : vector<1x16x16xf32> to vector<16x16xf32>
    %c0_139 = arith.constant 0 : index
    %c0_140 = arith.constant 0 : index
    %c0_141 = arith.constant 0 : index
    %450 = vector.load %arg21[%c0_139, %c0_140, %c0_141] : memref<4x1x16xf32, #tpu.memory_space<vmem>>, vector<1x1x16xf32>
    %451 = vector.shape_cast %450 : vector<1x1x16xf32> to vector<1x16xf32>
    %c1_142 = arith.constant 1 : index
    %c0_143 = arith.constant 0 : index
    %c0_144 = arith.constant 0 : index
    %452 = vector.load %arg21[%c1_142, %c0_143, %c0_144] : memref<4x1x16xf32, #tpu.memory_space<vmem>>, vector<1x1x16xf32>
    %453 = vector.shape_cast %452 : vector<1x1x16xf32> to vector<1x16xf32>
    %c2_145 = arith.constant 2 : index
    %c0_146 = arith.constant 0 : index
    %c0_147 = arith.constant 0 : index
    %454 = vector.load %arg21[%c2_145, %c0_146, %c0_147] : memref<4x1x16xf32, #tpu.memory_space<vmem>>, vector<1x1x16xf32>
    %455 = vector.shape_cast %454 : vector<1x1x16xf32> to vector<1x16xf32>
    %c3_148 = arith.constant 3 : index
    %c0_149 = arith.constant 0 : index
    %c0_150 = arith.constant 0 : index
    %456 = vector.load %arg21[%c3_148, %c0_149, %c0_150] : memref<4x1x16xf32, #tpu.memory_space<vmem>>, vector<1x1x16xf32>
    %457 = vector.shape_cast %456 : vector<1x1x16xf32> to vector<1x16xf32>
    %cst_151 = arith.constant 0.000000e+00 : f32
    %458 = vector.broadcast %cst_151 : f32 to vector<2x16xf32>
    %cst_152 = arith.constant 0.000000e+00 : f32
    %459 = vector.broadcast %cst_152 : f32 to vector<2x16xf32>
    %cst_153 = arith.constant 0.000000e+00 : f32
    %460 = vector.broadcast %cst_153 : f32 to vector<2x16xf32>
    %cst_154 = arith.constant 0.000000e+00 : f32
    %461 = vector.broadcast %cst_154 : f32 to vector<2x16xf32>
    %cst_155 = arith.constant dense<0.000000e+00> : vector<2x16xf32>
    %462 = tpu.matmul %458, %427, %cst_155 {dimension_numbers = #tpu.dot_dimension_numbers<[1], [0], [0], [1], [0, 0, 1, 1], [], []>} : vector<2x16xf32>, vector<16x16xf32>, vector<2x16xf32> -> vector<2x16xf32>
    %cst_156 = arith.constant dense<0.000000e+00> : vector<2x16xf32>
    %463 = tpu.matmul %459, %435, %cst_156 {dimension_numbers = #tpu.dot_dimension_numbers<[1], [0], [0], [1], [0, 0, 1, 1], [], []>} : vector<2x16xf32>, vector<16x16xf32>, vector<2x16xf32> -> vector<2x16xf32>
    %464 = arith.addf %462, %463 : vector<2x16xf32>
    %cst_157 = arith.constant dense<0.000000e+00> : vector<2x16xf32>
    %465 = tpu.matmul %460, %443, %cst_157 {dimension_numbers = #tpu.dot_dimension_numbers<[1], [0], [0], [1], [0, 0, 1, 1], [], []>} : vector<2x16xf32>, vector<16x16xf32>, vector<2x16xf32> -> vector<2x16xf32>
    %466 = arith.addf %464, %465 : vector<2x16xf32>
    %467 = vector.broadcast %451 : vector<1x16xf32> to vector<2x16xf32>
    %468 = arith.addf %466, %467 : vector<2x16xf32>
    %469 = arith.negf %468 : vector<2x16xf32>
    %470 = math.exp %469 : vector<2x16xf32>
    %cst_158 = arith.constant 1.000000e+00 : f32
    %471 = vector.broadcast %cst_158 : f32 to vector<2x16xf32>
    %472 = arith.addf %471, %470 : vector<2x16xf32>
    %473 = arith.divf %471, %472 : vector<2x16xf32>
    %cst_159 = arith.constant dense<0.000000e+00> : vector<2x16xf32>
    %474 = tpu.matmul %458, %429, %cst_159 {dimension_numbers = #tpu.dot_dimension_numbers<[1], [0], [0], [1], [0, 0, 1, 1], [], []>} : vector<2x16xf32>, vector<16x16xf32>, vector<2x16xf32> -> vector<2x16xf32>
    %cst_160 = arith.constant dense<0.000000e+00> : vector<2x16xf32>
    %475 = tpu.matmul %459, %437, %cst_160 {dimension_numbers = #tpu.dot_dimension_numbers<[1], [0], [0], [1], [0, 0, 1, 1], [], []>} : vector<2x16xf32>, vector<16x16xf32>, vector<2x16xf32> -> vector<2x16xf32>
    %476 = arith.addf %474, %475 : vector<2x16xf32>
    %cst_161 = arith.constant dense<0.000000e+00> : vector<2x16xf32>
    %477 = tpu.matmul %460, %445, %cst_161 {dimension_numbers = #tpu.dot_dimension_numbers<[1], [0], [0], [1], [0, 0, 1, 1], [], []>} : vector<2x16xf32>, vector<16x16xf32>, vector<2x16xf32> -> vector<2x16xf32>
    %478 = arith.addf %476, %477 : vector<2x16xf32>
    %479 = vector.broadcast %453 : vector<1x16xf32> to vector<2x16xf32>
    %480 = arith.addf %478, %479 : vector<2x16xf32>
    %481 = arith.negf %480 : vector<2x16xf32>
    %482 = math.exp %481 : vector<2x16xf32>
    %cst_162 = arith.constant 1.000000e+00 : f32
    %483 = vector.broadcast %cst_162 : f32 to vector<2x16xf32>
    %484 = arith.addf %483, %482 : vector<2x16xf32>
    %485 = arith.divf %483, %484 : vector<2x16xf32>
    %cst_163 = arith.constant dense<0.000000e+00> : vector<2x16xf32>
    %486 = tpu.matmul %458, %431, %cst_163 {dimension_numbers = #tpu.dot_dimension_numbers<[1], [0], [0], [1], [0, 0, 1, 1], [], []>} : vector<2x16xf32>, vector<16x16xf32>, vector<2x16xf32> -> vector<2x16xf32>
    %cst_164 = arith.constant dense<0.000000e+00> : vector<2x16xf32>
    %487 = tpu.matmul %459, %439, %cst_164 {dimension_numbers = #tpu.dot_dimension_numbers<[1], [0], [0], [1], [0, 0, 1, 1], [], []>} : vector<2x16xf32>, vector<16x16xf32>, vector<2x16xf32> -> vector<2x16xf32>
    %488 = arith.addf %486, %487 : vector<2x16xf32>
    %cst_165 = arith.constant dense<0.000000e+00> : vector<2x16xf32>
    %489 = tpu.matmul %460, %447, %cst_165 {dimension_numbers = #tpu.dot_dimension_numbers<[1], [0], [0], [1], [0, 0, 1, 1], [], []>} : vector<2x16xf32>, vector<16x16xf32>, vector<2x16xf32> -> vector<2x16xf32>
    %490 = arith.addf %488, %489 : vector<2x16xf32>
    %491 = vector.broadcast %455 : vector<1x16xf32> to vector<2x16xf32>
    %492 = arith.addf %490, %491 : vector<2x16xf32>
    %493 = math.tanh %492 : vector<2x16xf32>
    %cst_166 = arith.constant dense<0.000000e+00> : vector<2x16xf32>
    %494 = tpu.matmul %458, %433, %cst_166 {dimension_numbers = #tpu.dot_dimension_numbers<[1], [0], [0], [1], [0, 0, 1, 1], [], []>} : vector<2x16xf32>, vector<16x16xf32>, vector<2x16xf32> -> vector<2x16xf32>
    %cst_167 = arith.constant dense<0.000000e+00> : vector<2x16xf32>
    %495 = tpu.matmul %459, %441, %cst_167 {dimension_numbers = #tpu.dot_dimension_numbers<[1], [0], [0], [1], [0, 0, 1, 1], [], []>} : vector<2x16xf32>, vector<16x16xf32>, vector<2x16xf32> -> vector<2x16xf32>
    %496 = arith.addf %494, %495 : vector<2x16xf32>
    %cst_168 = arith.constant dense<0.000000e+00> : vector<2x16xf32>
    %497 = tpu.matmul %460, %449, %cst_168 {dimension_numbers = #tpu.dot_dimension_numbers<[1], [0], [0], [1], [0, 0, 1, 1], [], []>} : vector<2x16xf32>, vector<16x16xf32>, vector<2x16xf32> -> vector<2x16xf32>
    %498 = arith.addf %496, %497 : vector<2x16xf32>
    %499 = vector.broadcast %457 : vector<1x16xf32> to vector<2x16xf32>
    %500 = arith.addf %498, %499 : vector<2x16xf32>
    %501 = arith.negf %500 : vector<2x16xf32>
    %502 = math.exp %501 : vector<2x16xf32>
    %cst_169 = arith.constant 1.000000e+00 : f32
    %503 = vector.broadcast %cst_169 : f32 to vector<2x16xf32>
    %504 = arith.addf %503, %502 : vector<2x16xf32>
    %505 = arith.divf %503, %504 : vector<2x16xf32>
    %506 = arith.mulf %485, %461 : vector<2x16xf32>
    %507 = arith.mulf %473, %493 : vector<2x16xf32>
    %508 = arith.addf %506, %507 : vector<2x16xf32>
    %509 = math.tanh %508 : vector<2x16xf32>
    %510 = arith.mulf %505, %509 : vector<2x16xf32>
    %cst_170 = arith.constant dense<0.000000e+00> : vector<12x16xf32>
    %511 = tpu.matmul %425, %510, %cst_170 {dimension_numbers = #tpu.dot_dimension_numbers<[1], [0], [0], [1], [0, 0, 1, 1], [], []>} : vector<12x2xf32>, vector<2x16xf32>, vector<12x16xf32> -> vector<12x16xf32>
    %512 = arith.mulf %423, %511 : vector<12x16xf32>
    %cst_171 = arith.constant dense<0.000000e+00> : vector<12xf32>
    %513 = vector.multi_reduction <add>, %512, %cst_171 [1] : vector<12x16xf32> to vector<12xf32>
    %514 = vector.shape_cast %513 : vector<12xf32> to vector<12x1xf32>
    %cst_172 = arith.constant 5.000000e-01 : f32
    %515 = vector.broadcast %cst_172 : f32 to vector<12x2xf32>
    %516 = arith.cmpf ogt, %425, %515 : vector<12x2xf32>
    %cst_173 = arith.constant -1.000000e+30 : f32
    %517 = vector.shape_cast %514 : vector<12x1xf32> to vector<12x1xf32>
    %518 = vector.broadcast %517 : vector<12x1xf32> to vector<12x2xf32>
    %519 = vector.broadcast %cst_173 : f32 to vector<12x2xf32>
    %520 = arith.select %516, %518, %519 : vector<12x2xi1>, vector<12x2xf32>
    %cst_174 = arith.constant dense<0xFF800000> : vector<2xf32>
    %521 = vector.multi_reduction <maximumf>, %520, %cst_174 [0] : vector<12x2xf32> to vector<2xf32>
    %522 = vector.shape_cast %521 : vector<2xf32> to vector<1x2xf32>
    %523 = vector.broadcast %522 : vector<1x2xf32> to vector<12x2xf32>
    %524 = arith.mulf %425, %523 : vector<12x2xf32>
    %cst_175 = arith.constant dense<0.000000e+00> : vector<12xf32>
    %525 = vector.multi_reduction <add>, %524, %cst_175 [1] : vector<12x2xf32> to vector<12xf32>
    %526 = vector.shape_cast %525 : vector<12xf32> to vector<12x1xf32>
    %527 = arith.subf %514, %526 : vector<12x1xf32>
    %528 = math.exp %527 : vector<12x1xf32>
    %529 = vector.broadcast %528 : vector<12x1xf32> to vector<12x2xf32>
    %530 = arith.mulf %425, %529 : vector<12x2xf32>
    %cst_176 = arith.constant dense<0.000000e+00> : vector<2xf32>
    %531 = vector.multi_reduction <add>, %530, %cst_176 [0] : vector<12x2xf32> to vector<2xf32>
    %532 = vector.shape_cast %531 : vector<2xf32> to vector<1x2xf32>
    %533 = vector.broadcast %532 : vector<1x2xf32> to vector<12x2xf32>
    %534 = arith.mulf %425, %533 : vector<12x2xf32>
    %cst_177 = arith.constant dense<0.000000e+00> : vector<12xf32>
    %535 = vector.multi_reduction <add>, %534, %cst_177 [1] : vector<12x2xf32> to vector<12xf32>
    %536 = vector.shape_cast %535 : vector<12xf32> to vector<12x1xf32>
    %537 = arith.divf %528, %536 : vector<12x1xf32>
    %538 = vector.broadcast %537 : vector<12x1xf32> to vector<12x16xf32>
    %539 = arith.mulf %538, %423 : vector<12x16xf32>
    %cst_178 = arith.constant dense<0.000000e+00> : vector<2x16xf32>
    %540 = tpu.matmul %424, %539, %cst_178 {dimension_numbers = #tpu.dot_dimension_numbers<[1], [0], [0], [1], [0, 0, 1, 1], [], []>} : vector<2x12xf32>, vector<12x16xf32>, vector<2x16xf32> -> vector<2x16xf32>
    %cst_179 = arith.constant dense<0.000000e+00> : vector<2x16xf32>
    %541 = tpu.matmul %510, %427, %cst_179 {dimension_numbers = #tpu.dot_dimension_numbers<[1], [0], [0], [1], [0, 0, 1, 1], [], []>} : vector<2x16xf32>, vector<16x16xf32>, vector<2x16xf32> -> vector<2x16xf32>
    %cst_180 = arith.constant dense<0.000000e+00> : vector<2x16xf32>
    %542 = tpu.matmul %540, %435, %cst_180 {dimension_numbers = #tpu.dot_dimension_numbers<[1], [0], [0], [1], [0, 0, 1, 1], [], []>} : vector<2x16xf32>, vector<16x16xf32>, vector<2x16xf32> -> vector<2x16xf32>
    %543 = arith.addf %541, %542 : vector<2x16xf32>
    %cst_181 = arith.constant dense<0.000000e+00> : vector<2x16xf32>
    %544 = tpu.matmul %510, %443, %cst_181 {dimension_numbers = #tpu.dot_dimension_numbers<[1], [0], [0], [1], [0, 0, 1, 1], [], []>} : vector<2x16xf32>, vector<16x16xf32>, vector<2x16xf32> -> vector<2x16xf32>
    %545 = arith.addf %543, %544 : vector<2x16xf32>
    %546 = vector.broadcast %451 : vector<1x16xf32> to vector<2x16xf32>
    %547 = arith.addf %545, %546 : vector<2x16xf32>
    %548 = arith.negf %547 : vector<2x16xf32>
    %549 = math.exp %548 : vector<2x16xf32>
    %cst_182 = arith.constant 1.000000e+00 : f32
    %550 = vector.broadcast %cst_182 : f32 to vector<2x16xf32>
    %551 = arith.addf %550, %549 : vector<2x16xf32>
    %552 = arith.divf %550, %551 : vector<2x16xf32>
    %cst_183 = arith.constant dense<0.000000e+00> : vector<2x16xf32>
    %553 = tpu.matmul %510, %429, %cst_183 {dimension_numbers = #tpu.dot_dimension_numbers<[1], [0], [0], [1], [0, 0, 1, 1], [], []>} : vector<2x16xf32>, vector<16x16xf32>, vector<2x16xf32> -> vector<2x16xf32>
    %cst_184 = arith.constant dense<0.000000e+00> : vector<2x16xf32>
    %554 = tpu.matmul %540, %437, %cst_184 {dimension_numbers = #tpu.dot_dimension_numbers<[1], [0], [0], [1], [0, 0, 1, 1], [], []>} : vector<2x16xf32>, vector<16x16xf32>, vector<2x16xf32> -> vector<2x16xf32>
    %555 = arith.addf %553, %554 : vector<2x16xf32>
    %cst_185 = arith.constant dense<0.000000e+00> : vector<2x16xf32>
    %556 = tpu.matmul %510, %445, %cst_185 {dimension_numbers = #tpu.dot_dimension_numbers<[1], [0], [0], [1], [0, 0, 1, 1], [], []>} : vector<2x16xf32>, vector<16x16xf32>, vector<2x16xf32> -> vector<2x16xf32>
    %557 = arith.addf %555, %556 : vector<2x16xf32>
    %558 = vector.broadcast %453 : vector<1x16xf32> to vector<2x16xf32>
    %559 = arith.addf %557, %558 : vector<2x16xf32>
    %560 = arith.negf %559 : vector<2x16xf32>
    %561 = math.exp %560 : vector<2x16xf32>
    %cst_186 = arith.constant 1.000000e+00 : f32
    %562 = vector.broadcast %cst_186 : f32 to vector<2x16xf32>
    %563 = arith.addf %562, %561 : vector<2x16xf32>
    %564 = arith.divf %562, %563 : vector<2x16xf32>
    %cst_187 = arith.constant dense<0.000000e+00> : vector<2x16xf32>
    %565 = tpu.matmul %510, %431, %cst_187 {dimension_numbers = #tpu.dot_dimension_numbers<[1], [0], [0], [1], [0, 0, 1, 1], [], []>} : vector<2x16xf32>, vector<16x16xf32>, vector<2x16xf32> -> vector<2x16xf32>
    %cst_188 = arith.constant dense<0.000000e+00> : vector<2x16xf32>
    %566 = tpu.matmul %540, %439, %cst_188 {dimension_numbers = #tpu.dot_dimension_numbers<[1], [0], [0], [1], [0, 0, 1, 1], [], []>} : vector<2x16xf32>, vector<16x16xf32>, vector<2x16xf32> -> vector<2x16xf32>
    %567 = arith.addf %565, %566 : vector<2x16xf32>
    %cst_189 = arith.constant dense<0.000000e+00> : vector<2x16xf32>
    %568 = tpu.matmul %510, %447, %cst_189 {dimension_numbers = #tpu.dot_dimension_numbers<[1], [0], [0], [1], [0, 0, 1, 1], [], []>} : vector<2x16xf32>, vector<16x16xf32>, vector<2x16xf32> -> vector<2x16xf32>
    %569 = arith.addf %567, %568 : vector<2x16xf32>
    %570 = vector.broadcast %455 : vector<1x16xf32> to vector<2x16xf32>
    %571 = arith.addf %569, %570 : vector<2x16xf32>
    %572 = math.tanh %571 : vector<2x16xf32>
    %cst_190 = arith.constant dense<0.000000e+00> : vector<2x16xf32>
    %573 = tpu.matmul %510, %433, %cst_190 {dimension_numbers = #tpu.dot_dimension_numbers<[1], [0], [0], [1], [0, 0, 1, 1], [], []>} : vector<2x16xf32>, vector<16x16xf32>, vector<2x16xf32> -> vector<2x16xf32>
    %cst_191 = arith.constant dense<0.000000e+00> : vector<2x16xf32>
    %574 = tpu.matmul %540, %441, %cst_191 {dimension_numbers = #tpu.dot_dimension_numbers<[1], [0], [0], [1], [0, 0, 1, 1], [], []>} : vector<2x16xf32>, vector<16x16xf32>, vector<2x16xf32> -> vector<2x16xf32>
    %575 = arith.addf %573, %574 : vector<2x16xf32>
    %cst_192 = arith.constant dense<0.000000e+00> : vector<2x16xf32>
    %576 = tpu.matmul %510, %449, %cst_192 {dimension_numbers = #tpu.dot_dimension_numbers<[1], [0], [0], [1], [0, 0, 1, 1], [], []>} : vector<2x16xf32>, vector<16x16xf32>, vector<2x16xf32> -> vector<2x16xf32>
    %577 = arith.addf %575, %576 : vector<2x16xf32>
    %578 = vector.broadcast %457 : vector<1x16xf32> to vector<2x16xf32>
    %579 = arith.addf %577, %578 : vector<2x16xf32>
    %580 = arith.negf %579 : vector<2x16xf32>
    %581 = math.exp %580 : vector<2x16xf32>
    %cst_193 = arith.constant 1.000000e+00 : f32
    %582 = vector.broadcast %cst_193 : f32 to vector<2x16xf32>
    %583 = arith.addf %582, %581 : vector<2x16xf32>
    %584 = arith.divf %582, %583 : vector<2x16xf32>
    %585 = arith.mulf %564, %508 : vector<2x16xf32>
    %586 = arith.mulf %552, %572 : vector<2x16xf32>
    %587 = arith.addf %585, %586 : vector<2x16xf32>
    %588 = math.tanh %587 : vector<2x16xf32>
    %589 = arith.mulf %584, %588 : vector<2x16xf32>
    %cst_194 = arith.constant dense<0.000000e+00> : vector<12x16xf32>
    %590 = tpu.matmul %425, %589, %cst_194 {dimension_numbers = #tpu.dot_dimension_numbers<[1], [0], [0], [1], [0, 0, 1, 1], [], []>} : vector<12x2xf32>, vector<2x16xf32>, vector<12x16xf32> -> vector<12x16xf32>
    %591 = arith.mulf %423, %590 : vector<12x16xf32>
    %cst_195 = arith.constant dense<0.000000e+00> : vector<12xf32>
    %592 = vector.multi_reduction <add>, %591, %cst_195 [1] : vector<12x16xf32> to vector<12xf32>
    %593 = vector.shape_cast %592 : vector<12xf32> to vector<12x1xf32>
    %cst_196 = arith.constant 5.000000e-01 : f32
    %594 = vector.broadcast %cst_196 : f32 to vector<12x2xf32>
    %595 = arith.cmpf ogt, %425, %594 : vector<12x2xf32>
    %cst_197 = arith.constant -1.000000e+30 : f32
    %596 = vector.shape_cast %593 : vector<12x1xf32> to vector<12x1xf32>
    %597 = vector.broadcast %596 : vector<12x1xf32> to vector<12x2xf32>
    %598 = vector.broadcast %cst_197 : f32 to vector<12x2xf32>
    %599 = arith.select %595, %597, %598 : vector<12x2xi1>, vector<12x2xf32>
    %cst_198 = arith.constant dense<0xFF800000> : vector<2xf32>
    %600 = vector.multi_reduction <maximumf>, %599, %cst_198 [0] : vector<12x2xf32> to vector<2xf32>
    %601 = vector.shape_cast %600 : vector<2xf32> to vector<1x2xf32>
    %602 = vector.broadcast %601 : vector<1x2xf32> to vector<12x2xf32>
    %603 = arith.mulf %425, %602 : vector<12x2xf32>
    %cst_199 = arith.constant dense<0.000000e+00> : vector<12xf32>
    %604 = vector.multi_reduction <add>, %603, %cst_199 [1] : vector<12x2xf32> to vector<12xf32>
    %605 = vector.shape_cast %604 : vector<12xf32> to vector<12x1xf32>
    %606 = arith.subf %593, %605 : vector<12x1xf32>
    %607 = math.exp %606 : vector<12x1xf32>
    %608 = vector.broadcast %607 : vector<12x1xf32> to vector<12x2xf32>
    %609 = arith.mulf %425, %608 : vector<12x2xf32>
    %cst_200 = arith.constant dense<0.000000e+00> : vector<2xf32>
    %610 = vector.multi_reduction <add>, %609, %cst_200 [0] : vector<12x2xf32> to vector<2xf32>
    %611 = vector.shape_cast %610 : vector<2xf32> to vector<1x2xf32>
    %612 = vector.broadcast %611 : vector<1x2xf32> to vector<12x2xf32>
    %613 = arith.mulf %425, %612 : vector<12x2xf32>
    %cst_201 = arith.constant dense<0.000000e+00> : vector<12xf32>
    %614 = vector.multi_reduction <add>, %613, %cst_201 [1] : vector<12x2xf32> to vector<12xf32>
    %615 = vector.shape_cast %614 : vector<12xf32> to vector<12x1xf32>
    %616 = arith.divf %607, %615 : vector<12x1xf32>
    %617 = vector.broadcast %616 : vector<12x1xf32> to vector<12x16xf32>
    %618 = arith.mulf %617, %423 : vector<12x16xf32>
    %cst_202 = arith.constant dense<0.000000e+00> : vector<2x16xf32>
    %619 = tpu.matmul %424, %618, %cst_202 {dimension_numbers = #tpu.dot_dimension_numbers<[1], [0], [0], [1], [0, 0, 1, 1], [], []>} : vector<2x12xf32>, vector<12x16xf32>, vector<2x16xf32> -> vector<2x16xf32>
    %cst_203 = arith.constant dense<0.000000e+00> : vector<2x16xf32>
    %620 = tpu.matmul %589, %427, %cst_203 {dimension_numbers = #tpu.dot_dimension_numbers<[1], [0], [0], [1], [0, 0, 1, 1], [], []>} : vector<2x16xf32>, vector<16x16xf32>, vector<2x16xf32> -> vector<2x16xf32>
    %cst_204 = arith.constant dense<0.000000e+00> : vector<2x16xf32>
    %621 = tpu.matmul %619, %435, %cst_204 {dimension_numbers = #tpu.dot_dimension_numbers<[1], [0], [0], [1], [0, 0, 1, 1], [], []>} : vector<2x16xf32>, vector<16x16xf32>, vector<2x16xf32> -> vector<2x16xf32>
    %622 = arith.addf %620, %621 : vector<2x16xf32>
    %cst_205 = arith.constant dense<0.000000e+00> : vector<2x16xf32>
    %623 = tpu.matmul %589, %443, %cst_205 {dimension_numbers = #tpu.dot_dimension_numbers<[1], [0], [0], [1], [0, 0, 1, 1], [], []>} : vector<2x16xf32>, vector<16x16xf32>, vector<2x16xf32> -> vector<2x16xf32>
    %624 = arith.addf %622, %623 : vector<2x16xf32>
    %625 = vector.broadcast %451 : vector<1x16xf32> to vector<2x16xf32>
    %626 = arith.addf %624, %625 : vector<2x16xf32>
    %627 = arith.negf %626 : vector<2x16xf32>
    %628 = math.exp %627 : vector<2x16xf32>
    %cst_206 = arith.constant 1.000000e+00 : f32
    %629 = vector.broadcast %cst_206 : f32 to vector<2x16xf32>
    %630 = arith.addf %629, %628 : vector<2x16xf32>
    %631 = arith.divf %629, %630 : vector<2x16xf32>
    %cst_207 = arith.constant dense<0.000000e+00> : vector<2x16xf32>
    %632 = tpu.matmul %589, %429, %cst_207 {dimension_numbers = #tpu.dot_dimension_numbers<[1], [0], [0], [1], [0, 0, 1, 1], [], []>} : vector<2x16xf32>, vector<16x16xf32>, vector<2x16xf32> -> vector<2x16xf32>
    %cst_208 = arith.constant dense<0.000000e+00> : vector<2x16xf32>
    %633 = tpu.matmul %619, %437, %cst_208 {dimension_numbers = #tpu.dot_dimension_numbers<[1], [0], [0], [1], [0, 0, 1, 1], [], []>} : vector<2x16xf32>, vector<16x16xf32>, vector<2x16xf32> -> vector<2x16xf32>
    %634 = arith.addf %632, %633 : vector<2x16xf32>
    %cst_209 = arith.constant dense<0.000000e+00> : vector<2x16xf32>
    %635 = tpu.matmul %589, %445, %cst_209 {dimension_numbers = #tpu.dot_dimension_numbers<[1], [0], [0], [1], [0, 0, 1, 1], [], []>} : vector<2x16xf32>, vector<16x16xf32>, vector<2x16xf32> -> vector<2x16xf32>
    %636 = arith.addf %634, %635 : vector<2x16xf32>
    %637 = vector.broadcast %453 : vector<1x16xf32> to vector<2x16xf32>
    %638 = arith.addf %636, %637 : vector<2x16xf32>
    %639 = arith.negf %638 : vector<2x16xf32>
    %640 = math.exp %639 : vector<2x16xf32>
    %cst_210 = arith.constant 1.000000e+00 : f32
    %641 = vector.broadcast %cst_210 : f32 to vector<2x16xf32>
    %642 = arith.addf %641, %640 : vector<2x16xf32>
    %643 = arith.divf %641, %642 : vector<2x16xf32>
    %cst_211 = arith.constant dense<0.000000e+00> : vector<2x16xf32>
    %644 = tpu.matmul %589, %431, %cst_211 {dimension_numbers = #tpu.dot_dimension_numbers<[1], [0], [0], [1], [0, 0, 1, 1], [], []>} : vector<2x16xf32>, vector<16x16xf32>, vector<2x16xf32> -> vector<2x16xf32>
    %cst_212 = arith.constant dense<0.000000e+00> : vector<2x16xf32>
    %645 = tpu.matmul %619, %439, %cst_212 {dimension_numbers = #tpu.dot_dimension_numbers<[1], [0], [0], [1], [0, 0, 1, 1], [], []>} : vector<2x16xf32>, vector<16x16xf32>, vector<2x16xf32> -> vector<2x16xf32>
    %646 = arith.addf %644, %645 : vector<2x16xf32>
    %cst_213 = arith.constant dense<0.000000e+00> : vector<2x16xf32>
    %647 = tpu.matmul %589, %447, %cst_213 {dimension_numbers = #tpu.dot_dimension_numbers<[1], [0], [0], [1], [0, 0, 1, 1], [], []>} : vector<2x16xf32>, vector<16x16xf32>, vector<2x16xf32> -> vector<2x16xf32>
    %648 = arith.addf %646, %647 : vector<2x16xf32>
    %649 = vector.broadcast %455 : vector<1x16xf32> to vector<2x16xf32>
    %650 = arith.addf %648, %649 : vector<2x16xf32>
    %651 = math.tanh %650 : vector<2x16xf32>
    %cst_214 = arith.constant dense<0.000000e+00> : vector<2x16xf32>
    %652 = tpu.matmul %589, %433, %cst_214 {dimension_numbers = #tpu.dot_dimension_numbers<[1], [0], [0], [1], [0, 0, 1, 1], [], []>} : vector<2x16xf32>, vector<16x16xf32>, vector<2x16xf32> -> vector<2x16xf32>
    %cst_215 = arith.constant dense<0.000000e+00> : vector<2x16xf32>
    %653 = tpu.matmul %619, %441, %cst_215 {dimension_numbers = #tpu.dot_dimension_numbers<[1], [0], [0], [1], [0, 0, 1, 1], [], []>} : vector<2x16xf32>, vector<16x16xf32>, vector<2x16xf32> -> vector<2x16xf32>
    %654 = arith.addf %652, %653 : vector<2x16xf32>
    %cst_216 = arith.constant dense<0.000000e+00> : vector<2x16xf32>
    %655 = tpu.matmul %589, %449, %cst_216 {dimension_numbers = #tpu.dot_dimension_numbers<[1], [0], [0], [1], [0, 0, 1, 1], [], []>} : vector<2x16xf32>, vector<16x16xf32>, vector<2x16xf32> -> vector<2x16xf32>
    %656 = arith.addf %654, %655 : vector<2x16xf32>
    %657 = vector.broadcast %457 : vector<1x16xf32> to vector<2x16xf32>
    %658 = arith.addf %656, %657 : vector<2x16xf32>
    %659 = arith.negf %658 : vector<2x16xf32>
    %660 = math.exp %659 : vector<2x16xf32>
    %cst_217 = arith.constant 1.000000e+00 : f32
    %661 = vector.broadcast %cst_217 : f32 to vector<2x16xf32>
    %662 = arith.addf %661, %660 : vector<2x16xf32>
    %663 = arith.divf %661, %662 : vector<2x16xf32>
    %664 = arith.mulf %643, %587 : vector<2x16xf32>
    %665 = arith.mulf %631, %651 : vector<2x16xf32>
    %666 = arith.addf %664, %665 : vector<2x16xf32>
    %667 = math.tanh %666 : vector<2x16xf32>
    %668 = arith.mulf %663, %667 : vector<2x16xf32>
    %cst_218 = arith.constant dense<0.000000e+00> : vector<12x16xf32>
    %669 = tpu.matmul %425, %668, %cst_218 {dimension_numbers = #tpu.dot_dimension_numbers<[1], [0], [0], [1], [0, 0, 1, 1], [], []>} : vector<12x2xf32>, vector<2x16xf32>, vector<12x16xf32> -> vector<12x16xf32>
    %670 = arith.mulf %423, %669 : vector<12x16xf32>
    %cst_219 = arith.constant dense<0.000000e+00> : vector<12xf32>
    %671 = vector.multi_reduction <add>, %670, %cst_219 [1] : vector<12x16xf32> to vector<12xf32>
    %672 = vector.shape_cast %671 : vector<12xf32> to vector<12x1xf32>
    %cst_220 = arith.constant 5.000000e-01 : f32
    %673 = vector.broadcast %cst_220 : f32 to vector<12x2xf32>
    %674 = arith.cmpf ogt, %425, %673 : vector<12x2xf32>
    %cst_221 = arith.constant -1.000000e+30 : f32
    %675 = vector.shape_cast %672 : vector<12x1xf32> to vector<12x1xf32>
    %676 = vector.broadcast %675 : vector<12x1xf32> to vector<12x2xf32>
    %677 = vector.broadcast %cst_221 : f32 to vector<12x2xf32>
    %678 = arith.select %674, %676, %677 : vector<12x2xi1>, vector<12x2xf32>
    %cst_222 = arith.constant dense<0xFF800000> : vector<2xf32>
    %679 = vector.multi_reduction <maximumf>, %678, %cst_222 [0] : vector<12x2xf32> to vector<2xf32>
    %680 = vector.shape_cast %679 : vector<2xf32> to vector<1x2xf32>
    %681 = vector.broadcast %680 : vector<1x2xf32> to vector<12x2xf32>
    %682 = arith.mulf %425, %681 : vector<12x2xf32>
    %cst_223 = arith.constant dense<0.000000e+00> : vector<12xf32>
    %683 = vector.multi_reduction <add>, %682, %cst_223 [1] : vector<12x2xf32> to vector<12xf32>
    %684 = vector.shape_cast %683 : vector<12xf32> to vector<12x1xf32>
    %685 = arith.subf %672, %684 : vector<12x1xf32>
    %686 = math.exp %685 : vector<12x1xf32>
    %687 = vector.broadcast %686 : vector<12x1xf32> to vector<12x2xf32>
    %688 = arith.mulf %425, %687 : vector<12x2xf32>
    %cst_224 = arith.constant dense<0.000000e+00> : vector<2xf32>
    %689 = vector.multi_reduction <add>, %688, %cst_224 [0] : vector<12x2xf32> to vector<2xf32>
    %690 = vector.shape_cast %689 : vector<2xf32> to vector<1x2xf32>
    %691 = vector.broadcast %690 : vector<1x2xf32> to vector<12x2xf32>
    %692 = arith.mulf %425, %691 : vector<12x2xf32>
    %cst_225 = arith.constant dense<0.000000e+00> : vector<12xf32>
    %693 = vector.multi_reduction <add>, %692, %cst_225 [1] : vector<12x2xf32> to vector<12xf32>
    %694 = vector.shape_cast %693 : vector<12xf32> to vector<12x1xf32>
    %695 = arith.divf %686, %694 : vector<12x1xf32>
    %696 = vector.broadcast %695 : vector<12x1xf32> to vector<12x16xf32>
    %697 = arith.mulf %696, %423 : vector<12x16xf32>
    %cst_226 = arith.constant dense<0.000000e+00> : vector<2x16xf32>
    %698 = tpu.matmul %424, %697, %cst_226 {dimension_numbers = #tpu.dot_dimension_numbers<[1], [0], [0], [1], [0, 0, 1, 1], [], []>} : vector<2x12xf32>, vector<12x16xf32>, vector<2x16xf32> -> vector<2x16xf32>
    %c0_227 = arith.constant 0 : index
    %c0_228 = arith.constant 0 : index
    %699 = vector.load %arg22[%c0_227, %c0_228] : memref<16x12xf32, #tpu.memory_space<vmem>>, vector<16x12xf32>
    %cst_229 = arith.constant dense<0.000000e+00> : vector<2x12xf32>
    %700 = tpu.matmul %668, %699, %cst_229 {dimension_numbers = #tpu.dot_dimension_numbers<[1], [0], [0], [1], [0, 0, 1, 1], [], []>} : vector<2x16xf32>, vector<16x12xf32>, vector<2x12xf32> -> vector<2x12xf32>
    %c0_230 = arith.constant 0 : index
    %c0_231 = arith.constant 0 : index
    %701 = vector.load %arg23[%c0_230, %c0_231] : memref<16x12xf32, #tpu.memory_space<vmem>>, vector<16x12xf32>
    %cst_232 = arith.constant dense<0.000000e+00> : vector<2x12xf32>
    %702 = tpu.matmul %698, %701, %cst_232 {dimension_numbers = #tpu.dot_dimension_numbers<[1], [0], [0], [1], [0, 0, 1, 1], [], []>} : vector<2x16xf32>, vector<16x12xf32>, vector<2x12xf32> -> vector<2x12xf32>
    %703 = arith.addf %700, %702 : vector<2x12xf32>
    %c0_233 = arith.constant 0 : index
    %c0_234 = arith.constant 0 : index
    %704 = vector.load %arg24[%c0_233, %c0_234] : memref<1x12xf32, #tpu.memory_space<vmem>>, vector<1x12xf32>
    %705 = vector.broadcast %704 : vector<1x12xf32> to vector<2x12xf32>
    %706 = arith.addf %703, %705 : vector<2x12xf32>
    %cst_235 = arith.constant 0.000000e+00 : f32
    %707 = vector.broadcast %cst_235 : f32 to vector<2x12xf32>
    %708 = arith.maximumf %706, %707 : vector<2x12xf32>
    %c0_236 = arith.constant 0 : index
    %c0_237 = arith.constant 0 : index
    %709 = vector.load %arg25[%c0_236, %c0_237] : memref<2x12xf32, #tpu.memory_space<vmem>>, vector<2x12xf32>
    tpu.vector_store %arg25[%c0_236, %c0_237], %708 {strides = array<i32>} : memref<2x12xf32, #tpu.memory_space<vmem>>, vector<2x12xf32>,
    return
  }
}

</mosaic_0001>

<bundles_post_ra>
// kernel: tpu_custom_call.1
= control target key start
LH: loop header
LB: loop body
LE: loop exit
PB: predicated region body
PF: predicated region fallthrough
CT: control target
= control target key end

     0   :  { %s6950_s0 = inlined_call_operand.vmem [shape: f32[12,7], index: 0, kind: input, shape index: {}]   ;;  %s6951_s1 = inlined_call_operand.vmem [shape: f32[24,5], index: 1, kind: input, shape index: {}]   ;;  %s6952_s2 = inlined_call_operand.vmem [shape: f32[24,12], index: 2, kind: input, shape index: {}]   ;;  %s6953_s3 = inlined_call_operand.vmem [shape: f32[12,24], index: 3, kind: input, shape index: {}]   ;;  %s6954_s4 = inlined_call_operand.hbm [shape: f32[2,12], index: 4, kind: input, shape index: {}]   ;;  %s6955_s5 = inlined_call_operand.vmem [shape: f32[12,2], index: 5, kind: input, shape index: {}]   ;;  %s6956_s6 = inlined_call_operand.hbm [shape: f32[7,16], index: 6, kind: input, shape index: {}]   ;;  %s6957_s7 = inlined_call_operand.hbm [shape: f32[1,16], index: 7, kind: input, shape index: {}]   ;;  %s6958_s8 = inlined_call_operand.hbm [shape: f32[5,32], index: 8, kind: input, shape index: {}]   ;;  %s6959_s9 = inlined_call_operand.hbm [shape: f32[1,32], index: 9, kind: input, shape index: {}]   ;;  %s6960_s10 = inlined_call_operand.hbm [shape: f32[32,256], index: 10, kind: input, shape index: {}]   ;;  %s6961_s11 = inlined_call_operand.hbm [shape: f32[1,256], index: 11, kind: input, shape index: {}]   ;;  %s6962_s12 = inlined_call_operand.vmem [shape: f32[16,16], index: 12, kind: input, shape index: {}]   ;;  %s6963_s13 = inlined_call_operand.hbm [shape: f32[1,16], index: 13, kind: input, shape index: {}]   ;;  %s6964_s14 = inlined_call_operand.vmem [shape: f32[3,16,16], index: 14, kind: input, shape index: {}]   ;;  %s6965_s15 = inlined_call_operand.hbm [shape: f32[3,16,16], index: 15, kind: input, shape index: {}]   ;;  %s6966_s16 = inlined_call_operand.vmem [shape: f32[3,1,16], index: 16, kind: input, shape index: {}]   ;;  %s6967_s17 = inlined_call_operand.hbm [shape: f32[3,1,16], index: 17, kind: input, shape index: {}]   ;;  %s6968_s18 = inlined_call_operand.hbm [shape: f32[4,16,16], index: 18, kind: input, shape index: {}]   ;;  %s6969_s19 = inlined_call_operand.hbm [shape: f32[4,16,16], index: 19, kind: input, shape index: {}]   ;;  %s6970_s20 = inlined_call_operand.hbm [shape: f32[4,16,16], index: 20, kind: input, shape index: {}]   ;;  %s6971_s21 = inlined_call_operand.vmem [shape: f32[4,1,16], index: 21, kind: input, shape index: {}]   ;;  %s6972_s22 = inlined_call_operand.vmem [shape: f32[16,12], index: 22, kind: input, shape index: {}]   ;;  %s6973_s23 = inlined_call_operand.hbm [shape: f32[16,12], index: 23, kind: input, shape index: {}]   ;;  %s6974_s24 = inlined_call_operand.vmem [shape: f32[1,12], index: 24, kind: input, shape index: {}]   ;;  %s6975_s25 = inlined_call_operand.hbm [shape: f32[2,12], index: 25, kind: output, shape index: {}]  }
   0x1   :  { %7049 = sst [smem:[#allocation48_spill]] %s6950_s0 }
   0x2   :  { %7050 = sst [smem:[#allocation49_spill]] %s6951_s1 }
   0x3   :  { %7051 = sst [smem:[#allocation50_spill]] %s6952_s2 }
   0x4   :  { %7052 = sst [smem:[#allocation51_spill]] %s6953_s3 }
   0x5   :  { %7053 = sst [smem:[#allocation52_spill]] %s6954_s4 }
   0x6   :  { %7054 = sst [smem:[#allocation53_spill]] %s6955_s5 }
   0x7   :  { %7055 = sst [smem:[#allocation54_spill]] %s6956_s6 }
   0x8   :  { %7056 = sst [smem:[#allocation55_spill]] %s6957_s7 }
   0x9   :  { %7057 = sst [smem:[#allocation56_spill]] %s6958_s8 }
   0xa   :  { %7058 = sst [smem:[#allocation57_spill]] %s6959_s9 }
   0xb   :  { %7059 = sst [smem:[#allocation58_spill]] %s6975_s25 }
   0xc   :  { %30 = vsyncpa [#allocation3], 0 }
   0xd   :  { %31 = vsyncpa [#allocation6], 0 }
   0xe   :  { %32 = vsyncpa [#allocation9], 0 }
   0xf   :  { %33 = vsyncpa [#allocation12], 0 }
  0x10   :  { %34 = vsyncpa [#allocation15], 0 }
  0x11   :  { %35 = vsyncpa [#allocation18], 0 }
  0x12   :  { %36 = vsyncpa [#allocation21], 0 }
  0x13   :  { %37 = vsyncpa [#allocation24], 0  ;;  %s7060_s6 = sld [smem:[#allocation54_spill]] }
  0x19   :  { %s65_s30 = sshll.u32 %s7060_s6, 4  ;;  %s66_s30 = int_to_ptr.hbm [resolvable:$true] %s65_s30 }
  0x1a   :  { %38 = vsyncpa [#allocation4], 0  ;;  %s5265_s7 = smov [#allocation5]   ;;  %s7061_s8 = sld [smem:[#allocation56_spill]] }
  0x1b   :  { %s67_s3 = sshll.u32 %s5265_s7, 4  ;;  %s5266_s4 = smov [#allocation8]   ;;  %s68_s3 = int_to_ptr.vmem [resolvable:$true] %s67_s3 }
  0x1c   :  { %70 = dma.hbm_to_vmem [thread:$0]  %s66_s30, 128, %s68_s3, [#allocation6]  }
  0x1d   :  { %s89_s28 = sshll.u32 %s5266_s4, 4  ;;  %s108_s0 = sshll.u32 %s6960_s10, 4  ;;  %s90_s28 = int_to_ptr.vmem [resolvable:$true] %s89_s28  ;;  %s109_s0 = int_to_ptr.hbm [resolvable:$true] %s108_s0 }
  0x1e   :  { %s5267_s29 = smov [#allocation11]   ;;  %s135_s25 = sshll.u32 %s6963_s13, 4  ;;  %s136_s25 = int_to_ptr.hbm [resolvable:$true] %s135_s25 }
  0x1f   :  { %s110_s2 = sshll.u32 %s5267_s29, 4  ;;  %s5268_s26 = smov 256   ;;  %s111_s2 = int_to_ptr.vmem [resolvable:$true] %s110_s2 }
  0x20   :  { %s87_s27 = sshll.u32 %s7061_s8, 4  ;;  %s5269_s1 = smov 16   ;;  %s88_s27 = int_to_ptr.hbm [resolvable:$true] %s87_s27 }
  0x21   :  { %92 = dma.hbm_to_vmem [thread:$0]  %s88_s27, 128, %s90_s28, [#allocation9]  }
  0x22   :  { %116 = dma.hbm_to_vmem [thread:$0]  %s109_s0, 1024, %s111_s2, [#allocation12], %s5268_s26, %s5268_s26, %s5269_s1  }
  0x23   :  { %s5270_s30 = smov [#allocation14]   ;;  %s162_s10 = sshll.u32 %s6967_s17, 4  ;;  %s163_s10 = int_to_ptr.hbm [resolvable:$true] %s162_s10 }
  0x24   :  { %s137_s3 = sshll.u32 %s5270_s30, 4  ;;  %s5271_s27 = smov [#allocation17]   ;;  %s138_s3 = int_to_ptr.vmem [resolvable:$true] %s137_s3 }
  0x25   :  { %140 = dma.hbm_to_vmem [thread:$0]  %s136_s25, 16, %s138_s3, [#allocation15]  }
  0x26   :  { %s164_s28 = sshll.u32 %s5271_s27, 4  ;;  %s5272_s9 = smov 1   ;;  %s165_s28 = int_to_ptr.vmem [resolvable:$true] %s164_s28 }
  0x27   :  { %170 = dma.hbm_to_vmem [thread:$0]  %s163_s10, 48, %s165_s28, [#allocation18], %s5269_s1, %s5269_s1, %s5272_s9  }
  0x28   :  { %s188_s0 = sshll.u32 %s6969_s19, 4  ;;  %s5273_s29 = smov [#allocation20]   ;;  %s189_s0 = int_to_ptr.hbm [resolvable:$true] %s188_s0 }
  0x29   :  { %s190_s2 = sshll.u32 %s5273_s29, 4  ;;  %s7062_s7 = sld [smem:[#allocation52_spill]]  ;;  %s191_s2 = int_to_ptr.vmem [resolvable:$true] %s190_s2 }
  0x2a   :  { %s5274_s25 = smov 128   ;;  %s5275_s30 = smov 8  }
  0x2b   :  { %196 = dma.hbm_to_vmem [thread:$0]  %s189_s0, 1024, %s191_s2, [#allocation21], %s5274_s25, %s5274_s25, %s5275_s30  }
  0x2c   :  { %s5276_s3 = smov [#allocation2]   ;;  %s7063_s19 = sld [smem:[#allocation55_spill]] }
  0x2d   :  { %s54_s8 = sshll.u32 %s5276_s3, 4  ;;  %s7064_s13 = sld [smem:[#allocation57_spill]]  ;;  %s55_s8 = int_to_ptr.vmem [resolvable:$true] %s54_s8 }
  0x2e   :  { %s5277_s29 = smov [#allocation7]   ;;  %s5278_s0 = smov [#allocation10]  }
  0x2f   :  { %s52_s26 = sshll.u32 %s7062_s7, 4  ;;  %s78_s6 = sshll.u32 %s5277_s29, 4  ;;  %s53_s26 = int_to_ptr.hbm [resolvable:$true] %s52_s26  ;;  %s79_s6 = int_to_ptr.vmem [resolvable:$true] %s78_s6 }
  0x30   :  { %57 = dma.hbm_to_vmem [thread:$0]  %s53_s26, 32, %s55_s8, [#allocation3]  }
  0x31   :  { %s100_s2 = sshll.u32 %s5278_s0, 4  ;;  %s122_s3 = sshll.u32 %s6961_s11, 4  ;;  %s101_s2 = int_to_ptr.vmem [resolvable:$true] %s100_s2  ;;  %s123_s3 = int_to_ptr.hbm [resolvable:$true] %s122_s3 }
  0x32   :  { %s76_s27 = sshll.u32 %s7063_s19, 4  ;;  %s147_s8 = sshll.u32 %s6965_s15, 4  ;;  %s77_s27 = int_to_ptr.hbm [resolvable:$true] %s76_s27  ;;  %s148_s8 = int_to_ptr.hbm [resolvable:$true] %s147_s8 }
  0x33   :  { %s98_s5 = sshll.u32 %s7064_s13, 4  ;;  %s5279_s10 = smov [#allocation13]   ;;  %s99_s5 = int_to_ptr.hbm [resolvable:$true] %s98_s5 }
  0x34   :  { %81 = dma.hbm_to_vmem [thread:$0]  %s77_s27, 16, %s79_s6, [#allocation6]  }
  0x35   :  { %103 = dma.hbm_to_vmem [thread:$0]  %s99_s5, 16, %s101_s2, [#allocation9]  }
  0x36   :  { %s124_s19 = sshll.u32 %s5279_s10, 4  ;;  %s5280_s28 = smov [#allocation16]   ;;  %s125_s19 = int_to_ptr.vmem [resolvable:$true] %s124_s19 }
  0x37   :  { %127 = dma.hbm_to_vmem [thread:$0]  %s123_s3, 32, %s125_s19, [#allocation12]  }
  0x38   :  { %s149_s27 = sshll.u32 %s5280_s28, 4  ;;  %s175_s29 = sshll.u32 %s6968_s18, 4  ;;  %s150_s27 = int_to_ptr.vmem [resolvable:$true] %s149_s27  ;;  %s176_s29 = int_to_ptr.hbm [resolvable:$true] %s175_s29 }
  0x39   :  { %155 = dma.hbm_to_vmem [thread:$0]  %s148_s8, 768, %s150_s27, [#allocation15], %s5274_s25, %s5274_s25, %s5275_s30  }
  0x3a   :  { %s201_s15 = sshll.u32 %s6970_s20, 4  ;;  %s5281_s6 = smov [#allocation19]   ;;  %s202_s15 = int_to_ptr.hbm [resolvable:$true] %s201_s15 }
  0x3b   :  { %s177_s0 = sshll.u32 %s5281_s6, 4  ;;  %s5282_s2 = smov [#allocation22]   ;;  %s178_s0 = int_to_ptr.vmem [resolvable:$true] %s177_s0 }
  0x3c   :  { %183 = dma.hbm_to_vmem [thread:$0]  %s176_s29, 1024, %s178_s0, [#allocation18], %s5274_s25, %s5274_s25, %s5275_s30  }
  0x3d   :  { %s203_s18 = sshll.u32 %s5282_s2, 4  ;;  %s218_s3 = sshll.u32 %s6973_s23, 4  ;;  %s204_s18 = int_to_ptr.vmem [resolvable:$true] %s203_s18  ;;  %s219_s3 = int_to_ptr.hbm [resolvable:$true] %s218_s3 }
  0x3e   :  { %209 = dma.hbm_to_vmem [thread:$0]  %s202_s15, 1024, %s204_s18, [#allocation21], %s5274_s25, %s5274_s25, %s5275_s30  }
  0x3f   :  { %s5283_s20 = smov [#allocation23]  }
  0x40   :  { %s220_s4 = sshll.u32 %s5283_s20, 4  ;;  %s221_s4 = int_to_ptr.vmem [resolvable:$true] %s220_s4 }
  0x41   :  { %226 = dma.hbm_to_vmem [thread:$0]  %s219_s3, 256, %s221_s4, [#allocation24], %s5274_s25, %s5274_s25, %s5275_s30  }
  0x42   :  { %5247 = dma.done.wait [#allocation3], 32  }
  0x43   :  { %5248 = vsyncadd [#allocation3], 4294967264 }
  0x44   :  { %5249 = dma.done.wait [#allocation6], 144  }
  0x45   :  { %5250 = vsyncadd [#allocation6], 4294967152 }
  0x46   :  { %5251 = dma.done.wait [#allocation9], 144  }
  0x47   :  { %5252 = vsyncadd [#allocation9], 4294967152 }
  0x48   :  { %5253 = dma.done.wait [#allocation12], 1056  }
  0x49   :  { %5254 = vsyncadd [#allocation12], 4294966240 }
  0x4a   :  { %5255 = dma.done.wait [#allocation15], 784  }
  0x4b   :  { %5256 = vsyncadd [#allocation15], 4294966512 }
  0x4c   :  { %5257 = dma.done.wait [#allocation18], 1072  }
  0x4d   :  { %5258 = vsyncadd [#allocation18], 4294966224 }
  0x4e   :  { %5259 = dma.done.wait [#allocation21], 2048  }
  0x4f   :  { %5260 = vsyncadd [#allocation21], 4294965248 }
  0x50   :  { %5261 = dma.done.wait [#allocation24], 256  }
  0x51   :  { %5262 = vsyncadd [#allocation24], 4294967040  ;;  %vm299_vm0 = vcmask 1046528   ;;  %vm292_vm1 = vcmask 56320   ;;  %vm346_vm2 = vcmask 1044480   ;;  %s7065_s30 = sld [smem:[#allocation48_spill]] }
  0x52   :  { %v287_v0 = vld [vmem:[#allocation5] sm:$0x7f]  ;;  %vm336_vm3 = vcmask 39936   ;;  %v331_v2 = vld [vmem:[#allocation8] sm:$0x1f]  ;;  %s7066_s10 = sld [smem:[#allocation49_spill]] }
  0x53   :  { %4371 = vmatpush.msk.msra.mxu0 %vm299_vm0, %v287_v0  ;;  %4374 = vmatpush.msk.msra.mxu1 %vm346_vm2, %v331_v2  ;;  %v5516_v7 = vld [vmem:[%s6962_s12 + $0x8] sm:$0xff]  ;;  %v5522_v8 = vld [vmem:[%s6962_s12] sm:$0xff]  ;;  %vm985_vm4 = vcmask 130048   ;;  %vm499_vm5 = vcmask 1043456   ;;  %s7068_s18 = sld [smem:[#allocation50_spill]]  ;;  %vm489_vm6 = vcmask 97280  }
  0x54   :  { %v4703_v9 = vld [vmem:[#allocation7] ss:$0 sm:$0xff]  ;;  %v5538_v17 = vld [vmem:[#allocation16 + $0x8] sm:$0xff]  ;;  %v5542_v18 = vld [vmem:[#allocation16] sm:$0xff]  ;;  %vm393_vm7 = vcmask 261120   ;;  %v7007_v41 = vmov 5  }
  0x55   :  { %1005 = vmatpush.msrb.mxu1 %v5516_v7  ;;  %v478_v19 = vld [vmem:[#allocation16 + $0x28] sm:$0xff]  ;;  %v477_v20 = vld [vmem:[#allocation16 + $0x20] sm:$0xff]  ;;  %v4704_v24 = vld [vmem:[#allocation10] ss:$0 sm:$0xff]  ;;  %4562 = vset.pattern.permute.xlu2 %v7007_v41  ;;  %v6985_v42 = vmov 2   ;;  %v6997_v43 = vmov 1  }
  0x56   :  { %v385_v23 = vld [vmem:[#allocation11 + $0x30] sm:$0xff]  ;;  %v383_v26 = vld [vmem:[#allocation11 + $0x20] sm:$0xff]  ;;  %v386_v27 = vld [vmem:[#allocation11 + $0x38] sm:$0xff]  ;;  %4559 = vset.pattern.permute.xlu0 %v6985_v42  ;;  %4558 = vset.pattern.permute.xlu1 %v6997_v43  ;;  %v7001_v45 = vmov 6   ;;  %v7009_v46 = vmov 13   ;;  %v6981_v47 = vmov 3  }
  0x57   :  { %v285_v1 = vld [vmem:[%s7065_s30] sm:$0xff]  ;;  %v286_v4 = vld [vmem:[%s7065_s30 + $0x8] sm:$0xf]  ;;  %1006 = vmatpush.msrb.mxu1 %v5522_v8  ;;  %415 = vmatpush.msra.mxu2 %v385_v23  ;;  %v382_v31 = vld [vmem:[#allocation11 + $0x18] sm:$0xff]  ;;  %v6995_v48 = vmov 7   ;;  %v7003_v49 = vmov 15  }
  0x58   :  { %v328_v3 = vld [vmem:[%s7066_s10] sm:$0xff]  ;;  %4372 = vmatmul.msk.f32.vlgmr.msra.gmra.mxu0 %vm292_vm1, %v285_v1  ;;  %v329_v5 = vld [vmem:[%s7066_s10 + $0x8] sm:$0xff]  ;;  %v330_v6 = vld [vmem:[%s7066_s10 + $0x10] sm:$0xff]  ;;  %441 = vmatpush.msra.mxu3 %v386_v27  ;;  %v7011_v50 = vmov 4   ;;  %v6991_v51 = vmov 11   ;;  %v7005_v53 = vmov 9  }
  0x59   :  { %4375 = vmatmul.msk.f32.vlgmr.msra.gmra.mxu1 %vm336_vm3, %v328_v3  ;;  %v455_v16 = vld [vmem:[%s7068_s18] sm:$0xff]  ;;  %v456_v21 = vld [vmem:[%s7068_s18 + $0x8] sm:$0xff]  ;;  %v457_v22 = vld [vmem:[%s7068_s18 + $0x10] sm:$0xff]  ;;  %416 = vmatpush.msra.mxu2 %v383_v26  ;;  %v6987_v54 = vmov 12   ;;  %v6999_v55 = vmov 10   ;;  %v6983_v56 = vmov 0  }
  0x5a   :  { %v381_v29 = vld [vmem:[#allocation11 + $0x10] sm:$0xff]  ;;  %v384_v30 = vld [vmem:[#allocation11 + $0x28] sm:$0xff]  ;;  %v379_v33 = vld [vmem:[#allocation11] sm:$0xff]  ;;  %v6993_v57 = vmov 14   ;;  %v6989_v58 = vmov 8   ;;  %s5300_s4 = smov 32  }
  0x5b   :  { %442 = vmatpush.msra.mxu3 %v384_v30  ;;  %417 = vmatpush.msra.mxu2 %v381_v29  ;;  %v380_v34 = vld [vmem:[#allocation11 + $0x8] sm:$0xff]  ;;  %v5619_v61 = vld [vmem:[#allocation13] sm:$0x3]  ;;  %s5301_s23 = smov 112   ;;  %s5302_s25 = smov 96   ;;  %vm1014_vm8 = vcmask 195584  }
  0x5c   :  { %v5626_v62 = vperm.slane %v5619_v61, 0  ;;  %s5303_s30 = smov 80   ;;  %s5304_s26 = smov 64  }
  0x5d   :  { %443 = vmatpush.msra.mxu3 %v382_v31  ;;  %418 = vmatpush.msra.mxu2 %v379_v33  ;;  %s5305_s8 = smov 48   ;;  %s7071_s9 = sld [smem:[#allocation51_spill]] }
  0x5e   :  { %s5307_s11 = smov [#allocation25]  }
  0x5f   :  { %444 = vmatpush.msra.mxu3 %v380_v34  ;;  %s4352_s5 = sshll.u32 %s5307_s11, 4  ;;  %s4353_s5 = int_to_ptr.vmem [resolvable:$true] %s4352_s5 }
  0x60   :  { %4373 = vmatmul.msk.f32.gmra.mxu0 %vm292_vm1, %v286_v4 }
  0x61   :  { %4376 = vmatmul.msk.f32.gmra.mxu1 %vm336_vm3, %v329_v5 }
  0x69   :  { %4377 = vmatmul.msk.f32.gmra.mxu1 %vm336_vm3, %v330_v6 }
  0xd5   :  { %v320_v10 = vpop.f32.mrf.mxu0 }
  0xd6   :  { %v321_v11 = vadd.f32 %v4703_v9, %v320_v10  ;;  %v367_v25 = vpop.f32.mrf.mxu1 }
  0xd7   :  { %v368_v28 = vadd.f32 %v4704_v24, %v367_v25 }
  0xd8   :  { %v5525_v12 = vmax.f32 %v321_v11, 0.0 }
  0xd9   :  { %v376_v32 = vmax.f32 %v368_v28, 0.0 }
  0xda   :  { %4394 = vmatmul.msk.f32.vlgmr.msrb.gmra.mxu1 %vm985_vm4, %v5525_v12 }
  0xdb   :  { %4378 = vmatmul.msk.f32.vlgmr.msra.gmra.mxu2 %vm393_vm7, %v376_v32  ;;  %4381 = vmatmul.msk.f32.vlgmr.msra.gmra.mxu3 %vm393_vm7, %v376_v32 }
  0xdd   :  { %v323_v13 = vpop.f32.mrf.mxu0 }
  0xde   :  { %v324_v14 = vadd.f32 %v4703_v9, %v323_v13  ;;  %v370_v35 = vpop.f32.mrf.mxu1 }
  0xdf   :  { %v371_v36 = vadd.f32 %v4704_v24, %v370_v35 }
  0xe0   :  { %v5529_v15 = vmax.f32 %v324_v14, 0.0 }
  0xe1   :  { %v377_v37 = vmax.f32 %v371_v36, 0.0 }
  0xe2   :  { %7067 = vst [vmem:[#allocation35_spill] sm:$0xff] %v5529_v15  ;;  %4390 = vmatpush.msk.msrb.mxu0 %vm499_vm5, %v5529_v15  ;;  %4395 = vmatmul.msk.f32.gmra.mxu1 %vm985_vm4, %v5529_v15 }
  0xe3   :  { %4379 = vmatmul.msk.f32.gmra.mxu2 %vm393_vm7, %v377_v37  ;;  %4382 = vmatmul.msk.f32.gmra.mxu3 %vm393_vm7, %v377_v37 }
  0xe4   :  { %518 = vmatpush.msrb.mxu0 %v5525_v12 }
  0xe5   :  { %4391 = vmatmul.msk.f32.vlgmr.msrb.gmra.mxu0 %vm489_vm6, %v455_v16 }
  0xe6   :  { %1097 = vmatpush.msra.mxu0 %v5538_v17  ;;  %v373_v38 = vpop.f32.mrf.mxu1 }
  0xe7   :  { %v374_v39 = vadd.f32 %v4704_v24, %v373_v38 }
  0xe8   :  { %1098 = vmatpush.msra.mxu0 %v5542_v18 }
  0xe9   :  { %v378_v40 = vmax.f32 %v374_v39, 0.0 }
  0xea   :  { %1288 = vmatpush.msrb.mxu0 %v478_v19 }
  0xeb   :  { %4380 = vmatmul.msk.f32.gmra.mxu2 %vm393_vm7, %v378_v40  ;;  %4383 = vmatmul.msk.f32.gmra.mxu3 %vm393_vm7, %v378_v40 }
  0xec   :  { %1289 = vmatpush.msrb.mxu0 %v477_v20 }
  0xed   :  { %4392 = vmatmul.msk.f32.gmra.mxu0 %vm489_vm6, %v456_v21 }
  0xf5   :  { %4393 = vmatmul.msk.f32.gmra.mxu0 %vm489_vm6, %v457_v22 }
  0xfd   :  { %4400 = vmatmul.msk.f32.vlgmr.msra.gmra.mxu0 %vm985_vm4, %v5525_v12 }
 0x105   :  { %4401 = vmatmul.msk.f32.gmra.mxu0 %vm985_vm4, %v5529_v15 }
 0x10d   :  { %4412 = vmatmul.msk.f32.vlgmr.msrb.gmra.mxu0 %vm985_vm4, %v5525_v12 }
 0x115   :  { %4413 = vmatmul.msk.f32.gmra.mxu0 %vm985_vm4, %v5529_v15 }
 0x15e   :  { %v420_v63 = vpop.f32.mrf.mxu2 }
 0x15f   :  { %v5629_v0 = vadd.f32 %v420_v63, %v5626_v62 }
 0x162   :  { %v520_v44 = vpop.f32.mrf.mxu0 }
 0x163   :  { %668 = vperm.xlu2 %4562, %v520_v44   ;;  %578 = vperm.xlu0 %4559, %v520_v44  }
 0x164   :  { %548 = vperm.xlu1 %4558, %v520_v44  }
 0x166   :  { %v423_v19 = vpop.f32.mrf.mxu2 }
 0x167   :  { %v5670_v21 = vadd.f32 %v423_v19, %v5626_v62  ;;  %v446_v19 = vpop.f32.mrf.mxu3 }
 0x169   :  { %7069 = vst [vmem:[#allocation36_spill] sm:$0xff] %v5670_v21 }
 0x16a   :  { %v5579_v52 = vpop.f32.mrf.mxu0 }
 0x16b   :  { %4563 = vset.pattern.permute.xlu2 %v7001_v45  ;;  %4569 = vset.pattern.permute.xlu0 %v7009_v46 }
 0x16c   :  { %4560 = vset.pattern.permute.xlu1 %v6981_v47  ;;  %698 = vperm.xlu2 %4563, %v520_v44  }
 0x16d   :  { %896 = vperm.xlu0 %4569, %v520_v44   ;;  %608 = vperm.xlu1 %4560, %v520_v44  }
 0x16e   :  { %v426_v39 = vpop.f32.mrf.mxu2 }
 0x16f   :  { %v5709_v63 = vadd.f32 %v426_v39, %v5626_v62 }
 0x171   :  { %7070 = vst [vmem:[#allocation37_spill] sm:$0xff] %v5709_v63 }
 0x172   :  { %v5594_v59 = vpop.f32.mrf.mxu0 }
 0x174   :  { %4564 = vset.pattern.permute.xlu2 %v6995_v48 }
 0x175   :  { %4571 = vset.pattern.permute.xlu0 %v7003_v49  ;;  %4561 = vset.pattern.permute.xlu1 %v7011_v50 }
 0x176   :  { %728 = vperm.xlu2 %4564, %v520_v44   ;;  %956 = vperm.xlu0 %4571, %v520_v44  }
 0x177   :  { %638 = vperm.xlu1 %4561, %v520_v44  }
 0x17e   :  { %4567 = vset.pattern.permute.xlu2 %v6991_v51  ;;  %4574 = vset.pattern.permute.xlu0 %v6997_v43 }
 0x17f   :  { %4565 = vset.pattern.permute.xlu1 %v7005_v53  ;;  %836 = vperm.xlu2 %4567, %v520_v44  }
 0x180   :  { %776 = vperm.xlu1 %4565, %v520_v44   ;;  %552 = vperm.xlu0 %4574, %v5579_v52  }
 0x187   :  { %4568 = vset.pattern.permute.xlu2 %v6987_v54 }
 0x188   :  { %4566 = vset.pattern.permute.xlu1 %v6999_v55  ;;  %866 = vperm.xlu2 %4568, %v520_v44  }
 0x189   :  { %806 = vperm.xlu1 %4566, %v520_v44   ;;  %4579 = vset.pattern.permute.xlu0 %v7001_v45 }
 0x18a   :  { %702 = vperm.xlu0 %4579, %v5579_v52  }
 0x190   :  { %4572 = vset.pattern.permute.xlu2 %v6983_v56 }
 0x191   :  { %4570 = vset.pattern.permute.xlu1 %v6993_v57  ;;  %531 = vperm.xlu2 %4572, %v520_v44  }
 0x192   :  { %926 = vperm.xlu1 %4570, %v520_v44   ;;  %4584 = vset.pattern.permute.xlu0 %v6987_v54 }
 0x193   :  { %870 = vperm.xlu0 %4584, %v5579_v52  }
 0x199   :  { %4575 = vset.pattern.permute.xlu2 %v6985_v42 }
 0x19a   :  { %4573 = vset.pattern.permute.xlu1 %v6989_v58  ;;  %582 = vperm.xlu2 %4575, %v5579_v52  }
 0x19b   :  { %758 = vperm.xlu1 %4573, %v520_v44   ;;  %4590 = vset.pattern.permute.xlu0 %v6997_v43 }
 0x19c   :  { %556 = vperm.xlu0 %4590, %v5594_v59  }
 0x1a2   :  { %4577 = vset.pattern.permute.xlu2 %v7011_v50 }
 0x1a3   :  { %4576 = vset.pattern.permute.xlu1 %v6981_v47  ;;  %642 = vperm.xlu2 %4577, %v5579_v52  }
 0x1a4   :  { %612 = vperm.xlu1 %4576, %v5579_v52   ;;  %4594 = vset.pattern.permute.xlu0 %v7007_v41 }
 0x1a5   :  { %676 = vperm.xlu0 %4594, %v5594_v59  }
 0x1ab   :  { %4578 = vset.pattern.permute.xlu2 %v7007_v41 }
 0x1ac   :  { %4580 = vset.pattern.permute.xlu1 %v6995_v48  ;;  %672 = vperm.xlu2 %4578, %v5579_v52  }
 0x1ad   :  { %732 = vperm.xlu1 %4580, %v5579_v52   ;;  %4597 = vset.pattern.permute.xlu0 %v7005_v53 }
 0x1ae   :  { %784 = vperm.xlu0 %4597, %v5594_v59  }
 0x1b4   :  { %4582 = vset.pattern.permute.xlu2 %v6999_v55 }
 0x1b5   :  { %4581 = vset.pattern.permute.xlu1 %v7005_v53  ;;  %810 = vperm.xlu2 %4582, %v5579_v52  }
 0x1b6   :  { %780 = vperm.xlu1 %4581, %v5579_v52   ;;  %4599 = vset.pattern.permute.xlu0 %v6991_v51 }
 0x1b7   :  { %844 = vperm.xlu0 %4599, %v5594_v59  }
 0x1bd   :  { %4583 = vset.pattern.permute.xlu2 %v6991_v51  ;;  %v5617_v60 = vpop.permute.xlu2 %668 }
 0x1be   :  { %4585 = vset.pattern.permute.xlu1 %v7009_v46  ;;  %840 = vperm.xlu2 %4583, %v5579_v52  }
 0x1bf   :  { %900 = vperm.xlu1 %4585, %v5579_v52   ;;  %4607 = vset.pattern.permute.xlu0 %v6985_v42 }
 0x1c6   :  { %4587 = vset.pattern.permute.xlu2 %v7003_v49  ;;  %v699_v1 = vpop.permute.xlu2 %698 }
 0x1c7   :  { %4586 = vset.pattern.permute.xlu1 %v6993_v57  ;;  %v709_v2 = vmul.f32 %v699_v1, %v5629_v0  ;;  %960 = vperm.xlu2 %4587, %v5579_v52  }
 0x1c8   :  { %930 = vperm.xlu1 %4586, %v5579_v52  }
 0x1c9   :  { %715 = vrot.lane.b32.xlu0 %v709_v2, %s5300_s4 }
 0x1cf   :  { %4588 = vset.pattern.permute.xlu2 %v6983_v56 }
 0x1d0   :  { %4591 = vset.pattern.permute.xlu1 %v6985_v42  ;;  %v729_v3 = vpop.permute.xlu2 %728  ;;  %536 = vperm.xlu2 %4588, %v5579_v52  }
 0x1d1   :  { %586 = vperm.xlu1 %4591, %v5594_v59   ;;  %v739_v4 = vmul.f32 %v729_v3, %v5629_v0 }
 0x1d3   :  { %745 = vrot.lane.b32.xlu0 %v739_v4, %s5269_s1 }
 0x1d5   :  { %v579_v5 = vpop.permute.xlu0 %578 }
 0x1d6   :  { %v549_v6 = vpop.permute.xlu1 %548  ;;  %v589_v38 = vmul.f32 %v579_v5, %v5629_v0 }
 0x1d7   :  { %v559_v34 = vmul.f32 %v549_v6, %v5629_v0 }
 0x1d8   :  { %4589 = vset.pattern.permute.xlu2 %v6989_v58 }
 0x1d9   :  { %4595 = vset.pattern.permute.xlu1 %v7001_v45  ;;  %762 = vperm.xlu2 %4589, %v5579_v52   ;;  %v5647_v9 = vpop.permute.xlu2 %836 }
 0x1da   :  { %706 = vperm.xlu1 %4595, %v5594_v59  }
 0x1df   :  { %v5649_v10 = vpop.permute.xlu0 %896  ;;  %v5651_v11 = vpop.permute.xlu1 %608 }
 0x1e0   :  { %v619_v2 = vmul.f32 %v5651_v11, %v5629_v0 }
 0x1e1   :  { %4592 = vset.pattern.permute.xlu2 %v6981_v47 }
 0x1e2   :  { %4596 = vset.pattern.permute.xlu1 %v6995_v48  ;;  %616 = vperm.xlu2 %4592, %v5594_v59   ;;  %v5657_v13 = vpop.permute.xlu2 %866 }
 0x1e3   :  { %736 = vperm.xlu1 %4596, %v5594_v59  }
 0x1e8   :  { %v5659_v14 = vpop.permute.xlu0 %956 }
 0x1e9   :  { %v5661_v16 = vpop.permute.xlu1 %638 }
 0x1ea   :  { %4593 = vset.pattern.permute.xlu2 %v7011_v50  ;;  %v649_v62 = vmul.f32 %v5661_v16, %v5629_v0 }
 0x1eb   :  { %4600 = vset.pattern.permute.xlu1 %v6987_v54  ;;  %646 = vperm.xlu2 %4593, %v5594_v59   ;;  %v5667_v20 = vpop.permute.xlu2 %531 }
 0x1ec   :  { %874 = vperm.xlu1 %4600, %v5594_v59   ;;  %v544_v54 = vmul.f32 %v5667_v20, %v5629_v0 }
 0x1f2   :  { %v5672_v22 = vpop.permute.xlu1 %776  ;;  %v553_v23 = vpop.permute.xlu0 %552 }
 0x1f3   :  { %v560_v24 = vmul.f32 %v553_v23, %v5670_v21  ;;  %4598 = vset.pattern.permute.xlu2 %v6999_v55 }
 0x1f4   :  { %4601 = vset.pattern.permute.xlu1 %v7009_v46  ;;  %814 = vperm.xlu2 %4598, %v5594_v59   ;;  %v583_v25 = vpop.permute.xlu2 %582 }
 0x1f5   :  { %904 = vperm.xlu1 %4601, %v5594_v59   ;;  %567 = vrot.lane.b32.xlu0 %v560_v24, %s5301_s23  ;;  %v590_v26 = vmul.f32 %v583_v25, %v5670_v21  ;;  %v449_v24 = vpop.f32.mrf.mxu3  ;;  %v390_v25 = vperm.slane %v5619_v61, 1 }
 0x1fb   :  { %v5681_v27 = vpop.permute.xlu1 %806 }
 0x1fc   :  { %4602 = vset.pattern.permute.xlu2 %v6993_v57  ;;  %v703_v32 = vpop.permute.xlu0 %702 }
 0x1fd   :  { %4604 = vset.pattern.permute.xlu1 %v6983_v56  ;;  %597 = vrot.lane.b32.xlu0 %v590_v26, %s5302_s25  ;;  %v643_v28 = vpop.permute.xlu2 %642  ;;  %v710_v23 = vmul.f32 %v703_v32, %v5670_v21  ;;  %v5733_v32 = vadd.f32 %v446_v19, %v390_v25 }
 0x1fe   :  { %934 = vperm.xlu2 %4602, %v5594_v59   ;;  %541 = vperm.xlu1 %4604, %v5594_v59   ;;  %v650_v40 = vmul.f32 %v643_v28, %v5670_v21  ;;  %v5726_v28 = vadd.f32 %v449_v24, %v390_v25 }
 0x1ff   :  { %v787_v61 = vmul.f32 %v5672_v22, %v5733_v32  ;;  %v817_v39 = vmul.f32 %v5681_v27, %v5733_v32 }
 0x204   :  { %v5688_v29 = vpop.permute.xlu1 %926 }
 0x205   :  { %v871_v37 = vpop.permute.xlu0 %870 }
 0x206   :  { %4603 = vset.pattern.permute.xlu2 %v7003_v49  ;;  %4608 = vset.pattern.permute.xlu1 %v6981_v47  ;;  %v673_v30 = vpop.permute.xlu2 %672 }
 0x207   :  { %964 = vperm.xlu2 %4603, %v5594_v59   ;;  %v680_v4 = vmul.f32 %v673_v30, %v5670_v21  ;;  %v679_v30 = vmul.f32 %v5617_v60, %v5629_v0 }
 0x20d   :  { %v5693_v31 = vpop.permute.xlu1 %758 }
 0x20e   :  { %v557_v1 = vpop.permute.xlu0 %556 }
 0x20f   :  { %4605 = vset.pattern.permute.xlu2 %v6989_v58  ;;  %v811_v33 = vpop.permute.xlu2 %810  ;;  %v561_v3 = vmul.f32 %v557_v1, %v5709_v63 }
 0x210   :  { %766 = vperm.xlu2 %4605, %v5594_v59  }
 0x216   :  { %v613_v35 = vpop.permute.xlu1 %612 }
 0x217   :  { %v620_v36 = vmul.f32 %v613_v35, %v5670_v21 }
 0x218   :  { %565 = vrot.lane.b32.xlu2 %v559_v34, %s5301_s23  ;;  %v841_v44 = vpop.permute.xlu2 %840 }
 0x219   :  { %627 = vrot.lane.b32.xlu0 %v620_v36, %s5303_s30  ;;  %4606 = vset.pattern.permute.xlu2 %v6997_v43  ;;  %v818_v36 = vmul.f32 %v811_v33, %v5726_v28  ;;  %v847_v33 = vmul.f32 %v5647_v9, %v5733_v32  ;;  %v452_v9 = vpop.f32.mrf.mxu3 }
 0x21f   :  { %v733_v52 = vpop.permute.xlu1 %732 }
 0x220   :  { %595 = vrot.lane.b32.xlu2 %v589_v38, %s5302_s25  ;;  %v740_v59 = vmul.f32 %v733_v52, %v5670_v21 }
 0x221   :  { %657 = vrot.lane.b32.xlu0 %v650_v40, %s5304_s26  ;;  %v961_v6 = vpop.permute.xlu2 %960  ;;  %v848_v40 = vmul.f32 %v841_v44, %v5726_v28  ;;  %v677_v44 = vpop.permute.xlu0 %676 }
 0x222   :  { %747 = vrot.lane.b32.xlu1 %v740_v59, %s5269_s1  ;;  %v878_v59 = vmul.f32 %v871_v37, %v5726_v28  ;;  %v5763_v37 = vadd.f32 %v452_v9, %v390_v25  ;;  %v968_v24 = vmul.f32 %v961_v6, %v5726_v28 }
 0x228   :  { %v781_v5 = vpop.permute.xlu1 %780  ;;  %625 = vrot.lane.b32.xlu2 %v619_v2, %s5303_s30  ;;  %v877_v2 = vmul.f32 %v5657_v13, %v5733_v32 }
 0x229   :  { %687 = vrot.lane.b32.xlu0 %v680_v4, %s5305_s8  ;;  %v788_v34 = vmul.f32 %v781_v5, %v5726_v28  ;;  %v681_v4 = vmul.f32 %v677_v44, %v5709_v63  ;;  %v785_v5 = vpop.permute.xlu0 %784 }
 0x22a   :  { %569 = vrot.lane.b32.xlu1 %v561_v3, %s5301_s23  ;;  %v5724_v26 = vpop.permute.xlu2 %536  ;;  %v789_v19 = vmul.f32 %v785_v5, %v5763_v37 }
 0x22b   :  { %v545_v47 = vmul.f32 %v5724_v26, %v5670_v21 }
 0x230   :  { %655 = vrot.lane.b32.xlu2 %v649_v62, %s5304_s26 }
 0x231   :  { %v901_v11 = vpop.permute.xlu1 %900  ;;  %717 = vrot.lane.b32.xlu0 %v710_v23, %s5300_s4  ;;  %v845_v6 = vpop.permute.xlu0 %844 }
 0x232   :  { %v908_v3 = vmul.f32 %v901_v11, %v5726_v28  ;;  %v907_v11 = vmul.f32 %v5649_v10, %v5733_v32 }
 0x233   :  { %v5735_v35 = vpop.permute.xlu2 %762 }
 0x238   :  { %685 = vrot.lane.b32.xlu2 %v679_v30, %s5305_s8 }
 0x239   :  { %795 = vrot.lane.b32.xlu0 %v788_v34, %s5301_s23  ;;  %v937_v34 = vmul.f32 %v5688_v29, %v5733_v32 }
 0x23a   :  { %v931_v16 = vpop.permute.xlu1 %930 }
 0x23b   :  { %v938_v13 = vmul.f32 %v931_v16, %v5726_v28  ;;  %v5789_v29 = vpop.permute.xlu0 %715 }
 0x23c   :  { %v617_v52 = vpop.permute.xlu2 %616 }
 0x23d   :  { %v621_v22 = vmul.f32 %v617_v52, %v5709_v63 }
 0x240   :  { %793 = vrot.lane.b32.xlu2 %v787_v61, %s5301_s23  ;;  %v849_v61 = vmul.f32 %v845_v6, %v5763_v37 }
 0x241   :  { %825 = vrot.lane.b32.xlu0 %v818_v36, %s5302_s25 }
 0x243   :  { %v587_v60 = vpop.permute.xlu1 %586 }
 0x244   :  { %v591_v38 = vmul.f32 %v587_v60, %v5709_v63 }
 0x245   :  { %v647_v27 = vpop.permute.xlu2 %646  ;;  %v5793_v52 = vpop.permute.xlu0 %745 }
 0x246   :  { %599 = vrot.lane.b32.xlu1 %v591_v38, %s5302_s25  ;;  %v651_v1 = vmul.f32 %v647_v27, %v5709_v63 }
 0x248   :  { %823 = vrot.lane.b32.xlu2 %v817_v39, %s5302_s25 }
 0x249   :  { %855 = vrot.lane.b32.xlu0 %v848_v40, %s5303_s30 }
 0x24c   :  { %v707_v62 = vpop.permute.xlu1 %706 }
 0x24d   :  { %v711_v23 = vmul.f32 %v707_v62, %v5709_v63 }
 0x24e   :  { %629 = vrot.lane.b32.xlu1 %v621_v22, %s5303_s30  ;;  %v815_v16 = vpop.permute.xlu2 %814 }
 0x24f   :  { %v819_v10 = vmul.f32 %v815_v16, %v5763_v37 }
 0x250   :  { %853 = vrot.lane.b32.xlu2 %v847_v33, %s5303_s30 }
 0x251   :  { %885 = vrot.lane.b32.xlu0 %v878_v59, %s5304_s26 }
 0x255   :  { %v737_v25 = vpop.permute.xlu1 %736 }
 0x256   :  { %659 = vrot.lane.b32.xlu1 %v651_v1, %s5304_s26  ;;  %v741_v30 = vmul.f32 %v737_v25, %v5709_v63 }
 0x258   :  { %883 = vrot.lane.b32.xlu2 %v877_v2, %s5304_s26  ;;  %v935_v38 = vpop.permute.xlu2 %934 }
 0x259   :  { %915 = vrot.lane.b32.xlu0 %v908_v3, %s5305_s8  ;;  %v939_v33 = vmul.f32 %v935_v38, %v5763_v37  ;;  %v967_v3 = vmul.f32 %v5659_v14, %v5733_v32 }
 0x25e   :  { %689 = vrot.lane.b32.xlu1 %v681_v4, %s5305_s8  ;;  %v875_v36 = vpop.permute.xlu1 %874 }
 0x25f   :  { %v879_v60 = vmul.f32 %v875_v36, %v5763_v37 }
 0x260   :  { %797 = vrot.lane.b32.xlu2 %v789_v19, %s5301_s23 }
 0x261   :  { %945 = vrot.lane.b32.xlu0 %v938_v13, %s5300_s4  ;;  %v965_v22 = vpop.permute.xlu2 %964 }
 0x262   :  { %v969_v44 = vmul.f32 %v965_v22, %v5763_v37 }
 0x266   :  { %719 = vrot.lane.b32.xlu1 %v711_v23, %s5300_s4 }
 0x267   :  { %v905_v39 = vpop.permute.xlu1 %904  ;;  %v568_v59 = vpop.permute.xlu0 %567 }
 0x268   :  { %913 = vrot.lane.b32.xlu2 %v907_v11, %s5305_s8  ;;  %v909_v40 = vmul.f32 %v905_v39, %v5763_v37  ;;  %v575_v58 = vadd.f32 %v568_v59, %v545_v47 }
 0x269   :  { %975 = vrot.lane.b32.xlu0 %v968_v24, %s5269_s1 }
 0x26a   :  { %v767_v27 = vpop.permute.xlu2 %766 }
 0x26b   :  { %v771_v47 = vmul.f32 %v767_v27, %v5763_v37 }
 0x26e   :  { %749 = vrot.lane.b32.xlu1 %v741_v30, %s5269_s1 }
 0x26f   :  { %v598_v2 = vpop.permute.xlu0 %597 }
 0x270   :  { %943 = vrot.lane.b32.xlu2 %v937_v34, %s5300_s4  ;;  %v542_v1 = vpop.permute.xlu1 %541  ;;  %v605_v57 = vadd.f32 %v598_v2, %v575_v58 }
 0x272   :  { %v566_v9 = vpop.permute.xlu2 %565 }
 0x273   :  { %v574_v48 = vadd.f32 %v566_v9, %v544_v54 }
 0x276   :  { %827 = vrot.lane.b32.xlu1 %v819_v10, %s5302_s25 }
 0x27a   :  { %v596_v19 = vpop.permute.xlu2 %595 }
 0x27b   :  { %v604_v45 = vadd.f32 %v596_v19, %v574_v48 }
 0x27e   :  { %857 = vrot.lane.b32.xlu1 %v849_v61, %s5303_s30 }
 0x282   :  { %v626_v11 = vpop.permute.xlu2 %625 }
 0x286   :  { %887 = vrot.lane.b32.xlu1 %v879_v60, %s5304_s26 }
 0x28a   :  { %v656_v30 = vpop.permute.xlu2 %655 }
 0x28b   :  { %v628_v5 = vpop.permute.xlu0 %627 }
 0x28c   :  { %v635_v49 = vadd.f32 %v628_v5, %v605_v57 }
 0x28e   :  { %917 = vrot.lane.b32.xlu1 %v909_v40, %s5305_s8 }
 0x292   :  { %v686_v10 = vpop.permute.xlu2 %685 }
 0x293   :  { %v658_v62 = vpop.permute.xlu0 %657 }
 0x294   :  { %v748_v4 = vpop.permute.xlu1 %747  ;;  %v665_v46 = vadd.f32 %v658_v62, %v635_v49 }
 0x296   :  { %947 = vrot.lane.b32.xlu1 %v939_v33, %s5300_s4 }
 0x29a   :  { %v794_v36 = vpop.permute.xlu2 %793 }
 0x29b   :  { %v688_v24 = vpop.permute.xlu0 %687 }
 0x29c   :  { %v570_v13 = vpop.permute.xlu1 %569  ;;  %v695_v26 = vadd.f32 %v688_v24, %v665_v46 }
 0x29e   :  { %977 = vrot.lane.b32.xlu1 %v969_v44, %s5269_s1  ;;  %v546_v44 = vmul.f32 %v542_v1, %v5709_v63  ;;  %v634_v1 = vadd.f32 %v626_v11, %v604_v45 }
 0x2a0   :  { %v576_v56 = vadd.f32 %v570_v13, %v546_v44  ;;  %v664_v63 = vadd.f32 %v656_v30, %v634_v1 }
 0x2a2   :  { %v824_v39 = vpop.permute.xlu2 %823  ;;  %v694_v21 = vadd.f32 %v686_v10, %v664_v63  ;;  %v5817_v10 = vld [vmem:[%s6964_s14 + $0x8] sm:$0xff] }
 0x2a3   :  { %v718_v16 = vpop.permute.xlu0 %717  ;;  %1074 = vmatpush.msrb.mxu3 %v5817_v10  ;;  %1871 = vmatpush.msra.mxu0 %v5817_v10 }
 0x2a4   :  { %v725_v15 = vadd.f32 %v718_v16, %v695_v26 }
 0x2a6   :  { %973 = vrot.lane.b32.xlu1 %v967_v3, %s5269_s1  ;;  %v755_v48 = vadd.f32 %v748_v4, %v725_v15 }
 0x2aa   :  { %v854_v33 = vpop.permute.xlu2 %853 }
 0x2ab   :  { %v796_v61 = vpop.permute.xlu0 %795 }
 0x2b2   :  { %v884_v55 = vpop.permute.xlu2 %883 }
 0x2b3   :  { %v826_v60 = vpop.permute.xlu0 %825 }
 0x2b8   :  { %v600_v23 = vpop.permute.xlu1 %599 }
 0x2b9   :  { %v606_v51 = vadd.f32 %v600_v23, %v576_v56 }
 0x2ba   :  { %v798_v56 = vpop.permute.xlu2 %797 }
 0x2bb   :  { %v856_v40 = vpop.permute.xlu0 %855 }
 0x2c0   :  { %v630_v25 = vpop.permute.xlu1 %629 }
 0x2c1   :  { %v636_v43 = vadd.f32 %v630_v25, %v606_v51  ;;  %v724_v51 = vadd.f32 %v5789_v29, %v694_v21 }
 0x2c2   :  { %v914_v21 = vpop.permute.xlu2 %913 }
 0x2c3   :  { %v886_v42 = vpop.permute.xlu0 %885  ;;  %v754_v45 = vadd.f32 %v5793_v52, %v724_v51 }
 0x2c8   :  { %v660_v34 = vpop.permute.xlu1 %659 }
 0x2c9   :  { %v666_v53 = vadd.f32 %v660_v34, %v636_v43  ;;  %v770_v43 = vmul.f32 %v5735_v35, %v5726_v28 }
 0x2ca   :  { %v944_v16 = vpop.permute.xlu2 %943 }
 0x2cb   :  { %v916_v44 = vpop.permute.xlu0 %915  ;;  %v773_v49 = vadd.f32 %v770_v43, %v755_v48  ;;  %v5892_v43 = vld [vmem:[#allocation17 + $0x1] ss:$0 sm:$0xff] }
 0x2cc   :  { %7074 = vst [vmem:[#allocation38_spill] sm:$0xff] %v5892_v43 }
 0x2cd   :  { %v803_v58 = vadd.f32 %v796_v61, %v773_v49  ;;  %v5897_v49 = vld [vmem:[%s6966_s16] ss:$0 sm:$0xff] }
 0x2cf   :  { %v833_v2 = vadd.f32 %v826_v60, %v803_v58  ;;  %v459_v60 = vld [vmem:[%s7071_s9 + $0x8] sm:$0xf] }
 0x2d0   :  { %v690_v6 = vpop.permute.xlu1 %689 }
 0x2d1   :  { %v696_v50 = vadd.f32 %v690_v6, %v666_v53  ;;  %v769_v53 = vmul.f32 %v5693_v31, %v5733_v32  ;;  %v863_v15 = vadd.f32 %v856_v40, %v833_v2  ;;  %v1008_v40 = vpop.f32.mrf.mxu1 }
 0x2d3   :  { %v772_v27 = vadd.f32 %v769_v53, %v754_v45  ;;  %v893_v5 = vadd.f32 %v886_v42, %v863_v15 }
 0x2d5   :  { %v802_v4 = vadd.f32 %v794_v36, %v772_v27  ;;  %v923_v52 = vadd.f32 %v916_v44, %v893_v5  ;;  %v5824_v36 = vld [vmem:[#allocation16 + $0x18] sm:$0xff] }
 0x2d7   :  { %v832_v19 = vadd.f32 %v824_v39, %v802_v4  ;;  %v5870_v39 = vld [vmem:[%s6964_s14 + $0x20] sm:$0xff] }
 0x2d8   :  { %v720_v14 = vpop.permute.xlu1 %719 }
 0x2d9   :  { %v726_v13 = vadd.f32 %v720_v14, %v696_v50  ;;  %v946_v50 = vpop.permute.xlu0 %945  ;;  %v862_v24 = vadd.f32 %v854_v33, %v832_v19  ;;  %v5827_v14 = vld [vmem:[#allocation16 + $0x10] sm:$0xff] }
 0x2da   :  { %v953_v25 = vadd.f32 %v946_v50, %v923_v52  ;;  %v1100_v50 = vpop.f32.mrf.mxu0 }
 0x2db   :  { %v892_v30 = vadd.f32 %v884_v55, %v862_v24  ;;  %v458_v55 = vld [vmem:[%s7071_s9] sm:$0xff] }
 0x2e0   :  { %v750_v38 = vpop.permute.xlu1 %749 }
 0x2e1   :  { %v756_v20 = vadd.f32 %v750_v38, %v726_v13  ;;  %v976_v23 = vpop.permute.xlu0 %975  ;;  %v7072_v38 = vld [vmem:[#allocation35_spill] sm:$0xff]  ;;  %v1011_v13 = vpop.f32.mrf.mxu1 }
 0x2e2   :  { %v983_v34 = vadd.f32 %v976_v23, %v953_v25  ;;  %v1103_v23 = vpop.f32.mrf.mxu0 }
 0x2e3   :  { %v774_v57 = vadd.f32 %v771_v47, %v756_v20 }
 0x2e5   :  { %v804_v46 = vadd.f32 %v798_v56, %v774_v57 }
 0x2e8   :  { %v828_v22 = vpop.permute.xlu1 %827 }
 0x2e9   :  { %v834_v63 = vadd.f32 %v828_v22, %v804_v46  ;;  %v5876_v22 = vld [vmem:[#allocation14] ss:$0 sm:$0xff] }
 0x2f0   :  { %v858_v3 = vpop.permute.xlu1 %857 }
 0x2f1   :  { %v864_v9 = vadd.f32 %v858_v3, %v834_v63 }
 0x2f8   :  { %v888_v41 = vpop.permute.xlu1 %887 }
 0x2f9   :  { %v894_v29 = vadd.f32 %v888_v41, %v864_v9  ;;  %v922_v41 = vadd.f32 %v914_v21, %v892_v30 }
 0x2fb   :  { %v952_v42 = vadd.f32 %v944_v16, %v922_v41 }
 0x300   :  { %v918_v54 = vpop.permute.xlu1 %917 }
 0x301   :  { %v924_v35 = vadd.f32 %v918_v54, %v894_v29  ;;  %v5889_v54 = vld [vmem:[%s6966_s16 + $0x1] ss:$0 sm:$0xff] }
 0x302   :  { %7073 = vst [vmem:[#allocation35_spill] sm:$0xff] %v5889_v54 }
 0x308   :  { %v948_v59 = vpop.permute.xlu1 %947 }
 0x309   :  { %v954_v62 = vadd.f32 %v948_v59, %v924_v35  ;;  %v5901_v59 = vld [vmem:[#allocation17] ss:$0 sm:$0xff] }
 0x310   :  { %v978_v11 = vpop.permute.xlu1 %977 }
 0x311   :  { %v984_v31 = vadd.f32 %v978_v11, %v954_v62 }
 0x313   :  { %1034 = vmatpush.msrb.mxu2 %v984_v31 }
 0x315   :  { %1035 = vmatpush.msrb.mxu2 %v983_v34 }
 0x318   :  { %v974_v6 = vpop.permute.xlu1 %973 }
 0x319   :  { %v982_v61 = vadd.f32 %v974_v6, %v952_v42 }
 0x31b   :  { %1036 = vmatpush.msrb.mxu2 %v982_v61 }
 0x31c   :  { %4396 = vmatmul.msk.f32.vlgmr.msrb.gmra.mxu2 %vm1014_vm8, %v458_v55 }
 0x31d   :  { %1191 = vmatpush.msra.mxu2 %v5824_v36 }
 0x31f   :  { %1192 = vmatpush.msra.mxu2 %v5827_v14 }
 0x321   :  { %1815 = vmatpush.msrb.mxu2 %v5516_v7  ;;  %v5846_v7 = vld [vmem:[%s6964_s14 + $0x18] sm:$0xff] }
 0x322   :  { %1168 = vmatpush.msra.mxu1 %v5846_v7 }
 0x323   :  { %1816 = vmatpush.msrb.mxu2 %v5522_v8  ;;  %v5852_v8 = vld [vmem:[%s6964_s14] sm:$0xff] }
 0x324   :  { %4397 = vmatmul.msk.f32.gmra.mxu2 %vm1014_vm8, %v459_v60  ;;  %1075 = vmatpush.msrb.mxu3 %v5852_v8 }
 0x325   :  { %1872 = vmatpush.msra.mxu0 %v5852_v8 }
 0x32c   :  { %4406 = vmatmul.msk.f32.vlgmr.msra.gmra.mxu2 %vm985_vm4, %v5525_v12 }
 0x32d   :  { %1894 = vmatpush.msra.mxu2 %v5538_v17  ;;  %v5857_v17 = vld [vmem:[%s6964_s14 + $0x10] sm:$0xff] }
 0x32e   :  { %1169 = vmatpush.msra.mxu1 %v5857_v17 }
 0x32f   :  { %1895 = vmatpush.msra.mxu2 %v5542_v18  ;;  %v5865_v18 = vld [vmem:[%s6964_s14 + $0x28] sm:$0xff] }
 0x330   :  { %1262 = vmatpush.msra.mxu3 %v5865_v18  ;;  %2047 = vmatpush.msrb.mxu0 %v5865_v18 }
 0x332   :  { %1263 = vmatpush.msra.mxu3 %v5870_v39  ;;  %2048 = vmatpush.msrb.mxu0 %v5870_v39 }
 0x334   :  { %4407 = vmatmul.msk.f32.gmra.mxu2 %vm985_vm4, %v7072_v38 }
 0x39f   :  { %v1038_v33 = vpop.f32.mrf.mxu2 }
 0x3a0   :  { %v1039_v3 = vadd.f32 %v1038_v33, %v1008_v40 }
 0x3a2   :  { %v1047_v1 = vadd.f32 %v5876_v22, %v1039_v3 }
 0x3a4   :  { %v1049_v26 = vmax.f32 %v1047_v1, 0.0 }
 0x3a6   :  { %4398 = vmatmul.msk.f32.vlgmr.msrb.gmra.mxu3 %vm985_vm4, %v1049_v26  ;;  %4404 = vmatmul.msk.f32.vlgmr.msra.gmra.mxu1 %vm985_vm4, %v1049_v26 }
 0x3a7   :  { %v1041_v44 = vpop.f32.mrf.mxu2 }
 0x3a8   :  { %v1042_v20 = vadd.f32 %v1041_v44, %v1011_v13  ;;  %v5917_v44 = vld [vmem:[#allocation17 + $0x2] ss:$0 sm:$0xff] }
 0x3a9   :  { %7075 = vst [vmem:[#allocation39_spill] sm:$0xff] %v5917_v44 }
 0x3aa   :  { %v1048_v47 = vadd.f32 %v5876_v22, %v1042_v20 }
 0x3ac   :  { %v1050_v56 = vmax.f32 %v1048_v47, 0.0 }
 0x3ae   :  { %4399 = vmatmul.msk.f32.gmra.mxu3 %vm985_vm4, %v1050_v56  ;;  %4405 = vmatmul.msk.f32.gmra.mxu1 %vm985_vm4, %v1050_v56 }
 0x3af   :  { %v1194_v51 = vpop.f32.mrf.mxu2 }
 0x3b6   :  { %4410 = vmatmul.msk.f32.vlgmr.msra.gmra.mxu3 %vm985_vm4, %v1049_v26  ;;  %v1291_v26 = vpop.f32.mrf.mxu0 }
 0x3b7   :  { %v1197_v21 = vpop.f32.mrf.mxu2 }
 0x3be   :  { %4411 = vmatmul.msk.f32.gmra.mxu3 %vm985_vm4, %v1050_v56 }
 0x423   :  { %v1171_v48 = vpop.f32.mrf.mxu1 }
 0x424   :  { %v1172_v57 = vadd.f32 %v5889_v54, %v1171_v48 }
 0x426   :  { %v1200_v45 = vadd.f32 %v1194_v51, %v1172_v57 }
 0x428   :  { %v1205_v46 = vadd.f32 %v5892_v43, %v1200_v45  ;;  %v5924_v45 = vld [vmem:[%s6966_s16 + $0x2] ss:$0 sm:$0xff] }
 0x429   :  { %v1077_v53 = vpop.f32.mrf.mxu3  ;;  %7076 = vst [vmem:[#allocation40_spill] sm:$0xff] %v5924_v45 }
 0x42a   :  { %v4408_v58 = vmul.f32 -1.442695, %v1205_v46  ;;  %v1078_v63 = vadd.f32 %v5897_v49, %v1077_v53  ;;  %v1292_v53 = vadd.f32 %v5917_v44, %v1291_v26 }
 0x42b   :  { %v1174_v27 = vpop.f32.mrf.mxu1 }
 0x42c   :  { %4717 = vpow2.f32 %v4408_v58  ;;  %v1106_v2 = vadd.f32 %v1100_v50, %v1078_v63  ;;  %v1175_v9 = vadd.f32 %v5889_v54, %v1174_v27 }
 0x42e   :  { %v1111_v15 = vadd.f32 %v5901_v59, %v1106_v2  ;;  %v1201_v29 = vadd.f32 %v1197_v21, %v1175_v9 }
 0x430   :  { %v4402_v4 = vmul.f32 -1.442695, %v1111_v15  ;;  %v1206_v5 = vadd.f32 %v5892_v43, %v1201_v29 }
 0x431   :  { %v1080_v35 = vpop.f32.mrf.mxu3 }
 0x432   :  { %v4718_v19 = vpop.eup %4717  ;;  %4719 = vpow2.f32 %v4402_v4  ;;  %v4409_v52 = vmul.f32 -1.442695, %v1206_v5  ;;  %v1081_v62 = vadd.f32 %v5897_v49, %v1080_v35 }
 0x433   :  { %v5907_v11 = vadd.f32 1.0, %v4718_v19  ;;  %v7093_v19 = vmov 1  }
 0x434   :  { %4721 = vpow2.f32 %v4409_v52  ;;  %v1107_v24 = vadd.f32 %v1103_v23, %v1081_v62 }
 0x435   :  { %4723 = vrcp.f32 %v5907_v11  ;;  %v1226_v21 = vand.u32 2147483648, %v5907_v11  ;;  %vm1220_vm14 = vweird.f32 %v5907_v11  ;;  %v1224_v5 = vand.u32 2147483647, %v5907_v11 }
 0x436   :  { %v1112_v25 = vadd.f32 %v5901_v59, %v1107_v24  ;;  %v1294_v24 = vpop.f32.mrf.mxu0 }
 0x437   :  { %vm1225_vm2 = vcmp.eq.f32.partialorder %v1224_v5, 8.507059e+37  ;;  %v7091_v5 = vmov 6  }
 0x438   :  { %v4720_v31 = vpop.eup %4719  ;;  %v4403_v30 = vmul.f32 -1.442695, %v1112_v25 }
 0x439   :  { %v1119_v34 = vadd.f32 1.0, %v4720_v31  ;;  %v1265_v48 = vpop.f32.mrf.mxu3 }
 0x43a   :  { %v4722_v16 = vpop.eup %4721  ;;  %4725 = vpow2.f32 %v4403_v30  ;;  %v1266_v15 = vadd.f32 %v5924_v45, %v1265_v48  ;;  %v1227_v30 = vor.u32 1.1754944e-38, %v1226_v21 }
 0x43b   :  { %4727 = vrcp.f32 %v1119_v34  ;;  %v5911_v41 = vadd.f32 1.0, %v4722_v16  ;;  %v4724_v42 = vpop.eup %4723  ;;  %v1132_v13 = vand.u32 2147483648, %v1119_v34  ;;  %v1130_v47 = vand.u32 2147483647, %v1119_v34 }
 0x43c   :  { %v1216_v6 = vmul.f32 %v4724_v42, %v5907_v11  ;;  %vm1126_vm10 = vweird.f32 %v1119_v34  ;;  %vm1221_vm13 = vweird.f32 %v4724_v42 }
 0x43d   :  { %4729 = vrcp.f32 %v5911_v41  ;;  %v1133_v50 = vor.u32 1.1754944e-38, %v1132_v13  ;;  %vm1131_vm12 = vcmp.eq.f32.partialorder %v1130_v47, 8.507059e+37  ;;  %vm5931_vm15 = vmor %vm1220_vm14, %vm1221_vm13  ;;  %v1239_v13 = vand.u32 2147483647, %v5911_v41 }
 0x43e   :  { %v1217_v33 = vsub.f32 1.0, %v1216_v6  ;;  %v1295_v6 = vadd.f32 %v5917_v44, %v1294_v24  ;;  %v7096_v24 = vmov 11  }
 0x440   :  { %v4726_v61 = vpop.eup %4725  ;;  %v1218_v51 = vmul.f32 %v4724_v42, %v1217_v33 }
 0x441   :  { %v4728_v55 = vpop.eup %4727  ;;  %v1120_v60 = vadd.f32 1.0, %v4726_v61  ;;  %v1268_v16 = vpop.f32.mrf.mxu3 }
 0x442   :  { %v1122_v40 = vmul.f32 %v4728_v55, %v1119_v34  ;;  %vm1127_vm9 = vweird.f32 %v4728_v55  ;;  %v1219_v9 = vadd.f32 %v4724_v42, %v1218_v51 }
 0x443   :  { %4731 = vrcp.f32 %v1120_v60  ;;  %v5915_v3 = vpop.eup %4729  ;;  %vm1128_vm11 = vmor %vm1126_vm10, %vm1127_vm9  ;;  %v1147_v35 = vand.u32 2147483648, %v1120_v60  ;;  %v1145_v23 = vand.u32 2147483647, %v1120_v60  ;;  %vm1141_vm1 = vweird.f32 %v1120_v60 }
 0x444   :  { %v1123_v1 = vsub.f32 1.0, %v1122_v40  ;;  %v1231_v56 = vmul.f32 %v5915_v3, %v5911_v41  ;;  %v1223_v25 = vsel %vm5931_vm15, %v4724_v42, %v1219_v9  ;;  %vm1236_vm9 = vweird.f32 %v5915_v3  ;;  %v4853_v9 = vld [vmem:[%s6962_s12] sm:$0xff] }
 0x445   :  { %v1148_v11 = vor.u32 1.1754944e-38, %v1147_v35  ;;  %v1228_v61 = vsel %vm1225_vm2, %v1227_v30, %v1223_v25  ;;  %vm1146_vm7 = vcmp.eq.f32.partialorder %v1145_v23, 8.507059e+37  ;;  %v1241_v42 = vand.u32 2147483648, %v5911_v41 }
 0x446   :  { %v1124_v20 = vmul.f32 %v4728_v55, %v1123_v1  ;;  %v1232_v27 = vsub.f32 1.0, %v1231_v56  ;;  %v1269_v1 = vadd.f32 %v5924_v45, %v1268_v16  ;;  %vm1235_vm10 = vweird.f32 %v5911_v41 }
 0x447   :  { %v1307_v51 = vmul.f32 %v1228_v61, %v5525_v12  ;;  %v7092_v35 = vmov 10   ;;  %v7095_v23 = vmov 14   ;;  %v7097_v25 = vmov 8  }
 0x448   :  { %v1125_v57 = vadd.f32 %v4728_v55, %v1124_v20  ;;  %v1233_v31 = vmul.f32 %v5915_v3, %v1232_v27  ;;  %v7099_v30 = vmov 2   ;;  %v7101_v16 = vmov 3  }
 0x449   :  { %v4732_v46 = vpop.eup %4731 }
 0x44a   :  { %v1129_v58 = vsel %vm1128_vm11, %v4728_v55, %v1125_v57  ;;  %v1137_v63 = vmul.f32 %v4732_v46, %v1120_v60  ;;  %vm1142_vm0 = vweird.f32 %v4732_v46  ;;  %v1234_v33 = vadd.f32 %v5915_v3, %v1233_v31  ;;  %vm1237_vm11 = vmor %vm1235_vm10, %vm1236_vm9 }
 0x44b   :  { %v1134_v2 = vsel %vm1131_vm12, %v1133_v50, %v1129_v58  ;;  %vm1143_vm3 = vmor %vm1141_vm1, %vm1142_vm0  ;;  %v1303_v60 = vsub.f32 1.0, %v1228_v61  ;;  %v1242_v57 = vor.u32 1.1754944e-38, %v1241_v42  ;;  %vm1240_vm12 = vcmp.eq.f32.partialorder %v1239_v13, 8.507059e+37 }
 0x44c   :  { %v1297_v29 = vmul.f32 %v1292_v53, %v1134_v2  ;;  %v1138_v4 = vsub.f32 1.0, %v1137_v63  ;;  %v1238_v48 = vsel %vm1237_vm11, %v5915_v3, %v1234_v33  ;;  %v5951_v53 = vld [vmem:[#allocation16 + $0x28] sm:$0xff]  ;;  %v5954_v63 = vld [vmem:[#allocation16 + $0x20] sm:$0xff]  ;;  %v7098_v31 = vmov 12  }
 0x44d   :  { %v1243_v50 = vsel %vm1240_vm12, %v1242_v57, %v1238_v48  ;;  %7080 = vst [vmem:[#allocation42_spill] sm:$0xff] %v5951_v53  ;;  %v5968_v2 = vld [vmem:[%s7068_s18] sm:$0xff] }
 0x44e   :  { %v1299_v52 = vadd.f32 %v1297_v29, %v1266_v15  ;;  %v1139_v62 = vmul.f32 %v4732_v46, %v1138_v4  ;;  %v1304_v41 = vsub.f32 1.0, %v1243_v50  ;;  %7081 = vst [vmem:[#allocation43_spill] sm:$0xff] %v5954_v63  ;;  %v1308_v3 = vmul.f32 %v1243_v50, %v7072_v38  ;;  %v4852_v38 = vld [vmem:[%s6962_s12 + $0x8] sm:$0xff]  ;;  %s7135_s12 = sld [smem:[#allocation53_spill]] }
 0x44f   :  { %7083 = vst [vmem:[#allocation45_spill] sm:$0xff] %v5968_v2  ;;  %v7087_v15 = vmov 13   ;;  %v7088_v29 = vmov 5   ;;  %v7090_v4 = vmov 15   ;;  %v7102_v50 = vld [vmem:[#allocation36_spill] sm:$0xff] }
 0x450   :  { %4733 = vtanh.f32 %v1299_v52  ;;  %v1140_v34 = vadd.f32 %v4732_v46, %v1139_v62  ;;  %v7094_v62 = vmov 7  }
 0x452   :  { %v1144_v55 = vsel %vm1143_vm3, %v4732_v46, %v1140_v34  ;;  %v7100_v34 = vmov 0  }
 0x453   :  { %v1149_v40 = vsel %vm1146_vm7, %v1148_v11, %v1144_v55 }
 0x454   :  { %v1298_v26 = vmul.f32 %v1295_v6, %v1149_v40 }
 0x456   :  { %v4734_v20 = vpop.eup %4733  ;;  %v1300_v47 = vadd.f32 %v1298_v26, %v1269_v1 }
 0x457   :  { %v1305_v56 = vmul.f32 %v4734_v20, %v1303_v60 }
 0x458   :  { %4735 = vtanh.f32 %v1300_v47 }
 0x459   :  { %v5947_v46 = vadd.f32 %v1307_v51, %v1305_v56 }
 0x45b   :  { %7079 = vst [vmem:[#allocation41_spill] sm:$0xff] %v5947_v46  ;;  %4418 = vmatmul.msk.f32.vlgmr.msrb.gmra.mxu2 %vm985_vm4, %v5947_v46 }
 0x45c   :  { %2070 = vmatpush.msrb.mxu2 %v5951_v53 }
 0x45e   :  { %v4736_v58 = vpop.eup %4735  ;;  %2071 = vmatpush.msrb.mxu2 %v5954_v63 }
 0x45f   :  { %v1306_v12 = vmul.f32 %v4736_v58, %v1304_v41 }
 0x461   :  { %v5958_v27 = vadd.f32 %v1308_v3, %v1306_v12 }
 0x463   :  { %7082 = vst [vmem:[#allocation44_spill] sm:$0xff] %v5958_v27  ;;  %4414 = vmatpush.msk.msrb.mxu1 %vm499_vm5, %v5958_v27  ;;  %4419 = vmatmul.msk.f32.gmra.mxu2 %vm985_vm4, %v5958_v27 }
 0x465   :  { %1329 = vmatpush.msrb.mxu1 %v5947_v46 }
 0x466   :  { %4415 = vmatmul.msk.f32.vlgmr.msrb.gmra.mxu1 %vm489_vm6, %v5968_v2 }
 0x467   :  { %1982 = vmatpush.msra.mxu1 %v5824_v36  ;;  %v5986_v36 = vld [vmem:[%s7068_s18 + $0x8] sm:$0xff] }
 0x468   :  { %7084 = vst [vmem:[#allocation46_spill] sm:$0xff] %v5986_v36 }
 0x469   :  { %1983 = vmatpush.msra.mxu1 %v5827_v14  ;;  %v5996_v14 = vld [vmem:[%s7068_s18 + $0x10] sm:$0xff] }
 0x46a   :  { %7085 = vst [vmem:[#allocation47_spill] sm:$0xff] %v5996_v14 }
 0x46b   :  { %2597 = vmatpush.msrb.mxu1 %v4852_v38  ;;  %4424 = vmatmul.msk.f32.vlgmr.msra.gmra.mxu2 %vm985_vm4, %v5947_v46 }
 0x46c   :  { %2653 = vmatpush.msra.mxu2 %v5817_v10  ;;  %v4856_v10 = vld [vmem:[#allocation16 + $0x8] sm:$0xff] }
 0x46d   :  { %2598 = vmatpush.msrb.mxu1 %v4853_v9 }
 0x46e   :  { %4416 = vmatmul.msk.f32.gmra.mxu1 %vm489_vm6, %v5986_v36  ;;  %2654 = vmatpush.msra.mxu2 %v5852_v8  ;;  %v4857_v8 = vld [vmem:[#allocation16] sm:$0xff] }
 0x473   :  { %4425 = vmatmul.msk.f32.gmra.mxu2 %vm985_vm4, %v5958_v27 }
 0x476   :  { %4417 = vmatmul.msk.f32.gmra.mxu1 %vm489_vm6, %v5996_v14 }
 0x47b   :  { %4436 = vmatmul.msk.f32.vlgmr.msrb.gmra.mxu2 %vm985_vm4, %v5947_v46 }
 0x47c   :  { %2829 = vmatpush.msrb.mxu2 %v5865_v18  ;;  %v7086_v18 = vmov 4  }
 0x47e   :  { %4430 = vmatmul.msk.f32.vlgmr.msra.gmra.mxu1 %vm985_vm4, %v5947_v46  ;;  %2830 = vmatpush.msrb.mxu2 %v5870_v39  ;;  %v7089_v39 = vmov 9  }
 0x47f   :  { %2676 = vmatpush.msra.mxu1 %v4856_v10 }
 0x481   :  { %2677 = vmatpush.msra.mxu1 %v4857_v8 }
 0x483   :  { %4437 = vmatmul.msk.f32.gmra.mxu2 %vm985_vm4, %v5958_v27 }
 0x486   :  { %4431 = vmatmul.msk.f32.gmra.mxu1 %vm985_vm4, %v5958_v27 }
 0x4e3   :  { %v1331_v21 = vpop.f32.mrf.mxu1 }
 0x4e4   :  { %1419 = vperm.xlu1 %4608, %v1331_v21   ;;  %1389 = vperm.xlu0 %4607, %v1331_v21  }
 0x4e5   :  { %1359 = vperm.xlu2 %4606, %v1331_v21  }
 0x4eb   :  { %v6018_v52 = vpop.f32.mrf.mxu1 }
 0x4ec   :  { %4609 = vset.pattern.permute.xlu1 %v7086_v18  ;;  %4617 = vset.pattern.permute.xlu0 %v7087_v15 }
 0x4ed   :  { %4610 = vset.pattern.permute.xlu2 %v7088_v29  ;;  %1449 = vperm.xlu1 %4609, %v1331_v21  }
 0x4ee   :  { %1707 = vperm.xlu0 %4617, %v1331_v21   ;;  %1479 = vperm.xlu2 %4610, %v1331_v21  }
 0x4f3   :  { %v6033_v11 = vpop.f32.mrf.mxu1 }
 0x4f5   :  { %4613 = vset.pattern.permute.xlu1 %v7089_v39 }
 0x4f6   :  { %4619 = vset.pattern.permute.xlu0 %v7090_v4  ;;  %4611 = vset.pattern.permute.xlu2 %v7091_v5 }
 0x4f7   :  { %1587 = vperm.xlu1 %4613, %v1331_v21   ;;  %1767 = vperm.xlu0 %4619, %v1331_v21  }
 0x4f8   :  { %1509 = vperm.xlu2 %4611, %v1331_v21  }
 0x4ff   :  { %4614 = vset.pattern.permute.xlu1 %v7092_v35  ;;  %4622 = vset.pattern.permute.xlu0 %v7093_v19 }
 0x500   :  { %4612 = vset.pattern.permute.xlu2 %v7094_v62  ;;  %1617 = vperm.xlu1 %4614, %v1331_v21  }
 0x501   :  { %1539 = vperm.xlu2 %4612, %v1331_v21   ;;  %1363 = vperm.xlu0 %4622, %v6018_v52  }
 0x508   :  { %4618 = vset.pattern.permute.xlu1 %v7095_v23 }
 0x509   :  { %4615 = vset.pattern.permute.xlu2 %v7096_v24  ;;  %4627 = vset.pattern.permute.xlu0 %v7091_v5 }
 0x50a   :  { %1737 = vperm.xlu1 %4618, %v1331_v21   ;;  %1647 = vperm.xlu2 %4615, %v1331_v21  }
 0x50b   :  { %1513 = vperm.xlu0 %4627, %v6018_v52  }
 0x512   :  { %4621 = vset.pattern.permute.xlu1 %v7097_v25  ;;  %4616 = vset.pattern.permute.xlu2 %v7098_v31 }
 0x513   :  { %4632 = vset.pattern.permute.xlu0 %v7098_v31  ;;  %1569 = vperm.xlu1 %4621, %v1331_v21  }
 0x514   :  { %1677 = vperm.xlu2 %4616, %v1331_v21   ;;  %1681 = vperm.xlu0 %4632, %v6018_v52  }
 0x51b   :  { %4623 = vset.pattern.permute.xlu1 %v7099_v30 }
 0x51c   :  { %4620 = vset.pattern.permute.xlu2 %v7100_v34  ;;  %4642 = vset.pattern.permute.xlu0 %v7088_v29 }
 0x51d   :  { %1342 = vperm.xlu2 %4620, %v1331_v21   ;;  %1393 = vperm.xlu1 %4623, %v6018_v52  }
 0x51e   :  { %1487 = vperm.xlu0 %4642, %v6033_v11  }
 0x525   :  { %4625 = vset.pattern.permute.xlu2 %v7086_v18  ;;  %4624 = vset.pattern.permute.xlu1 %v7101_v16 }
 0x526   :  { %4645 = vset.pattern.permute.xlu0 %v7089_v39  ;;  %1453 = vperm.xlu2 %4625, %v6018_v52  }
 0x527   :  { %1423 = vperm.xlu1 %4624, %v6018_v52   ;;  %1595 = vperm.xlu0 %4645, %v6033_v11  }
 0x52e   :  { %4626 = vset.pattern.permute.xlu2 %v7088_v29 }
 0x52f   :  { %4628 = vset.pattern.permute.xlu1 %v7094_v62  ;;  %4647 = vset.pattern.permute.xlu0 %v7096_v24 }
 0x530   :  { %1483 = vperm.xlu2 %4626, %v6018_v52   ;;  %1543 = vperm.xlu1 %4628, %v6018_v52  }
 0x531   :  { %1655 = vperm.xlu0 %4647, %v6033_v11  }
 0x538   :  { %4630 = vset.pattern.permute.xlu2 %v7092_v35  ;;  %4629 = vset.pattern.permute.xlu1 %v7089_v39 }
 0x539   :  { %1621 = vperm.xlu2 %4630, %v6018_v52   ;;  %1591 = vperm.xlu1 %4629, %v6018_v52  }
 0x53a   :  { %4655 = vset.pattern.permute.xlu0 %v7099_v30 }
 0x53f   :  { %v6054_v6 = vpop.permute.xlu2 %1359 }
 0x541   :  { %4631 = vset.pattern.permute.xlu2 %v7096_v24  ;;  %4633 = vset.pattern.permute.xlu1 %v7087_v15 }
 0x542   :  { %1651 = vperm.xlu2 %4631, %v6018_v52   ;;  %1711 = vperm.xlu1 %4633, %v6018_v52  }
 0x548   :  { %v6060_v61 = vpop.permute.xlu2 %1479 }
 0x54a   :  { %4635 = vset.pattern.permute.xlu2 %v7090_v4  ;;  %4634 = vset.pattern.permute.xlu1 %v7095_v23 }
 0x54b   :  { %1771 = vperm.xlu2 %4635, %v6018_v52   ;;  %1741 = vperm.xlu1 %4634, %v6018_v52  }
 0x552   :  { %v1510_v55 = vpop.permute.xlu2 %1509 }
 0x553   :  { %4636 = vset.pattern.permute.xlu2 %v7100_v34  ;;  %4639 = vset.pattern.permute.xlu1 %v7099_v30  ;;  %v1520_v40 = vmul.f32 %v1510_v55, %v5629_v0 }
 0x554   :  { %1347 = vperm.xlu2 %4636, %v6018_v52   ;;  %1397 = vperm.xlu1 %4639, %v6033_v11  }
 0x555   :  { %1526 = vrot.lane.b32.xlu0 %v1520_v40, %s5300_s4 }
 0x556   :  { %v6072_v33 = vpop.permute.xlu1 %1419  ;;  %v6074_v42 = vpop.permute.xlu0 %1389 }
 0x55b   :  { %v1540_v1 = vpop.permute.xlu2 %1539 }
 0x55c   :  { %4637 = vset.pattern.permute.xlu2 %v7097_v25  ;;  %4643 = vset.pattern.permute.xlu1 %v7091_v5  ;;  %v1550_v26 = vmul.f32 %v1540_v1, %v5629_v0  ;;  %v1370_v1 = vmul.f32 %v6054_v6, %v5629_v0 }
 0x55d   :  { %1573 = vperm.xlu2 %4637, %v6018_v52   ;;  %1517 = vperm.xlu1 %4643, %v6033_v11  }
 0x55e   :  { %1556 = vrot.lane.b32.xlu0 %v1550_v26, %s5269_s1 }
 0x55f   :  { %v6082_v60 = vpop.permute.xlu1 %1449 }
 0x560   :  { %v6084_v13 = vpop.permute.xlu0 %1707 }
 0x564   :  { %v6086_v20 = vpop.permute.xlu2 %1647 }
 0x565   :  { %4638 = vset.pattern.permute.xlu2 %v7093_v19  ;;  %4644 = vset.pattern.permute.xlu1 %v7094_v62 }
 0x566   :  { %1547 = vperm.xlu1 %4644, %v6033_v11   ;;  %1367 = vperm.xlu2 %4638, %v6033_v11  }
 0x569   :  { %v6092_v47 = vpop.permute.xlu1 %1587  ;;  %v6094_v56 = vpop.permute.xlu0 %1767 }
 0x56e   :  { %4648 = vset.pattern.permute.xlu1 %v7098_v31  ;;  %4640 = vset.pattern.permute.xlu2 %v7101_v16  ;;  %v6098_v51 = vpop.permute.xlu2 %1677 }
 0x56f   :  { %1685 = vperm.xlu1 %4648, %v6033_v11   ;;  %1427 = vperm.xlu2 %4640, %v6033_v11  }
 0x572   :  { %v6102_v48 = vpop.permute.xlu1 %1617 }
 0x573   :  { %v1364_v57 = vpop.permute.xlu0 %1363 }
 0x574   :  { %v1371_v41 = vmul.f32 %v1364_v57, %v7102_v50 }
 0x576   :  { %1378 = vrot.lane.b32.xlu0 %v1371_v41, %s5301_s23 }
 0x577   :  { %4649 = vset.pattern.permute.xlu1 %v7087_v15  ;;  %4641 = vset.pattern.permute.xlu2 %v7086_v18  ;;  %v6108_v58 = vpop.permute.xlu2 %1342 }
 0x578   :  { %1715 = vperm.xlu1 %4649, %v6033_v11   ;;  %1457 = vperm.xlu2 %4641, %v6033_v11   ;;  %v1355_v29 = vmul.f32 %v6108_v58, %v5629_v0 }
 0x57c   :  { %v6112_v12 = vpop.permute.xlu1 %1737 }
 0x580   :  { %4652 = vset.pattern.permute.xlu1 %v7100_v34  ;;  %4646 = vset.pattern.permute.xlu2 %v7092_v35  ;;  %v1454_v3 = vpop.permute.xlu2 %1453 }
 0x581   :  { %1352 = vperm.xlu1 %4652, %v6033_v11   ;;  %1625 = vperm.xlu2 %4646, %v6033_v11   ;;  %v1461_v26 = vmul.f32 %v1454_v3, %v7102_v50 }
 0x585   :  { %v6118_v38 = vpop.permute.xlu1 %1569 }
 0x589   :  { %4650 = vset.pattern.permute.xlu2 %v7095_v23  ;;  %4656 = vset.pattern.permute.xlu1 %v7101_v16 }
 0x58a   :  { %v1484_v9 = vpop.permute.xlu2 %1483  ;;  %1745 = vperm.xlu2 %4650, %v6033_v11  }
 0x58f   :  { %v1394_v10 = vpop.permute.xlu1 %1393 }
 0x590   :  { %v1401_v8 = vmul.f32 %v1394_v10, %v7102_v50 }
 0x592   :  { %4651 = vset.pattern.permute.xlu2 %v7090_v4  ;;  %1408 = vrot.lane.b32.xlu0 %v1401_v8, %s5302_s25  ;;  %v1491_v8 = vmul.f32 %v1484_v9, %v7102_v50  ;;  %v1460_v9 = vmul.f32 %v6082_v60, %v5629_v0 }
 0x593   :  { %v1622_v21 = vpop.permute.xlu2 %1621  ;;  %1775 = vperm.xlu2 %4651, %v6033_v11  }
 0x599   :  { %v1424_v52 = vpop.permute.xlu1 %1423 }
 0x59a   :  { %v1431_v55 = vmul.f32 %v1424_v52, %v7102_v50  ;;  %v1514_v52 = vpop.permute.xlu0 %1513 }
 0x59b   :  { %4653 = vset.pattern.permute.xlu2 %v7097_v25 }
 0x59c   :  { %v1652_v40 = vpop.permute.xlu2 %1651  ;;  %1438 = vrot.lane.b32.xlu0 %v1431_v55, %s5303_s30  ;;  %1577 = vperm.xlu2 %4653, %v6033_v11   ;;  %v1400_v11 = vmul.f32 %v6074_v42, %v5629_v0  ;;  %v1430_v55 = vmul.f32 %v6072_v33, %v5629_v0 }
 0x5a2   :  { %v1544_v57 = vpop.permute.xlu1 %1543 }
 0x5a3   :  { %v1551_v41 = vmul.f32 %v1544_v57, %v7102_v50 }
 0x5a4   :  { %1468 = vrot.lane.b32.xlu0 %v1461_v26, %s5304_s26  ;;  %1376 = vrot.lane.b32.xlu2 %v1370_v1, %s5301_s23  ;;  %v1521_v1 = vmul.f32 %v1514_v52, %v7102_v50  ;;  %v1490_v52 = vmul.f32 %v6060_v61, %v5629_v0  ;;  %v1682_v61 = vpop.permute.xlu0 %1681 }
 0x5a5   :  { %v1772_v10 = vpop.permute.xlu2 %1771  ;;  %1558 = vrot.lane.b32.xlu1 %v1551_v41, %s5269_s1  ;;  %4654 = vset.pattern.permute.xlu2 %v7093_v19 }
 0x5ab   :  { %v1592_v6 = vpop.permute.xlu1 %1591 }
 0x5ac   :  { %1498 = vrot.lane.b32.xlu0 %v1491_v8, %s5305_s8  ;;  %1406 = vrot.lane.b32.xlu2 %v1400_v11, %s5302_s25  ;;  %v1599_v57 = vmul.f32 %v1592_v6, %v5726_v28  ;;  %v7103_v11 = vld [vmem:[#allocation37_spill] sm:$0xff] }
 0x5ae   :  { %v6144_v3 = vpop.permute.xlu2 %1347 }
 0x5af   :  { %v1356_v5 = vmul.f32 %v6144_v3, %v7102_v50 }
 0x5b4   :  { %v1712_v26 = vpop.permute.xlu1 %1711  ;;  %1528 = vrot.lane.b32.xlu0 %v1521_v1, %s5300_s4  ;;  %1436 = vrot.lane.b32.xlu2 %v1430_v55, %s5303_s30  ;;  %v1629_v55 = vmul.f32 %v1622_v21, %v5726_v28  ;;  %v1598_v1 = vmul.f32 %v6092_v47, %v5733_v32 }
 0x5b7   :  { %v6151_v42 = vpop.permute.xlu2 %1573 }
 0x5bc   :  { %1606 = vrot.lane.b32.xlu0 %v1599_v57, %s5301_s23  ;;  %1466 = vrot.lane.b32.xlu2 %v1460_v9, %s5304_s26  ;;  %v1659_v9 = vmul.f32 %v1652_v40, %v5726_v28 }
 0x5bd   :  { %v1742_v41 = vpop.permute.xlu1 %1741 }
 0x5c0   :  { %v1368_v33 = vpop.permute.xlu2 %1367 }
 0x5c1   :  { %v1372_v8 = vmul.f32 %v1368_v33, %v7103_v11  ;;  %v1628_v33 = vmul.f32 %v6102_v48, %v5733_v32  ;;  %v1488_v48 = vpop.permute.xlu0 %1487 }
 0x5c3   :  { %1380 = vrot.lane.b32.xlu1 %v1372_v8, %s5301_s23  ;;  %v1689_v8 = vmul.f32 %v1682_v61, %v5726_v28  ;;  %v1779_v61 = vmul.f32 %v1772_v10, %v5726_v28  ;;  %v1748_v10 = vmul.f32 %v6112_v12, %v5733_v32 }
 0x5c4   :  { %1636 = vrot.lane.b32.xlu0 %v1629_v55, %s5302_s25  ;;  %1496 = vrot.lane.b32.xlu2 %v1490_v52, %s5305_s8  ;;  %v1658_v52 = vmul.f32 %v6086_v20, %v5733_v32  ;;  %v1719_v55 = vmul.f32 %v1712_v26, %v5726_v28 }
 0x5c6   :  { %v1398_v60 = vpop.permute.xlu1 %1397 }
 0x5c7   :  { %v1402_v6 = vmul.f32 %v1398_v60, %v7103_v11  ;;  %v1492_v60 = vmul.f32 %v1488_v48, %v7103_v11 }
 0x5c9   :  { %v1428_v57 = vpop.permute.xlu2 %1427  ;;  %v1596_v20 = vpop.permute.xlu0 %1595 }
 0x5ca   :  { %v1432_v21 = vmul.f32 %v1428_v57, %v7103_v11  ;;  %v1600_v57 = vmul.f32 %v1596_v20, %v5763_v37 }
 0x5cb   :  { %1410 = vrot.lane.b32.xlu1 %v1402_v6, %s5302_s25  ;;  %v1688_v6 = vmul.f32 %v6098_v51, %v5733_v32 }
 0x5cc   :  { %1666 = vrot.lane.b32.xlu0 %v1659_v9, %s5303_s30  ;;  %1604 = vrot.lane.b32.xlu2 %v1598_v1, %s5301_s23  ;;  %v1749_v1 = vmul.f32 %v1742_v41, %v5726_v28 }
 0x5cf   :  { %v1518_v9 = vpop.permute.xlu1 %1517 }
 0x5d0   :  { %v1522_v26 = vmul.f32 %v1518_v9, %v7103_v11 }
 0x5d2   :  { %v1458_v47 = vpop.permute.xlu2 %1457 }
 0x5d3   :  { %1440 = vrot.lane.b32.xlu1 %v1432_v21, %s5303_s30  ;;  %v1462_v40 = vmul.f32 %v1458_v47, %v7103_v11  ;;  %v1718_v21 = vmul.f32 %v6084_v13, %v5733_v32  ;;  %v1656_v47 = vpop.permute.xlu0 %1655 }
 0x5d4   :  { %1696 = vrot.lane.b32.xlu0 %v1689_v8, %s5304_s26  ;;  %1634 = vrot.lane.b32.xlu2 %v1628_v33, %s5302_s25 }
 0x5d8   :  { %v1548_v51 = vpop.permute.xlu1 %1547 }
 0x5d9   :  { %v1552_v41 = vmul.f32 %v1548_v51, %v7103_v11 }
 0x5db   :  { %1470 = vrot.lane.b32.xlu1 %v1462_v40, %s5304_s26  ;;  %v1626_v33 = vpop.permute.xlu2 %1625  ;;  %v1660_v40 = vmul.f32 %v1656_v47, %v5763_v37 }
 0x5dc   :  { %1726 = vrot.lane.b32.xlu0 %v1719_v55, %s5305_s8  ;;  %1664 = vrot.lane.b32.xlu2 %v1658_v52, %s5303_s30  ;;  %v1630_v8 = vmul.f32 %v1626_v33, %v5763_v37  ;;  %v6213_v55 = vpop.permute.xlu0 %1526 }
 0x5e1   :  { %v1686_v13 = vpop.permute.xlu1 %1685 }
 0x5e2   :  { %v1690_v52 = vmul.f32 %v1686_v13, %v5763_v37 }
 0x5e3   :  { %1500 = vrot.lane.b32.xlu1 %v1492_v60, %s5305_s8 }
 0x5e4   :  { %1756 = vrot.lane.b32.xlu0 %v1749_v1, %s5300_s4  ;;  %1694 = vrot.lane.b32.xlu2 %v1688_v6, %s5304_s26  ;;  %v1746_v48 = vpop.permute.xlu2 %1745  ;;  %v6217_v6 = vpop.permute.xlu0 %1556 }
 0x5e5   :  { %v1750_v9 = vmul.f32 %v1746_v48, %v5763_v37 }
 0x5ea   :  { %v1716_v60 = vpop.permute.xlu1 %1715 }
 0x5eb   :  { %1530 = vrot.lane.b32.xlu1 %v1522_v26, %s5300_s4  ;;  %v1720_v12 = vmul.f32 %v1716_v60, %v5763_v37 }
 0x5ec   :  { %1786 = vrot.lane.b32.xlu0 %v1779_v61, %s5269_s1  ;;  %1608 = vrot.lane.b32.xlu2 %v1600_v57, %s5301_s23  ;;  %v1379_v20 = vpop.permute.xlu0 %1378 }
 0x5ed   :  { %v1776_v1 = vpop.permute.xlu2 %1775  ;;  %v1386_v15 = vadd.f32 %v1379_v20, %v1356_v5 }
 0x5ee   :  { %v1780_v26 = vmul.f32 %v1776_v1, %v5763_v37 }
 0x5f3   :  { %1560 = vrot.lane.b32.xlu1 %v1552_v41, %s5269_s1  ;;  %v1353_v61 = vpop.permute.xlu1 %1352  ;;  %v1778_v41 = vmul.f32 %v6094_v56, %v5733_v32 }
 0x5f4   :  { %1724 = vrot.lane.b32.xlu2 %v1718_v21, %s5305_s8  ;;  %v1357_v19 = vmul.f32 %v1353_v61, %v7103_v11 }
 0x5f6   :  { %v1578_v57 = vpop.permute.xlu2 %1577 }
 0x5fb   :  { %1638 = vrot.lane.b32.xlu1 %v1630_v8, %s5302_s25 }
 0x5fc   :  { %1754 = vrot.lane.b32.xlu2 %v1748_v10, %s5300_s4 }
 0x5fe   :  { %v1377_v21 = vpop.permute.xlu2 %1376 }
 0x5ff   :  { %v1385_v14 = vadd.f32 %v1377_v21, %v1355_v29 }
 0x603   :  { %1668 = vrot.lane.b32.xlu1 %v1660_v40, %s5303_s30 }
 0x604   :  { %v1409_v51 = vpop.permute.xlu0 %1408 }
 0x605   :  { %v1416_v36 = vadd.f32 %v1409_v51, %v1386_v15 }
 0x606   :  { %v1407_v10 = vpop.permute.xlu2 %1406 }
 0x607   :  { %v1415_v63 = vadd.f32 %v1407_v10, %v1385_v14 }
 0x60b   :  { %1698 = vrot.lane.b32.xlu1 %v1690_v52, %s5304_s26 }
 0x60e   :  { %v1439_v8 = vpop.permute.xlu0 %1438  ;;  %v1437_v52 = vpop.permute.xlu2 %1436 }
 0x60f   :  { %v1446_v53 = vadd.f32 %v1439_v8, %v1416_v36  ;;  %v1445_v61 = vadd.f32 %v1437_v52, %v1415_v63  ;;  %v1581_v63 = vmul.f32 %v6151_v42, %v5726_v28 }
 0x613   :  { %1728 = vrot.lane.b32.xlu1 %v1720_v12, %s5305_s8 }
 0x616   :  { %v1469_v40 = vpop.permute.xlu0 %1468  ;;  %v1467_v12 = vpop.permute.xlu2 %1466 }
 0x617   :  { %v1559_v33 = vpop.permute.xlu1 %1558  ;;  %v1476_v11 = vadd.f32 %v1469_v40, %v1446_v53  ;;  %v1475_v43 = vadd.f32 %v1467_v12, %v1445_v61 }
 0x61b   :  { %1758 = vrot.lane.b32.xlu1 %v1750_v9, %s5300_s4 }
 0x61e   :  { %v1499_v48 = vpop.permute.xlu0 %1498 }
 0x61f   :  { %v1506_v3 = vadd.f32 %v1499_v48, %v1476_v11 }
 0x623   :  { %1788 = vrot.lane.b32.xlu1 %v1780_v26, %s5269_s1  ;;  %v1497_v26 = vpop.permute.xlu2 %1496 }
 0x624   :  { %v1505_v50 = vadd.f32 %v1497_v26, %v1475_v43  ;;  %v1580_v43 = vmul.f32 %v6118_v38, %v5733_v32 }
 0x626   :  { %v1529_v9 = vpop.permute.xlu0 %1528 }
 0x627   :  { %v1536_v54 = vadd.f32 %v1529_v9, %v1506_v3 }
 0x629   :  { %v1566_v14 = vadd.f32 %v1559_v33, %v1536_v54 }
 0x62b   :  { %1784 = vrot.lane.b32.xlu1 %v1778_v41, %s5269_s1  ;;  %v1605_v30 = vpop.permute.xlu2 %1604  ;;  %v1584_v53 = vadd.f32 %v1581_v63, %v1566_v14 }
 0x62e   :  { %v1607_v34 = vpop.permute.xlu0 %1606 }
 0x62f   :  { %v1614_v5 = vadd.f32 %v1607_v34, %v1584_v53 }
 0x633   :  { %v1635_v41 = vpop.permute.xlu2 %1634 }
 0x635   :  { %v1381_v47 = vpop.permute.xlu1 %1380 }
 0x636   :  { %v1637_v31 = vpop.permute.xlu0 %1636  ;;  %v1387_v4 = vadd.f32 %v1381_v47, %v1357_v19 }
 0x637   :  { %v1644_v20 = vadd.f32 %v1637_v31, %v1614_v5 }
 0x63b   :  { %v1665_v62 = vpop.permute.xlu2 %1664 }
 0x63d   :  { %v1411_v13 = vpop.permute.xlu1 %1410 }
 0x63e   :  { %v1667_v24 = vpop.permute.xlu0 %1666  ;;  %v1417_v18 = vadd.f32 %v1411_v13, %v1387_v4  ;;  %v1582_v4 = vmul.f32 %v1578_v57, %v5763_v37 }
 0x63f   :  { %v1674_v54 = vadd.f32 %v1667_v24, %v1644_v20 }
 0x643   :  { %v1695_v27 = vpop.permute.xlu2 %1694 }
 0x645   :  { %v1441_v60 = vpop.permute.xlu1 %1440 }
 0x646   :  { %v1697_v39 = vpop.permute.xlu0 %1696  ;;  %v1447_v2 = vadd.f32 %v1441_v60, %v1417_v18  ;;  %v1535_v18 = vadd.f32 %v6213_v55, %v1505_v50 }
 0x647   :  { %v1704_v21 = vadd.f32 %v1697_v39, %v1674_v54  ;;  %v6241_v39 = vld [vmem:[%s7071_s9] sm:$0xff]  ;;  %v4861_v54 = vld [vmem:[#allocation17 + $0x1] ss:$0 sm:$0xff] }
 0x64b   :  { %v1609_v29 = vpop.permute.xlu2 %1608 }
 0x64d   :  { %v1471_v1 = vpop.permute.xlu1 %1470 }
 0x64e   :  { %v1477_v46 = vadd.f32 %v1471_v1, %v1447_v2  ;;  %v1727_v47 = vpop.permute.xlu0 %1726 }
 0x653   :  { %v1725_v50 = vpop.permute.xlu2 %1724 }
 0x655   :  { %v1501_v16 = vpop.permute.xlu1 %1500 }
 0x656   :  { %v1507_v44 = vadd.f32 %v1501_v16, %v1477_v46  ;;  %v1565_v46 = vadd.f32 %v6217_v6, %v1535_v18  ;;  %v1734_v6 = vadd.f32 %v1727_v47, %v1704_v21 }
 0x658   :  { %v1583_v11 = vadd.f32 %v1580_v43, %v1565_v46  ;;  %v7105_v46 = vld [vmem:[#allocation38_spill] sm:$0xff] }
 0x65a   :  { %v1613_v51 = vadd.f32 %v1605_v30, %v1583_v11  ;;  %v4860_v11 = vld [vmem:[%s6966_s16 + $0x1] ss:$0 sm:$0xff] }
 0x65b   :  { %v1755_v48 = vpop.permute.xlu2 %1754 }
 0x65c   :  { %v1643_v33 = vadd.f32 %v1635_v41, %v1613_v51 }
 0x65d   :  { %v1531_v56 = vpop.permute.xlu1 %1530 }
 0x65e   :  { %v1537_v19 = vadd.f32 %v1531_v56, %v1507_v44  ;;  %v1757_v44 = vpop.permute.xlu0 %1756  ;;  %v1673_v13 = vadd.f32 %v1665_v62, %v1643_v33  ;;  %v1818_v62 = vpop.f32.mrf.mxu2 }
 0x65f   :  { %v1764_v52 = vadd.f32 %v1757_v44, %v1734_v6 }
 0x660   :  { %v1703_v34 = vadd.f32 %v1695_v27, %v1673_v13  ;;  %v6250_v27 = vld [vmem:[%s7071_s9 + $0x8] sm:$0xf] }
 0x662   :  { %v1733_v31 = vadd.f32 %v1725_v50, %v1703_v34 }
 0x665   :  { %v1561_v25 = vpop.permute.xlu1 %1560 }
 0x666   :  { %v1567_v58 = vadd.f32 %v1561_v25, %v1537_v19  ;;  %v1787_v10 = vpop.permute.xlu0 %1786 }
 0x668   :  { %v1585_v36 = vadd.f32 %v1582_v4, %v1567_v58  ;;  %v1985_v58 = vpop.f32.mrf.mxu1 }
 0x66a   :  { %v1615_v2 = vadd.f32 %v1609_v29, %v1585_v36 }
 0x66d   :  { %v1639_v23 = vpop.permute.xlu1 %1638 }
 0x66e   :  { %v1645_v25 = vadd.f32 %v1639_v23, %v1615_v2  ;;  %v1794_v23 = vadd.f32 %v1787_v10, %v1764_v52 }
 0x675   :  { %v1669_v35 = vpop.permute.xlu1 %1668 }
 0x676   :  { %v1675_v57 = vadd.f32 %v1669_v35, %v1645_v25  ;;  %v1763_v35 = vadd.f32 %v1755_v48, %v1733_v31 }
 0x67d   :  { %v1699_v45 = vpop.permute.xlu1 %1698 }
 0x67e   :  { %v1705_v55 = vadd.f32 %v1699_v45, %v1675_v57  ;;  %v1988_v57 = vpop.f32.mrf.mxu1 }
 0x685   :  { %v1729_v15 = vpop.permute.xlu1 %1728 }
 0x686   :  { %v1735_v42 = vadd.f32 %v1729_v15, %v1705_v55 }
 0x68d   :  { %v1759_v16 = vpop.permute.xlu1 %1758 }
 0x68e   :  { %v1765_v8 = vadd.f32 %v1759_v16, %v1735_v42 }
 0x695   :  { %v1789_v40 = vpop.permute.xlu1 %1788 }
 0x696   :  { %v1795_v38 = vadd.f32 %v1789_v40, %v1765_v8 }
 0x698   :  { %1837 = vmatpush.msrb.mxu3 %v1795_v38 }
 0x69a   :  { %1838 = vmatpush.msrb.mxu3 %v1794_v23 }
 0x69d   :  { %v1785_v24 = vpop.permute.xlu1 %1784 }
 0x69e   :  { %v1793_v45 = vadd.f32 %v1785_v24, %v1763_v35 }
 0x6a0   :  { %1839 = vmatpush.msrb.mxu3 %v1793_v45 }
 0x6a1   :  { %4420 = vmatmul.msk.f32.vlgmr.msrb.gmra.mxu3 %vm1014_vm8, %v6241_v39 }
 0x6a2   :  { %1959 = vmatpush.msra.mxu3 %v5846_v7  ;;  %v1821_v7 = vpop.f32.mrf.mxu2 }
 0x6a4   :  { %1960 = vmatpush.msra.mxu3 %v5857_v17 }
 0x6a9   :  { %4421 = vmatmul.msk.f32.gmra.mxu3 %vm1014_vm8, %v6250_v27 }
 0x6aa   :  { %v1897_v41 = vpop.f32.mrf.mxu2 }
 0x6b2   :  { %v1900_v63 = vpop.f32.mrf.mxu2 }
 0x6ba   :  { %v2073_v10 = vpop.f32.mrf.mxu2 }
 0x724   :  { %v1841_v30 = vpop.f32.mrf.mxu3 }
 0x725   :  { %v1842_v60 = vadd.f32 %v1841_v30, %v1818_v62  ;;  %v7106_v62 = vld [vmem:[#allocation39_spill] sm:$0xff] }
 0x726   :  { %v2074_v30 = vadd.f32 %v7106_v62, %v2073_v10  ;;  %v7112_v62 = vld [vmem:[#allocation45_spill] sm:$0xff] }
 0x727   :  { %v1847_v12 = vadd.f32 %v5876_v22, %v1842_v60 }
 0x729   :  { %v1849_v1 = vmax.f32 %v1847_v12, 0.0 }
 0x72b   :  { %4422 = vmatmul.msk.f32.vlgmr.msra.gmra.mxu0 %vm985_vm4, %v1849_v1  ;;  %4428 = vmatmul.msk.f32.vlgmr.msra.gmra.mxu3 %vm985_vm4, %v1849_v1 }
 0x72c   :  { %v1844_v17 = vpop.f32.mrf.mxu3 }
 0x72d   :  { %v1845_v9 = vadd.f32 %v1844_v17, %v1821_v7 }
 0x72f   :  { %v1848_v26 = vadd.f32 %v5876_v22, %v1845_v9  ;;  %v7104_v22 = vld [vmem:[#allocation35_spill] sm:$0xff] }
 0x731   :  { %v1850_v56 = vmax.f32 %v1848_v26, 0.0  ;;  %v7107_v26 = vld [vmem:[#allocation40_spill] sm:$0xff] }
 0x733   :  { %4423 = vmatmul.msk.f32.gmra.mxu0 %vm985_vm4, %v1850_v56  ;;  %4429 = vmatmul.msk.f32.gmra.mxu3 %vm985_vm4, %v1850_v56 }
 0x73b   :  { %4434 = vmatmul.msk.f32.vlgmr.msrb.gmra.mxu0 %vm985_vm4, %v1849_v1 }
 0x743   :  { %4435 = vmatmul.msk.f32.gmra.mxu0 %vm985_vm4, %v1850_v56 }
 0x7a8   :  { %v1874_v61 = vpop.f32.mrf.mxu0 }
 0x7a9   :  { %v1875_v3 = vadd.f32 %v5897_v49, %v1874_v61 }
 0x7ab   :  { %v1903_v19 = vadd.f32 %v1897_v41, %v1875_v3 }
 0x7ad   :  { %v1905_v47 = vadd.f32 %v5901_v59, %v1903_v19 }
 0x7ae   :  { %v1962_v4 = vpop.f32.mrf.mxu3 }
 0x7af   :  { %v4426_v29 = vmul.f32 -1.442695, %v1905_v47  ;;  %v1963_v15 = vadd.f32 %v7104_v22, %v1962_v4  ;;  %v2076_v4 = vpop.f32.mrf.mxu2 }
 0x7b0   :  { %v1877_v18 = vpop.f32.mrf.mxu0 }
 0x7b1   :  { %4737 = vpow2.f32 %v4426_v29  ;;  %v1991_v14 = vadd.f32 %v1985_v58, %v1963_v15  ;;  %v1878_v36 = vadd.f32 %v5897_v49, %v1877_v18 }
 0x7b3   :  { %v1993_v53 = vadd.f32 %v7105_v46, %v1991_v14  ;;  %v1904_v2 = vadd.f32 %v1900_v63, %v1878_v36 }
 0x7b5   :  { %v4432_v44 = vmul.f32 -1.442695, %v1993_v53  ;;  %v1906_v43 = vadd.f32 %v5901_v59, %v1904_v2  ;;  %v4862_v2 = vld [vmem:[#allocation17 + $0x2] ss:$0 sm:$0xff] }
 0x7b6   :  { %v1965_v5 = vpop.f32.mrf.mxu3 }
 0x7b7   :  { %v4738_v25 = vpop.eup %4737  ;;  %4739 = vpow2.f32 %v4432_v44  ;;  %v4427_v16 = vmul.f32 -1.442695, %v1906_v43  ;;  %v1966_v20 = vadd.f32 %v4860_v11, %v1965_v5  ;;  %v2077_v44 = vadd.f32 %v4862_v2, %v2076_v4 }
 0x7b8   :  { %v1913_v50 = vadd.f32 1.0, %v4738_v25  ;;  %v2050_v23 = vpop.f32.mrf.mxu0  ;;  %v7124_v4 = vmov 14  }
 0x7b9   :  { %4741 = vpow2.f32 %v4427_v16  ;;  %v1992_v49 = vadd.f32 %v1988_v57, %v1966_v20  ;;  %v2051_v56 = vadd.f32 %v7107_v26, %v2050_v23  ;;  %v4863_v20 = vld [vmem:[%s6966_s16 + $0x2] ss:$0 sm:$0xff]  ;;  %v7117_v26 = vmov 5  }
 0x7ba   :  { %4743 = vrcp.f32 %v1913_v50  ;;  %v1926_v13 = vand.u32 2147483648, %v1913_v50  ;;  %v1924_v34 = vand.u32 2147483647, %v1913_v50  ;;  %vm1920_vm14 = vweird.f32 %v1913_v50 }
 0x7bb   :  { %v1994_v55 = vadd.f32 %v4861_v54, %v1992_v49 }
 0x7bc   :  { %v1927_v60 = vor.u32 1.1754944e-38, %v1926_v13  ;;  %vm1925_vm0 = vcmp.eq.f32.partialorder %v1924_v34, 8.507059e+37 }
 0x7bd   :  { %v4740_v51 = vpop.eup %4739  ;;  %v4433_v21 = vmul.f32 -1.442695, %v1994_v55 }
 0x7be   :  { %v2001_v42 = vadd.f32 1.0, %v4740_v51 }
 0x7bf   :  { %v4742_v59 = vpop.eup %4741  ;;  %4745 = vpow2.f32 %v4433_v21 }
 0x7c0   :  { %v4744_v33 = vpop.eup %4743  ;;  %4747 = vrcp.f32 %v2001_v42  ;;  %v1914_v6 = vadd.f32 1.0, %v4742_v59  ;;  %v2014_v9 = vand.u32 2147483648, %v2001_v42  ;;  %vm2008_vm2 = vweird.f32 %v2001_v42  ;;  %v2053_v53 = vpop.f32.mrf.mxu0 }
 0x7c1   :  { %v1916_v8 = vmul.f32 %v4744_v33, %v1913_v50  ;;  %vm1921_vm13 = vweird.f32 %v4744_v33  ;;  %v2012_v19 = vand.u32 2147483647, %v2001_v42  ;;  %v2054_v57 = vadd.f32 %v4863_v20, %v2053_v53 }
 0x7c2   :  { %4749 = vrcp.f32 %v1914_v6  ;;  %vm1922_vm15 = vmor %vm1920_vm14, %vm1921_vm13  ;;  %v1939_v47 = vand.u32 2147483647, %v1914_v6  ;;  %v1941_v58 = vand.u32 2147483648, %v1914_v6  ;;  %v2015_v14 = vor.u32 1.1754944e-38, %v2014_v9 }
 0x7c3   :  { %v1917_v40 = vsub.f32 1.0, %v1916_v8  ;;  %vm1935_vm9 = vweird.f32 %v1914_v6  ;;  %vm2013_vm10 = vcmp.eq.f32.partialorder %v2012_v19, 8.507059e+37  ;;  %v7116_v9 = vmov 13  }
 0x7c4   :  { %v1942_v43 = vor.u32 1.1754944e-38, %v1941_v58  ;;  %vm1940_vm12 = vcmp.eq.f32.partialorder %v1939_v47, 8.507059e+37  ;;  %v7121_v19 = vmov 10   ;;  %v7122_v47 = vmov 1  }
 0x7c5   :  { %v4746_v52 = vpop.eup %4745  ;;  %v1918_v38 = vmul.f32 %v4744_v33, %v1917_v40  ;;  %v7123_v58 = vmov 7  }
 0x7c6   :  { %v4748_v48 = vpop.eup %4747  ;;  %v6271_v31 = vadd.f32 1.0, %v4746_v52 }
 0x7c7   :  { %v2004_v35 = vmul.f32 %v4748_v48, %v2001_v42  ;;  %v1919_v24 = vadd.f32 %v4744_v33, %v1918_v38  ;;  %vm2009_vm1 = vweird.f32 %v4748_v48  ;;  %v7109_v38 = vld [vmem:[#allocation42_spill] sm:$0xff] }
 0x7c8   :  { %v4750_v45 = vpop.eup %4749  ;;  %4751 = vrcp.f32 %v6271_v31  ;;  %vm2010_vm7 = vmor %vm2008_vm2, %vm2009_vm1  ;;  %v2029_v49 = vand.u32 2147483648, %v6271_v31  ;;  %v2027_v51 = vand.u32 2147483647, %v6271_v31  ;;  %vm2023_vm14 = vweird.f32 %v6271_v31 }
 0x7c9   :  { %v2005_v12 = vsub.f32 1.0, %v2004_v35  ;;  %v1923_v1 = vsel %vm1922_vm15, %v4744_v33, %v1919_v24  ;;  %v1931_v7 = vmul.f32 %v4750_v45, %v1914_v6  ;;  %vm1936_vm3 = vweird.f32 %v4750_v45  ;;  %v7108_v6 = vld [vmem:[#allocation41_spill] sm:$0xff]  ;;  %v7111_v35 = vld [vmem:[#allocation44_spill] sm:$0xff] }
 0x7ca   :  { %v1928_v17 = vsel %vm1925_vm0, %v1927_v60, %v1923_v1  ;;  %vm1937_vm11 = vmor %vm1935_vm9, %vm1936_vm3  ;;  %v2030_v40 = vor.u32 1.1754944e-38, %v2029_v49  ;;  %vm2028_vm0 = vcmp.eq.f32.partialorder %v2027_v51, 8.507059e+37  ;;  %v4865_v60 = vld [vmem:[%s6964_s14 + $0x10] sm:$0xff]  ;;  %v7114_v1 = vld [vmem:[#allocation47_spill] sm:$0xff] }
 0x7cb   :  { %v2006_v41 = vmul.f32 %v4748_v48, %v2005_v12  ;;  %v2079_v61 = vmul.f32 %v2074_v30, %v1928_v17  ;;  %v1932_v3 = vsub.f32 1.0, %v1931_v7  ;;  %v4864_v30 = vld [vmem:[%s6964_s14 + $0x18] sm:$0xff]  ;;  %v7115_v17 = vmov 4  }
 0x7cc   :  { %v7113_v12 = vld [vmem:[#allocation46_spill] sm:$0xff] }
 0x7cd   :  { %v2007_v29 = vadd.f32 %v4748_v48, %v2006_v41  ;;  %v2081_v22 = vadd.f32 %v2079_v61, %v2051_v56  ;;  %v1933_v15 = vmul.f32 %v4750_v45, %v1932_v3  ;;  %v7118_v56 = vmov 9  }
 0x7ce   :  { %v4752_v18 = vpop.eup %4751  ;;  %v7119_v41 = vmov 15   ;;  %v7120_v61 = vmov 6  }
 0x7cf   :  { %v2019_v36 = vmul.f32 %v4752_v18, %v6271_v31  ;;  %v2011_v63 = vsel %vm2010_vm7, %v4748_v48, %v2007_v29  ;;  %4753 = vtanh.f32 %v2081_v22  ;;  %v1934_v46 = vadd.f32 %v4750_v45, %v1933_v15  ;;  %v7110_v48 = vld [vmem:[#allocation43_spill] sm:$0xff] }
 0x7d0   :  { %v2016_v25 = vsel %vm2013_vm10, %v2015_v14, %v2011_v63  ;;  %vm2024_vm13 = vweird.f32 %v4752_v18  ;;  %v7125_v29 = vmov 11   ;;  %v7126_v22 = vmov 8  }
 0x7d1   :  { %v2020_v5 = vsub.f32 1.0, %v2019_v36  ;;  %v1938_v16 = vsel %vm1937_vm11, %v4750_v45, %v1934_v46  ;;  %v2085_v55 = vsub.f32 1.0, %v2016_v25  ;;  %v2089_v8 = vmul.f32 %v2016_v25, %v7108_v6  ;;  %vm2025_vm15 = vmor %vm2023_vm14, %vm2024_vm13 }
 0x7d2   :  { %v1943_v11 = vsel %vm1940_vm12, %v1942_v43, %v1938_v16  ;;  %v7127_v15 = vmov 12   ;;  %v7129_v36 = vmov 0   ;;  %v7130_v63 = vmov 3  }
 0x7d3   :  { %v2021_v50 = vmul.f32 %v4752_v18, %v2020_v5  ;;  %v2080_v54 = vmul.f32 %v2077_v44, %v1943_v11 }
 0x7d5   :  { %v4754_v21 = vpop.eup %4753  ;;  %v2022_v42 = vadd.f32 %v4752_v18, %v2021_v50  ;;  %v2082_v59 = vadd.f32 %v2080_v54, %v2054_v57 }
 0x7d6   :  { %v2087_v33 = vmul.f32 %v4754_v21, %v2085_v55  ;;  %v7131_v21 = vld [vmem:[#allocation36_spill] sm:$0xff] }
 0x7d7   :  { %v2026_v10 = vsel %vm2025_vm15, %v4752_v18, %v2022_v42  ;;  %4755 = vtanh.f32 %v2082_v59  ;;  %v7128_v18 = vmov 2  }
 0x7d8   :  { %v6284_v13 = vadd.f32 %v2089_v8, %v2087_v33  ;;  %v2031_v52 = vsel %vm2028_vm0, %v2030_v40, %v2026_v10 }
 0x7d9   :  { %v2086_v34 = vsub.f32 1.0, %v2031_v52  ;;  %v2090_v24 = vmul.f32 %v2031_v52, %v7111_v35 }
 0x7da   :  { %4442 = vmatmul.msk.f32.vlgmr.msrb.gmra.mxu1 %vm985_vm4, %v6284_v13 }
 0x7db   :  { %2852 = vmatpush.msrb.mxu1 %v7109_v38 }
 0x7dd   :  { %v4756_v23 = vpop.eup %4755  ;;  %2853 = vmatpush.msrb.mxu1 %v7110_v48 }
 0x7de   :  { %v2088_v31 = vmul.f32 %v4756_v23, %v2086_v34 }
 0x7e0   :  { %v6291_v45 = vadd.f32 %v2090_v24, %v2088_v31 }
 0x7e2   :  { %4438 = vmatpush.msk.msrb.mxu3 %vm499_vm5, %v6291_v45  ;;  %4443 = vmatmul.msk.f32.gmra.mxu1 %vm985_vm4, %v6291_v45 }
 0x7e4   :  { %2111 = vmatpush.msrb.mxu3 %v6284_v13 }
 0x7e5   :  { %4439 = vmatmul.msk.f32.vlgmr.msrb.gmra.mxu3 %vm489_vm6, %v7112_v62 }
 0x7e6   :  { %2741 = vmatpush.msra.mxu3 %v4864_v30 }
 0x7e8   :  { %2742 = vmatpush.msra.mxu3 %v4865_v60 }
 0x7ea   :  { %4448 = vmatmul.msk.f32.vlgmr.msra.gmra.mxu1 %vm985_vm4, %v6284_v13 }
 0x7ed   :  { %4440 = vmatmul.msk.f32.gmra.mxu3 %vm489_vm6, %v7113_v12 }
 0x7f2   :  { %4449 = vmatmul.msk.f32.gmra.mxu1 %vm985_vm4, %v6291_v45 }
 0x7f5   :  { %4441 = vmatmul.msk.f32.gmra.mxu3 %vm489_vm6, %v7114_v1 }
 0x7fa   :  { %4460 = vmatmul.msk.f32.vlgmr.msrb.gmra.mxu1 %vm985_vm4, %v6284_v13 }
 0x802   :  { %4461 = vmatmul.msk.f32.gmra.mxu1 %vm985_vm4, %v6291_v45 }
 0x868   :  { %v2113_v7 = vpop.f32.mrf.mxu3 }
 0x869   :  { %2201 = vperm.xlu1 %4656, %v2113_v7   ;;  %2171 = vperm.xlu0 %4655, %v2113_v7  }
 0x86a   :  { %2141 = vperm.xlu2 %4654, %v2113_v7  }
 0x870   :  { %v6324_v3 = vpop.f32.mrf.mxu3 }
 0x871   :  { %4657 = vset.pattern.permute.xlu1 %v7115_v17  ;;  %4665 = vset.pattern.permute.xlu0 %v7116_v9 }
 0x872   :  { %4658 = vset.pattern.permute.xlu2 %v7117_v26  ;;  %2231 = vperm.xlu1 %4657, %v2113_v7  }
 0x873   :  { %2489 = vperm.xlu0 %4665, %v2113_v7   ;;  %2261 = vperm.xlu2 %4658, %v2113_v7  }
 0x878   :  { %v6339_v14 = vpop.f32.mrf.mxu3 }
 0x87a   :  { %4661 = vset.pattern.permute.xlu1 %v7118_v56 }
 0x87b   :  { %4667 = vset.pattern.permute.xlu0 %v7119_v41  ;;  %4659 = vset.pattern.permute.xlu2 %v7120_v61 }
 0x87c   :  { %2369 = vperm.xlu1 %4661, %v2113_v7   ;;  %2549 = vperm.xlu0 %4667, %v2113_v7  }
 0x87d   :  { %2291 = vperm.xlu2 %4659, %v2113_v7  }
 0x884   :  { %4662 = vset.pattern.permute.xlu1 %v7121_v19  ;;  %4670 = vset.pattern.permute.xlu0 %v7122_v47 }
 0x885   :  { %4660 = vset.pattern.permute.xlu2 %v7123_v58  ;;  %2399 = vperm.xlu1 %4662, %v2113_v7  }
 0x886   :  { %2321 = vperm.xlu2 %4660, %v2113_v7   ;;  %2145 = vperm.xlu0 %4670, %v6324_v3  }
 0x88d   :  { %4666 = vset.pattern.permute.xlu1 %v7124_v4 }
 0x88e   :  { %4663 = vset.pattern.permute.xlu2 %v7125_v29  ;;  %4675 = vset.pattern.permute.xlu0 %v7120_v61 }
 0x88f   :  { %2519 = vperm.xlu1 %4666, %v2113_v7   ;;  %2429 = vperm.xlu2 %4663, %v2113_v7  }
 0x890   :  { %2295 = vperm.xlu0 %4675, %v6324_v3  }
 0x897   :  { %4669 = vset.pattern.permute.xlu1 %v7126_v22  ;;  %4664 = vset.pattern.permute.xlu2 %v7127_v15 }
 0x898   :  { %4680 = vset.pattern.permute.xlu0 %v7127_v15  ;;  %2351 = vperm.xlu1 %4669, %v2113_v7  }
 0x899   :  { %2459 = vperm.xlu2 %4664, %v2113_v7   ;;  %2463 = vperm.xlu0 %4680, %v6324_v3  }
 0x8a0   :  { %4671 = vset.pattern.permute.xlu1 %v7128_v18 }
 0x8a1   :  { %4668 = vset.pattern.permute.xlu2 %v7129_v36  ;;  %4690 = vset.pattern.permute.xlu0 %v7117_v26 }
 0x8a2   :  { %2124 = vperm.xlu2 %4668, %v2113_v7   ;;  %2175 = vperm.xlu1 %4671, %v6324_v3  }
 0x8a3   :  { %2269 = vperm.xlu0 %4690, %v6339_v14  }
 0x8aa   :  { %4673 = vset.pattern.permute.xlu2 %v7115_v17  ;;  %4672 = vset.pattern.permute.xlu1 %v7130_v63 }
 0x8ab   :  { %4693 = vset.pattern.permute.xlu0 %v7118_v56  ;;  %2235 = vperm.xlu2 %4673, %v6324_v3  }
 0x8ac   :  { %2205 = vperm.xlu1 %4672, %v6324_v3   ;;  %2377 = vperm.xlu0 %4693, %v6339_v14  }
 0x8b3   :  { %4674 = vset.pattern.permute.xlu2 %v7117_v26 }
 0x8b4   :  { %4676 = vset.pattern.permute.xlu1 %v7123_v58  ;;  %4695 = vset.pattern.permute.xlu0 %v7125_v29 }
 0x8b5   :  { %2265 = vperm.xlu2 %4674, %v6324_v3   ;;  %2325 = vperm.xlu1 %4676, %v6324_v3  }
 0x8b6   :  { %2437 = vperm.xlu0 %4695, %v6339_v14  }
 0x8bd   :  { %4678 = vset.pattern.permute.xlu2 %v7121_v19  ;;  %4677 = vset.pattern.permute.xlu1 %v7118_v56 }
 0x8be   :  { %2403 = vperm.xlu2 %4678, %v6324_v3   ;;  %2373 = vperm.xlu1 %4677, %v6324_v3  }
 0x8bf   :  { %4702 = vset.pattern.permute.xlu0 %v7119_v41 }
 0x8c4   :  { %v6362_v46 = vpop.permute.xlu2 %2141 }
 0x8c5   :  { %v2152_v31 = vmul.f32 %v6362_v46, %v5629_v0 }
 0x8c6   :  { %4679 = vset.pattern.permute.xlu2 %v7125_v29  ;;  %4681 = vset.pattern.permute.xlu1 %v7116_v9  ;;  %v7132_v29 = vld [vmem:[#allocation37_spill] sm:$0xff] }
 0x8c7   :  { %2433 = vperm.xlu2 %4679, %v6324_v3   ;;  %2493 = vperm.xlu1 %4681, %v6324_v3  }
 0x8cd   :  { %v6368_v53 = vpop.permute.xlu2 %2261 }
 0x8cf   :  { %4683 = vset.pattern.permute.xlu2 %v7119_v41  ;;  %4682 = vset.pattern.permute.xlu1 %v7124_v4 }
 0x8d0   :  { %2553 = vperm.xlu2 %4683, %v6324_v3   ;;  %2523 = vperm.xlu1 %4682, %v6324_v3  }
 0x8d7   :  { %v2292_v2 = vpop.permute.xlu2 %2291 }
 0x8d8   :  { %4684 = vset.pattern.permute.xlu2 %v7129_v36  ;;  %4687 = vset.pattern.permute.xlu1 %v7128_v18  ;;  %v2302_v44 = vmul.f32 %v2292_v2, %v5629_v0 }
 0x8d9   :  { %2129 = vperm.xlu2 %4684, %v6324_v3   ;;  %2179 = vperm.xlu1 %4687, %v6339_v14  }
 0x8da   :  { %2308 = vrot.lane.b32.xlu0 %v2302_v44, %s5300_s4 }
 0x8db   :  { %v6380_v43 = vpop.permute.xlu1 %2201  ;;  %v2172_v5 = vpop.permute.xlu0 %2171 }
 0x8dc   :  { %v2182_v12 = vmul.f32 %v2172_v5, %v5629_v0  ;;  %v2212_v26 = vmul.f32 %v6380_v43, %v5629_v0 }
 0x8e0   :  { %v2322_v25 = vpop.permute.xlu2 %2321 }
 0x8e1   :  { %4685 = vset.pattern.permute.xlu2 %v7126_v22  ;;  %4691 = vset.pattern.permute.xlu1 %v7120_v61  ;;  %v2332_v16 = vmul.f32 %v2322_v25, %v5629_v0 }
 0x8e2   :  { %2355 = vperm.xlu2 %4685, %v6324_v3   ;;  %2299 = vperm.xlu1 %4691, %v6339_v14  }
 0x8e3   :  { %2338 = vrot.lane.b32.xlu0 %v2332_v16, %s5269_s1 }
 0x8e4   :  { %v6388_v11 = vpop.permute.xlu1 %2231 }
 0x8e5   :  { %v6390_v20 = vpop.permute.xlu0 %2489  ;;  %v2242_v3 = vmul.f32 %v6388_v11, %v5629_v0 }
 0x8e9   :  { %v6392_v57 = vpop.permute.xlu2 %2429 }
 0x8ea   :  { %4686 = vset.pattern.permute.xlu2 %v7122_v47  ;;  %4692 = vset.pattern.permute.xlu1 %v7123_v58 }
 0x8eb   :  { %2329 = vperm.xlu1 %4692, %v6339_v14   ;;  %2149 = vperm.xlu2 %4686, %v6339_v14  }
 0x8ee   :  { %v6398_v50 = vpop.permute.xlu1 %2369  ;;  %v6400_v49 = vpop.permute.xlu0 %2549 }
 0x8ef   :  { %v2380_v2 = vmul.f32 %v6398_v50, %v5733_v32 }
 0x8f3   :  { %4696 = vset.pattern.permute.xlu1 %v7127_v15  ;;  %4688 = vset.pattern.permute.xlu2 %v7130_v63  ;;  %v6404_v54 = vpop.permute.xlu2 %2459  ;;  %v2272_v15 = vmul.f32 %v6368_v53, %v5629_v0 }
 0x8f4   :  { %2467 = vperm.xlu1 %4696, %v6339_v14   ;;  %2209 = vperm.xlu2 %4688, %v6339_v14  }
 0x8f7   :  { %v6408_v55 = vpop.permute.xlu1 %2399 }
 0x8f8   :  { %v2146_v51 = vpop.permute.xlu0 %2145  ;;  %v2410_v5 = vmul.f32 %v6408_v55, %v5733_v32 }
 0x8f9   :  { %v2153_v42 = vmul.f32 %v2146_v51, %v7131_v21  ;;  %v2440_v51 = vmul.f32 %v6392_v57, %v5733_v32 }
 0x8fb   :  { %2160 = vrot.lane.b32.xlu0 %v2153_v42, %s5301_s23 }
 0x8fc   :  { %4697 = vset.pattern.permute.xlu1 %v7116_v9  ;;  %4689 = vset.pattern.permute.xlu2 %v7115_v17  ;;  %v6414_v59 = vpop.permute.xlu2 %2124 }
 0x8fd   :  { %2497 = vperm.xlu1 %4697, %v6339_v14   ;;  %2239 = vperm.xlu2 %4689, %v6339_v14  }
 0x901   :  { %v6418_v33 = vpop.permute.xlu1 %2519 }
 0x902   :  { %v2296_v60 = vpop.permute.xlu0 %2295 }
 0x903   :  { %v2303_v56 = vmul.f32 %v2296_v60, %v7131_v21 }
 0x905   :  { %4700 = vset.pattern.permute.xlu1 %v7129_v36  ;;  %4694 = vset.pattern.permute.xlu2 %v7121_v19  ;;  %v2236_v6 = vpop.permute.xlu2 %2235 }
 0x906   :  { %2134 = vperm.xlu1 %4700, %v6339_v14   ;;  %2407 = vperm.xlu2 %4694, %v6339_v14   ;;  %v2243_v35 = vmul.f32 %v2236_v6, %v7131_v21 }
 0x90a   :  { %v6424_v8 = vpop.permute.xlu1 %2351 }
 0x90b   :  { %v2464_v9 = vpop.permute.xlu0 %2463 }
 0x90c   :  { %v2471_v25 = vmul.f32 %v2464_v9, %v5726_v28 }
 0x90e   :  { %4698 = vset.pattern.permute.xlu2 %v7124_v4 }
 0x90f   :  { %v2266_v10 = vpop.permute.xlu2 %2265  ;;  %2527 = vperm.xlu2 %4698, %v6339_v14  }
 0x910   :  { %v2273_v1 = vmul.f32 %v2266_v10, %v7131_v21 }
 0x914   :  { %v2176_v40 = vpop.permute.xlu1 %2175 }
 0x915   :  { %v2183_v52 = vmul.f32 %v2176_v40, %v7131_v21  ;;  %v2270_v19 = vpop.permute.xlu0 %2269  ;;  %v2470_v40 = vmul.f32 %v6404_v54, %v5733_v32 }
 0x916   :  { %v2274_v10 = vmul.f32 %v2270_v19, %v7132_v29 }
 0x917   :  { %4699 = vset.pattern.permute.xlu2 %v7119_v41  ;;  %2190 = vrot.lane.b32.xlu0 %v2183_v52, %s5302_s25 }
 0x918   :  { %v2404_v38 = vpop.permute.xlu2 %2403  ;;  %2557 = vperm.xlu2 %4699, %v6339_v14  }
 0x919   :  { %v2411_v18 = vmul.f32 %v2404_v38, %v5726_v28 }
 0x91e   :  { %v2206_v34 = vpop.permute.xlu1 %2205 }
 0x91f   :  { %v2213_v23 = vmul.f32 %v2206_v34, %v7131_v21 }
 0x920   :  { %4701 = vset.pattern.permute.xlu2 %v7126_v22 }
 0x921   :  { %v2434_v48 = vpop.permute.xlu2 %2433  ;;  %2220 = vrot.lane.b32.xlu0 %v2213_v23, %s5303_s30  ;;  %2359 = vperm.xlu2 %4701, %v6339_v14   ;;  %v2378_v14 = vpop.permute.xlu0 %2377 }
 0x922   :  { %v2441_v44 = vmul.f32 %v2434_v48, %v5726_v28 }
 0x927   :  { %v2326_v24 = vpop.permute.xlu1 %2325 }
 0x928   :  { %v2333_v62 = vmul.f32 %v2326_v24, %v7131_v21 }
 0x929   :  { %2250 = vrot.lane.b32.xlu0 %v2243_v35, %s5304_s26  ;;  %2158 = vrot.lane.b32.xlu2 %v2152_v31, %s5301_s23  ;;  %v2438_v53 = vpop.permute.xlu0 %2437  ;;  %v2382_v35 = vmul.f32 %v2378_v14, %v5763_v37 }
 0x92a   :  { %v6442_v30 = vpop.permute.xlu2 %2553  ;;  %2340 = vrot.lane.b32.xlu1 %v2333_v62, %s5269_s1  ;;  %v2442_v9 = vmul.f32 %v2438_v53, %v5763_v37 }
 0x92b   :  { %v2561_v54 = vmul.f32 %v6442_v30, %v5726_v28 }
 0x930   :  { %v2374_v7 = vpop.permute.xlu1 %2373 }
 0x931   :  { %2280 = vrot.lane.b32.xlu0 %v2273_v1, %s5305_s8  ;;  %2188 = vrot.lane.b32.xlu2 %v2182_v12, %s5302_s25  ;;  %v2381_v47 = vmul.f32 %v2374_v7, %v5726_v28  ;;  %v2530_v1 = vmul.f32 %v6418_v33, %v5733_v32  ;;  %v2137_v7 = vmul.f32 %v6414_v59, %v5629_v0 }
 0x933   :  { %v2130_v17 = vpop.permute.xlu2 %2129 }
 0x934   :  { %v2138_v34 = vmul.f32 %v2130_v17, %v7131_v21  ;;  %v2500_v21 = vmul.f32 %v6390_v20, %v5733_v32 }
 0x939   :  { %v2494_v41 = vpop.permute.xlu1 %2493  ;;  %2310 = vrot.lane.b32.xlu0 %v2303_v56, %s5300_s4  ;;  %2218 = vrot.lane.b32.xlu2 %v2212_v26, %s5303_s30 }
 0x93a   :  { %v2501_v42 = vmul.f32 %v2494_v41, %v5726_v28 }
 0x93c   :  { %v6454_v61 = vpop.permute.xlu2 %2355 }
 0x941   :  { %2388 = vrot.lane.b32.xlu0 %v2381_v47, %s5301_s23  ;;  %2248 = vrot.lane.b32.xlu2 %v2242_v3, %s5304_s26 }
 0x942   :  { %v2524_v58 = vpop.permute.xlu1 %2523 }
 0x943   :  { %v2531_v52 = vmul.f32 %v2524_v58, %v5726_v28 }
 0x945   :  { %v2150_v4 = vpop.permute.xlu2 %2149 }
 0x946   :  { %v2154_v22 = vmul.f32 %v2150_v4, %v7132_v29 }
 0x948   :  { %2162 = vrot.lane.b32.xlu1 %v2154_v22, %s5301_s23 }
 0x949   :  { %2418 = vrot.lane.b32.xlu0 %v2411_v18, %s5302_s25  ;;  %2278 = vrot.lane.b32.xlu2 %v2272_v15, %s5305_s8 }
 0x94b   :  { %v2180_v36 = vpop.permute.xlu1 %2179 }
 0x94c   :  { %v2184_v63 = vmul.f32 %v2180_v36, %v7132_v29  ;;  %v6482_v11 = vpop.permute.xlu0 %2308 }
 0x94e   :  { %v2210_v46 = vpop.permute.xlu2 %2209 }
 0x94f   :  { %v2214_v43 = vmul.f32 %v2210_v46, %v7132_v29 }
 0x950   :  { %2192 = vrot.lane.b32.xlu1 %v2184_v63, %s5302_s25 }
 0x951   :  { %2448 = vrot.lane.b32.xlu0 %v2441_v44, %s5303_s30  ;;  %2386 = vrot.lane.b32.xlu2 %v2380_v2, %s5301_s23 }
 0x954   :  { %v2300_v57 = vpop.permute.xlu1 %2299 }
 0x955   :  { %v2339_v6 = vpop.permute.xlu0 %2338  ;;  %v2304_v48 = vmul.f32 %v2300_v57, %v7132_v29 }
 0x957   :  { %v2240_v16 = vpop.permute.xlu2 %2239 }
 0x958   :  { %2222 = vrot.lane.b32.xlu1 %v2214_v43, %s5303_s30  ;;  %v2244_v50 = vmul.f32 %v2240_v16, %v7132_v29 }
 0x959   :  { %2478 = vrot.lane.b32.xlu0 %v2471_v25, %s5304_s26  ;;  %2416 = vrot.lane.b32.xlu2 %v2410_v5, %s5302_s25  ;;  %v2362_v5 = vmul.f32 %v6424_v8, %v5733_v32 }
 0x95d   :  { %v2330_v62 = vpop.permute.xlu1 %2329 }
 0x95e   :  { %v2334_v60 = vmul.f32 %v2330_v62, %v7132_v29 }
 0x960   :  { %2252 = vrot.lane.b32.xlu1 %v2244_v50, %s5304_s26  ;;  %v2408_v55 = vpop.permute.xlu2 %2407 }
 0x961   :  { %2508 = vrot.lane.b32.xlu0 %v2501_v42, %s5305_s8  ;;  %2446 = vrot.lane.b32.xlu2 %v2440_v51, %s5303_s30  ;;  %v2412_v30 = vmul.f32 %v2408_v55, %v5763_v37 }
 0x966   :  { %v2468_v26 = vpop.permute.xlu1 %2467 }
 0x967   :  { %v2472_v3 = vmul.f32 %v2468_v26, %v5763_v37 }
 0x968   :  { %2282 = vrot.lane.b32.xlu1 %v2274_v10, %s5305_s8 }
 0x969   :  { %2538 = vrot.lane.b32.xlu0 %v2531_v52, %s5300_s4  ;;  %2476 = vrot.lane.b32.xlu2 %v2470_v40, %s5304_s26  ;;  %v2528_v38 = vpop.permute.xlu2 %2527  ;;  %v2560_v40 = vmul.f32 %v6400_v49, %v5733_v32  ;;  %v2363_v52 = vmul.f32 %v6454_v61, %v5726_v28 }
 0x96a   :  { %v2532_v4 = vmul.f32 %v2528_v38, %v5763_v37 }
 0x96d   :  { %v2161_v23 = vpop.permute.xlu0 %2160 }
 0x96e   :  { %v2168_v31 = vadd.f32 %v2161_v23, %v2138_v34 }
 0x96f   :  { %v2498_v33 = vpop.permute.xlu1 %2497 }
 0x970   :  { %2312 = vrot.lane.b32.xlu1 %v2304_v48, %s5300_s4  ;;  %v2502_v58 = vmul.f32 %v2498_v33, %v5763_v37 }
 0x971   :  { %2568 = vrot.lane.b32.xlu0 %v2561_v54, %s5269_s1  ;;  %2390 = vrot.lane.b32.xlu2 %v2382_v35, %s5301_s23 }
 0x972   :  { %v2558_v24 = vpop.permute.xlu2 %2557 }
 0x973   :  { %v2562_v44 = vmul.f32 %v2558_v24, %v5763_v37 }
 0x978   :  { %2342 = vrot.lane.b32.xlu1 %v2334_v60, %s5269_s1  ;;  %v2135_v2 = vpop.permute.xlu1 %2134 }
 0x979   :  { %2506 = vrot.lane.b32.xlu2 %v2500_v21, %s5305_s8  ;;  %v2139_v8 = vmul.f32 %v2135_v2, %v7132_v29 }
 0x97b   :  { %v6511_v12 = vpop.permute.xlu2 %2359 }
 0x980   :  { %2420 = vrot.lane.b32.xlu1 %v2412_v30, %s5302_s25  ;;  %v2364_v30 = vmul.f32 %v6511_v12, %v5763_v37 }
 0x981   :  { %2536 = vrot.lane.b32.xlu2 %v2530_v1, %s5300_s4 }
 0x983   :  { %v2159_v17 = vpop.permute.xlu2 %2158 }
 0x984   :  { %v2167_v20 = vadd.f32 %v2159_v17, %v2137_v7 }
 0x988   :  { %2450 = vrot.lane.b32.xlu1 %v2442_v9, %s5303_s30 }
 0x989   :  { %v2191_v56 = vpop.permute.xlu0 %2190 }
 0x98a   :  { %v2198_v63 = vadd.f32 %v2191_v56, %v2168_v31 }
 0x98b   :  { %v2189_v41 = vpop.permute.xlu2 %2188 }
 0x98c   :  { %v2197_v22 = vadd.f32 %v2189_v41, %v2167_v20 }
 0x990   :  { %2480 = vrot.lane.b32.xlu1 %v2472_v3, %s5304_s26 }
 0x993   :  { %v2221_v19 = vpop.permute.xlu0 %2220  ;;  %v2219_v47 = vpop.permute.xlu2 %2218 }
 0x994   :  { %v2227_v15 = vadd.f32 %v2219_v47, %v2197_v22  ;;  %v2228_v53 = vadd.f32 %v2221_v19, %v2198_v63 }
 0x998   :  { %2510 = vrot.lane.b32.xlu1 %v2502_v58, %s5305_s8 }
 0x99b   :  { %v2251_v0 = vpop.permute.xlu0 %2250  ;;  %v2249_v59 = vpop.permute.xlu2 %2248 }
 0x99c   :  { %v2257_v18 = vadd.f32 %v2249_v59, %v2227_v15  ;;  %v2258_v25 = vadd.f32 %v2251_v0, %v2228_v53  ;;  %v2341_v10 = vpop.permute.xlu1 %2340 }
 0x9a0   :  { %2540 = vrot.lane.b32.xlu1 %v2532_v4, %s5300_s4 }
 0x9a3   :  { %v2281_v14 = vpop.permute.xlu0 %2280  ;;  %v2279_v36 = vpop.permute.xlu2 %2278 }
 0x9a4   :  { %v2287_v46 = vadd.f32 %v2279_v36, %v2257_v18  ;;  %v2288_v50 = vadd.f32 %v2281_v14, %v2258_v25 }
 0x9a6   :  { %v2317_v43 = vadd.f32 %v6482_v11, %v2287_v46 }
 0x9a8   :  { %2570 = vrot.lane.b32.xlu1 %v2562_v44, %s5269_s1  ;;  %v2347_v16 = vadd.f32 %v2339_v6, %v2317_v43 }
 0x9aa   :  { %v2365_v51 = vadd.f32 %v2362_v5, %v2347_v16 }
 0x9ab   :  { %v2311_v42 = vpop.permute.xlu0 %2310  ;;  %v2387_v24 = vpop.permute.xlu2 %2386 }
 0x9ac   :  { %v2318_v55 = vadd.f32 %v2311_v42, %v2288_v50  ;;  %v2395_v36 = vadd.f32 %v2387_v24, %v2365_v51  ;;  %v4866_v51 = vld [vmem:[#allocation16 + $0x18] sm:$0xff] }
 0x9ae   :  { %v2348_v57 = vadd.f32 %v2341_v10, %v2318_v55 }
 0x9b0   :  { %2566 = vrot.lane.b32.xlu1 %v2560_v40, %s5269_s1  ;;  %v2366_v11 = vadd.f32 %v2363_v52, %v2348_v57  ;;  %s7144_s1 = sld [smem:[#allocation58_spill]] }
 0x9b3   :  { %v2389_v35 = vpop.permute.xlu0 %2388  ;;  %v2417_v1 = vpop.permute.xlu2 %2416 }
 0x9b4   :  { %v2396_v59 = vadd.f32 %v2389_v35, %v2366_v11  ;;  %v2425_v2 = vadd.f32 %v2417_v1, %v2395_v36  ;;  %v6562_v35 = vld [vmem:[#allocation19 + $0x18] sm:$0xff] }
 0x9b6   :  { %s4354_s4 = sshll.u32 %s7144_s1, 4  ;;  %s4355_s4 = int_to_ptr.hbm [resolvable:$true] %s4354_s4 }
 0x9ba   :  { %v2163_v38 = vpop.permute.xlu1 %2162 }
 0x9bb   :  { %v2169_v34 = vadd.f32 %v2163_v38, %v2139_v8  ;;  %v2419_v28 = vpop.permute.xlu0 %2418  ;;  %v2447_v9 = vpop.permute.xlu2 %2446  ;;  %v4867_v8 = vld [vmem:[#allocation16 + $0x10] sm:$0xff]  ;;  %v6549_v38 = vld [vmem:[#allocation20 + $0x8] sm:$0xff] }
 0x9bc   :  { %v2426_v15 = vadd.f32 %v2419_v28, %v2396_v59  ;;  %v2455_v25 = vadd.f32 %v2447_v9, %v2425_v2  ;;  %2935 = vmatpush.msrb.mxu3 %v6549_v38  ;;  %v6571_v28 = vld [vmem:[#allocation22 + $0x8] sm:$0xff]  ;;  %v6628_v59 = vld [vmem:[#allocation19 + $0x38] sm:$0xff] }
 0x9bd   :  { %v6592_v9 = vld [vmem:[#allocation22 + $0x28] sm:$0xff] }
 0x9c2   :  { %v2193_v6 = vpop.permute.xlu1 %2192 }
 0x9c3   :  { %v2199_v54 = vadd.f32 %v2193_v6, %v2169_v34  ;;  %v2449_v17 = vpop.permute.xlu0 %2448  ;;  %v2477_v41 = vpop.permute.xlu2 %2476  ;;  %v6552_v34 = vld [vmem:[#allocation20] sm:$0xff] }
 0x9c4   :  { %v2456_v18 = vadd.f32 %v2449_v17, %v2426_v15  ;;  %v2485_v42 = vadd.f32 %v2477_v41, %v2455_v25  ;;  %2936 = vmatpush.msrb.mxu3 %v6552_v34  ;;  %v6558_v6 = vld [vmem:[#allocation19] sm:$0xff]  ;;  %v4872_v25 = vld [vmem:[#allocation17 + $0x1] ss:$0 sm:$0xff] }
 0x9c5   :  { %v6599_v41 = vld [vmem:[#allocation22 + $0x20] sm:$0xff] }
 0x9ca   :  { %v2223_v23 = vpop.permute.xlu1 %2222 }
 0x9cb   :  { %v2229_v32 = vadd.f32 %v2223_v23, %v2199_v54  ;;  %v2479_v56 = vpop.permute.xlu0 %2478  ;;  %v2391_v19 = vpop.permute.xlu2 %2390  ;;  %v5306_v23 = vmov 0.0   ;;  %v4868_v54 = vld [vmem:[#allocation14] ss:$0 sm:$0xff] }
 0x9cc   :  { %v2486_v63 = vadd.f32 %v2479_v56, %v2456_v18  ;;  %v6596_v56 = vld [vmem:[#allocation19 + $0x28] sm:$0xff] }
 0x9d2   :  { %v2253_v48 = vpop.permute.xlu1 %2252 }
 0x9d3   :  { %v2259_v49 = vadd.f32 %v2253_v48, %v2229_v32  ;;  %v2509_v33 = vpop.permute.xlu0 %2508  ;;  %v2507_v12 = vpop.permute.xlu2 %2506  ;;  %v6567_v32 = vld [vmem:[#allocation22 + $0x18] sm:$0xff] }
 0x9d4   :  { %v2516_v44 = vadd.f32 %v2509_v33, %v2486_v63  ;;  %v2515_v40 = vadd.f32 %v2507_v12, %v2485_v42  ;;  %3059 = vmatpush.msra.mxu1 %v6567_v32  ;;  %v6605_v33 = vld [vmem:[#allocation19 + $0x20] sm:$0xff]  ;;  %v4870_v63 = vld [vmem:[%s6966_s16 + $0x1] ss:$0 sm:$0xff] }
 0x9da   :  { %v2283_v31 = vpop.permute.xlu1 %2282 }
 0x9db   :  { %v2289_v60 = vadd.f32 %v2283_v31, %v2259_v49  ;;  %v2539_v0 = vpop.permute.xlu0 %2538  ;;  %v2537_v10 = vpop.permute.xlu2 %2536 }
 0x9dc   :  { %v2546_v16 = vadd.f32 %v2539_v0, %v2516_v44  ;;  %v2545_v52 = vadd.f32 %v2537_v10, %v2515_v40  ;;  %v6624_v0 = vld [vmem:[#allocation22 + $0x30] sm:$0xff] }
 0x9e2   :  { %v2313_v62 = vpop.permute.xlu1 %2312 }
 0x9e3   :  { %v2319_v61 = vadd.f32 %v2313_v62, %v2289_v60  ;;  %v2569_v43 = vpop.permute.xlu0 %2568  ;;  %v6565_v62 = vld [vmem:[#allocation19 + $0x10] sm:$0xff]  ;;  %v6569_v60 = vld [vmem:[#allocation20 + $0x18] sm:$0xff] }
 0x9e4   :  { %v2576_v55 = vadd.f32 %v2569_v43, %v2546_v16  ;;  %v4871_v43 = vld [vmem:[#allocation17] ss:$0 sm:$0xff] }
 0x9ea   :  { %v2343_v21 = vpop.permute.xlu1 %2342 }
 0x9eb   :  { %v2349_v29 = vadd.f32 %v2343_v21, %v2319_v61  ;;  %v6576_v61 = vld [vmem:[#allocation22 + $0x10] sm:$0xff] }
 0x9ec   :  { %v6580_v21 = vld [vmem:[#allocation20 + $0x10] sm:$0xff]  ;;  %3060 = vmatpush.msra.mxu1 %v6576_v61 }
 0x9ed   :  { %v2367_v7 = vadd.f32 %v2364_v30, %v2349_v29  ;;  %v6582_v30 = vld [vmem:[#allocation22] sm:$0xff]  ;;  %3061 = vmatmul.f32.vlgmr.msra.gmra.mxu1 %v5306_v23 }
 0x9ef   :  { %v2397_v58 = vadd.f32 %v2391_v19, %v2367_v7  ;;  %v6607_v19 = vld [vmem:[#allocation20 + $0x38] sm:$0xff] }
 0x9f0   :  { %3169 = vmatpush.msrb.mxu1 %v6607_v19 }
 0x9f2   :  { %v2421_v20 = vpop.permute.xlu1 %2420 }
 0x9f3   :  { %v2427_v4 = vadd.f32 %v2421_v20, %v2397_v58  ;;  %v6620_v58 = vld [vmem:[#allocation22 + $0x38] sm:$0xff] }
 0x9fa   :  { %v2451_v26 = vpop.permute.xlu1 %2450 }
 0x9fb   :  { %v2457_v37 = vadd.f32 %v2451_v26, %v2427_v4  ;;  %v6594_v26 = vld [vmem:[#allocation20 + $0x28] sm:$0xff]  ;;  %v6632_v4 = vld [vmem:[#allocation19 + $0x30] sm:$0xff] }
 0xa02   :  { %v2481_v3 = vpop.permute.xlu1 %2480 }
 0xa03   :  { %v2487_v14 = vadd.f32 %v2481_v3, %v2457_v37  ;;  %v6603_v3 = vld [vmem:[#allocation20 + $0x20] sm:$0xff] }
 0xa0a   :  { %v2511_v47 = vpop.permute.xlu1 %2510 }
 0xa0b   :  { %v2517_v46 = vadd.f32 %v2511_v47, %v2487_v14  ;;  %v6611_v47 = vld [vmem:[#allocation20 + $0x30] sm:$0xff] }
 0xa0c   :  { %3170 = vmatpush.msrb.mxu1 %v6611_v47  ;;  %v4869_v14 = vld [vmem:[%s6966_s16] ss:$0 sm:$0xff] }
 0xa0d   :  { %3171 = vmatmul.f32.vlgmr.msrb.gmra.mxu1 %v5306_v23 }
 0xa12   :  { %v2541_v22 = vpop.permute.xlu1 %2540 }
 0xa13   :  { %v2547_v53 = vadd.f32 %v2541_v22, %v2517_v46 }
 0xa1a   :  { %v2571_v5 = vpop.permute.xlu1 %2570 }
 0xa1b   :  { %v2577_v50 = vadd.f32 %v2571_v5, %v2547_v53 }
 0xa1d   :  { %2619 = vmatpush.msra.mxu0 %v2577_v50 }
 0xa1f   :  { %2620 = vmatpush.msra.mxu0 %v2576_v55 }
 0xa22   :  { %v2567_v57 = vpop.permute.xlu1 %2566 }
 0xa23   :  { %v2575_v11 = vadd.f32 %v2567_v57, %v2545_v52 }
 0xa25   :  { %2621 = vmatpush.msra.mxu0 %v2575_v11 }
 0xa26   :  { %4444 = vmatmul.msk.f32.vlgmr.msra.gmra.mxu0 %vm1014_vm8, %v6241_v39  ;;  %v6555_v39 = vld [vmem:[#allocation19 + $0x8] sm:$0xff] }
 0xa27   :  { %2764 = vmatpush.msrb.mxu0 %v4866_v51 }
 0xa29   :  { %2765 = vmatpush.msrb.mxu0 %v4867_v8 }
 0xa2b   :  { %2955 = vmatpush.msra.mxu0 %v6555_v39 }
 0xa2d   :  { %2956 = vmatpush.msra.mxu0 %v6558_v6 }
 0xa2e   :  { %4445 = vmatmul.msk.f32.gmra.mxu0 %vm1014_vm8, %v6250_v27  ;;  %v2600_v27 = vpop.f32.mrf.mxu1 }
 0xa36   :  { %4454 = vmatmul.msk.f32.vlgmr.msrb.gmra.mxu0 %vm985_vm4, %v6284_v13  ;;  %v2603_v29 = vpop.f32.mrf.mxu1 }
 0xa37   :  { %3039 = vmatpush.msrb.mxu0 %v6562_v35 }
 0xa39   :  { %3040 = vmatpush.msrb.mxu0 %v6565_v62 }
 0xa3e   :  { %4455 = vmatmul.msk.f32.gmra.mxu0 %vm985_vm4, %v6291_v45  ;;  %v2679_v22 = vpop.f32.mrf.mxu1 }
 0xa46   :  { %2957 = vmatmul.f32.vlgmr.msra.gmra.mxu0 %v5306_v23  ;;  %v2682_v37 = vpop.f32.mrf.mxu1 }
 0xa47   :  { %3143 = vmatpush.msra.mxu0 %v6592_v9 }
 0xa49   :  { %3144 = vmatpush.msra.mxu0 %v6599_v41 }
 0xa4e   :  { %3041 = vmatmul.f32.vlgmr.msrb.gmra.mxu0 %v5306_v23  ;;  %v2855_v50 = vpop.f32.mrf.mxu1 }
 0xa56   :  { %3145 = vmatmul.f32.vlgmr.msra.gmra.mxu0 %v5306_v23 }
 0xaa3   :  { %v2623_v48 = vpop.f32.mrf.mxu0 }
 0xaa4   :  { %v2624_v31 = vadd.f32 %v2623_v48, %v2600_v27 }
 0xaa6   :  { %v2629_v24 = vadd.f32 %v4868_v54, %v2624_v31 }
 0xaa8   :  { %v2631_v49 = vmax.f32 %v2629_v24, 0.0 }
 0xaaa   :  { %4446 = vmatmul.msk.f32.vlgmr.msra.gmra.mxu2 %vm985_vm4, %v2631_v49  ;;  %4452 = vmatmul.msk.f32.vlgmr.msra.gmra.mxu3 %vm985_vm4, %v2631_v49 }
 0xaab   :  { %v2626_v1 = vpop.f32.mrf.mxu0  ;;  %3019 = vmatpush.msra.mxu3 %v6569_v60  ;;  %2975 = vmatpush.msra.mxu2 %v6571_v28 }
 0xaac   :  { %v2627_v7 = vadd.f32 %v2626_v1, %v2603_v29 }
 0xaad   :  { %3020 = vmatpush.msra.mxu3 %v6580_v21  ;;  %2976 = vmatpush.msra.mxu2 %v6582_v30 }
 0xaae   :  { %v2630_v17 = vadd.f32 %v4868_v54, %v2627_v7  ;;  %v6653_v7 = vpop.f32.mrf.mxu1 }
 0xab0   :  { %v2632_v20 = vmax.f32 %v2630_v17, 0.0 }
 0xab2   :  { %4447 = vmatmul.msk.f32.gmra.mxu2 %vm985_vm4, %v2632_v20  ;;  %4453 = vmatmul.msk.f32.gmra.mxu3 %vm985_vm4, %v2632_v20 }
 0xab3   :  { %v2767_v15 = vpop.f32.mrf.mxu0 }
 0xaba   :  { %4458 = vmatmul.msk.f32.vlgmr.msrb.gmra.mxu2 %vm985_vm4, %v2631_v49  ;;  %2937 = vmatmul.f32.vlgmr.msrb.gmra.mxu3 %v5306_v23 }
 0xabb   :  { %3103 = vmatpush.msrb.mxu2 %v6594_v26  ;;  %3123 = vmatpush.msrb.mxu3 %v6596_v56  ;;  %v2770_v53 = vpop.f32.mrf.mxu0 }
 0xabd   :  { %3104 = vmatpush.msrb.mxu2 %v6603_v3  ;;  %3124 = vmatpush.msrb.mxu3 %v6605_v33 }
 0xac2   :  { %4459 = vmatmul.msk.f32.gmra.mxu2 %vm985_vm4, %v2632_v20  ;;  %3021 = vmatmul.f32.vlgmr.msra.gmra.mxu3 %v5306_v23 }
 0xac3   :  { %3209 = vmatpush.msra.mxu3 %v6620_v58  ;;  %v2958_v8 = vpop.f32.mrf.mxu0 }
 0xac5   :  { %3210 = vmatpush.msra.mxu3 %v6624_v0 }
 0xaca   :  { %2977 = vmatmul.f32.vlgmr.msra.gmra.mxu2 %v5306_v23  ;;  %3125 = vmatmul.f32.vlgmr.msrb.gmra.mxu3 %v5306_v23 }
 0xacb   :  { %3189 = vmatpush.msra.mxu2 %v6628_v59  ;;  %3431 = vmatpush.msrb.mxu3 %v6555_v39  ;;  %v3042_v20 = vpop.f32.mrf.mxu0 }
 0xacd   :  { %3190 = vmatpush.msra.mxu2 %v6632_v4  ;;  %3432 = vmatpush.msrb.mxu3 %v6558_v6 }
 0xad2   :  { %3105 = vmatmul.f32.vlgmr.msrb.gmra.mxu2 %v5306_v23  ;;  %3211 = vmatmul.f32.vlgmr.msra.gmra.mxu3 %v5306_v23 }
 0xad3   :  { %3512 = vmatpush.msra.mxu3 %v6562_v35  ;;  %3409 = vmatpush.msrb.mxu2 %v6549_v38 }
 0xad5   :  { %3513 = vmatpush.msra.mxu3 %v6565_v62  ;;  %3410 = vmatpush.msrb.mxu2 %v6552_v34 }
 0xada   :  { %3191 = vmatmul.f32.vlgmr.msra.gmra.mxu2 %v5306_v23 }
 0xadb   :  { %3492 = vmatpush.msra.mxu2 %v6569_v60 }
 0xadd   :  { %3493 = vmatpush.msra.mxu2 %v6580_v21 }
 0xb2d   :  { %v2656_v12 = vpop.f32.mrf.mxu2  ;;  %v2744_v18 = vpop.f32.mrf.mxu3 }
 0xb2e   :  { %v2657_v36 = vadd.f32 %v4869_v14, %v2656_v12  ;;  %v2745_v46 = vadd.f32 %v4870_v63, %v2744_v18 }
 0xb30   :  { %v2685_v2 = vadd.f32 %v2679_v22, %v2657_v36  ;;  %v2773_v44 = vadd.f32 %v2767_v15, %v2745_v46  ;;  %v3062_v46 = vpop.f32.mrf.mxu1 }
 0xb32   :  { %v2687_v5 = vadd.f32 %v4871_v43, %v2685_v2  ;;  %v2775_v16 = vadd.f32 %v4872_v25, %v2773_v44 }
 0xb34   :  { %v4450_v42 = vmul.f32 -1.442695, %v2687_v5  ;;  %v4456_v55 = vmul.f32 -1.442695, %v2775_v16  ;;  %v6672_v5 = vld [vmem:[%s6971_s21 + $0x1] ss:$0 sm:$0xff] }
 0xb35   :  { %v2659_v10 = vpop.f32.mrf.mxu2  ;;  %v2747_v40 = vpop.f32.mrf.mxu3 }
 0xb36   :  { %4757 = vpow2.f32 %v4450_v42  ;;  %v2660_v52 = vadd.f32 %v4869_v14, %v2659_v10  ;;  %v2748_v57 = vadd.f32 %v4870_v63, %v2747_v40 }
 0xb37   :  { %4759 = vpow2.f32 %v4456_v55 }
 0xb38   :  { %v2686_v11 = vadd.f32 %v2682_v37, %v2660_v52  ;;  %v2774_v51 = vadd.f32 %v2770_v53, %v2748_v57  ;;  %v4873_v52 = vld [vmem:[#allocation17 + $0x2] ss:$0 sm:$0xff] }
 0xb39   :  { %v2856_v57 = vadd.f32 %v4873_v52, %v2855_v50 }
 0xb3a   :  { %v2688_v27 = vadd.f32 %v4871_v43, %v2686_v11  ;;  %v2776_v23 = vadd.f32 %v4872_v25, %v2774_v51 }
 0xb3c   :  { %v4758_v48 = vpop.eup %4757  ;;  %v4451_v31 = vmul.f32 -1.442695, %v2688_v27  ;;  %v4457_v49 = vmul.f32 -1.442695, %v2776_v23 }
 0xb3d   :  { %v4760_v54 = vpop.eup %4759  ;;  %v2695_v24 = vadd.f32 1.0, %v4758_v48  ;;  %v2832_v29 = vpop.f32.mrf.mxu2 }
 0xb3e   :  { %v2938_v1 = vpop.f32.mrf.mxu3  ;;  %v6655_v17 = vadd.f32 1.0, %v4760_v54  ;;  %4761 = vpow2.f32 %v4451_v31  ;;  %v4874_v31 = vld [vmem:[%s6966_s16 + $0x2] ss:$0 sm:$0xff] }
 0xb3f   :  { %4763 = vrcp.f32 %v2695_v24  ;;  %v2708_v16 = vand.u32 2147483648, %v2695_v24  ;;  %v2706_v10 = vand.u32 2147483647, %v2695_v24  ;;  %vm2702_vm1 = vweird.f32 %v2695_v24 }
 0xb40   :  { %4765 = vrcp.f32 %v6655_v17  ;;  %v2796_v48 = vand.u32 2147483648, %v6655_v17  ;;  %v2833_v54 = vadd.f32 %v4874_v31, %v2832_v29  ;;  %vm2790_vm9 = vweird.f32 %v6655_v17 }
 0xb41   :  { %4767 = vpow2.f32 %v4457_v49  ;;  %v2709_v23 = vor.u32 1.1754944e-38, %v2708_v16  ;;  %v2959_v49 = vadd.f32 %v2958_v8, %v2938_v1  ;;  %vm2707_vm3 = vcmp.eq.f32.partialorder %v2706_v10, 8.507059e+37 }
 0xb44   :  { %v4762_v22 = vpop.eup %4761 }
 0xb45   :  { %v4764_v15 = vpop.eup %4763  ;;  %v6658_v37 = vadd.f32 1.0, %v4762_v22  ;;  %v6660_v12 = vpop.f32.mrf.mxu2 }
 0xb46   :  { %v3022_v18 = vpop.f32.mrf.mxu3  ;;  %v6662_v14 = vpop.eup %4765  ;;  %v2698_v36 = vmul.f32 %v4764_v15, %v2695_v24  ;;  %vm2703_vm8 = vweird.f32 %v4764_v15  ;;  %v6685_v24 = vld [vmem:[%s6971_s21] ss:$0 sm:$0xff] }
 0xb47   :  { %v3043_v63 = vadd.f32 %v3042_v20, %v3022_v18  ;;  %v4768_v2 = vpop.eup %4767  ;;  %v2786_v44 = vmul.f32 %v6662_v14, %v6655_v17  ;;  %4769 = vrcp.f32 %v6658_v37  ;;  %vm2704_vm2 = vmor %vm2702_vm1, %vm2703_vm8  ;;  %vm2791_vm7 = vweird.f32 %v6662_v14 }
 0xb48   :  { %v6667_v53 = vadd.f32 1.0, %v4768_v2  ;;  %v2699_v43 = vsub.f32 1.0, %v2698_v36  ;;  %vm6694_vm10 = vmor %vm2790_vm9, %vm2791_vm7  ;;  %vm2717_vm12 = vweird.f32 %v6658_v37 }
 0xb49   :  { %v2787_v25 = vsub.f32 1.0, %v2786_v44  ;;  %v3065_v42 = vadd.f32 %v3062_v46, %v3043_v63  ;;  %v2721_v44 = vand.u32 2147483647, %v6658_v37 }
 0xb4a   :  { %4771 = vrcp.f32 %v6667_v53  ;;  %v2700_v55 = vmul.f32 %v4764_v15, %v2699_v43  ;;  %v2723_v43 = vand.u32 2147483648, %v6658_v37  ;;  %vm2805_vm8 = vweird.f32 %v6667_v53 }
 0xb4b   :  { %v2788_v40 = vmul.f32 %v6662_v14, %v2787_v25  ;;  %v3069_v51 = vadd.f32 %v6672_v5, %v3065_v42  ;;  %vm2722_vm15 = vcmp.eq.f32.partialorder %v2721_v44, 8.507059e+37  ;;  %v3172_v44 = vpop.f32.mrf.mxu1 }
 0xb4c   :  { %v2701_v11 = vadd.f32 %v4764_v15, %v2700_v55 }
 0xb4d   :  { %v4770_v27 = vpop.eup %4769  ;;  %v2978_v20 = vpop.f32.mrf.mxu2  ;;  %v4466_v18 = vmul.f32 -1.442695, %v3069_v51  ;;  %v2789_v63 = vadd.f32 %v6662_v14, %v2788_v40  ;;  %v2859_v51 = vadd.f32 %v4873_v52, %v6653_v7  ;;  %v2836_v7 = vadd.f32 %v4874_v31, %v6660_v12 }
 0xb4e   :  { %v2705_v22 = vsel %vm2704_vm2, %v4764_v15, %v2701_v11  ;;  %v2713_v50 = vmul.f32 %v4770_v27, %v6658_v37  ;;  %v2981_v46 = vadd.f32 %v2978_v20, %v2959_v49  ;;  %v2794_v15 = vand.u32 2147483647, %v6655_v17  ;;  %v3126_v20 = vpop.f32.mrf.mxu3 }
 0xb4f   :  { %v2710_v36 = vsel %vm2707_vm3, %v2709_v23, %v2705_v22  ;;  %4773 = vpow2.f32 %v4466_v18  ;;  %vm2718_vm11 = vweird.f32 %v4770_v27  ;;  %v2793_v40 = vsel %vm6694_vm10, %v6662_v14, %v2789_v63 }
 0xb50   :  { %v4772_v2 = vpop.eup %4771  ;;  %v2861_v8 = vmul.f32 %v2856_v57, %v2710_v36  ;;  %v2714_v29 = vsub.f32 1.0, %v2713_v50  ;;  %v2985_v55 = vadd.f32 %v6685_v24, %v2981_v46  ;;  %v2797_v57 = vor.u32 1.1754944e-38, %v2796_v48  ;;  %vm2719_vm14 = vmor %vm2717_vm12, %vm2718_vm11 }
 0xb51   :  { %v2801_v1 = vmul.f32 %v4772_v2, %v6667_v53  ;;  %vm2795_vm13 = vcmp.eq.f32.partialorder %v2794_v15, 8.507059e+37  ;;  %v2724_v23 = vor.u32 1.1754944e-38, %v2723_v43  ;;  %vm2806_vm0 = vweird.f32 %v4772_v2 }
 0xb52   :  { %v2863_v16 = vadd.f32 %v2861_v8, %v2833_v54  ;;  %v2715_v42 = vmul.f32 %v4770_v27, %v2714_v29  ;;  %v4465_v11 = vmul.f32 -1.442695, %v2985_v55  ;;  %v2798_v50 = vsel %vm2795_vm13, %v2797_v57, %v2793_v40  ;;  %vm2807_vm1 = vmor %vm2805_vm8, %vm2806_vm0  ;;  %v6717_v40 = vld [vmem:[%s6971_s21 + $0x3] ss:$0 sm:$0xff] }
 0xb53   :  { %v2802_v10 = vsub.f32 1.0, %v2801_v1  ;;  %v2811_v37 = vand.u32 2147483648, %v6667_v53  ;;  %v2867_v63 = vsub.f32 1.0, %v2798_v50  ;;  %v2809_v46 = vand.u32 2147483647, %v6667_v53 }
 0xb54   :  { %4775 = vtanh.f32 %v2863_v16  ;;  %v2716_v17 = vadd.f32 %v4770_v27, %v2715_v42  ;;  %v2871_v1 = vmul.f32 %v2798_v50, %v6284_v13 }
 0xb55   :  { %v2803_v54 = vmul.f32 %v4772_v2, %v2802_v10  ;;  %v3106_v49 = vpop.f32.mrf.mxu2  ;;  %v4774_v22 = vpop.eup %4773  ;;  %4777 = vpow2.f32 %v4465_v11  ;;  %v2812_v25 = vor.u32 1.1754944e-38, %v2811_v37  ;;  %vm2810_vm2 = vcmp.eq.f32.partialorder %v2809_v46, 8.507059e+37 }
 0xb56   :  { %v2720_v18 = vsel %vm2719_vm14, %v4770_v27, %v2716_v17  ;;  %v6704_v36 = vadd.f32 1.0, %v4774_v22  ;;  %v3212_v42 = vpop.f32.mrf.mxu3  ;;  %v3127_v55 = vadd.f32 %v3126_v20, %v3106_v49  ;;  %v6723_v49 = vld [vmem:[%s6971_s21 + $0x2] ss:$0 sm:$0xff] }
 0xb57   :  { %v2725_v14 = vsel %vm2722_vm15, %v2724_v23, %v2720_v18  ;;  %v2804_v48 = vadd.f32 %v4772_v2, %v2803_v54 }
 0xb58   :  { %v2862_v52 = vmul.f32 %v2859_v51, %v2725_v14  ;;  %4779 = vrcp.f32 %v6704_v36  ;;  %vm3079_vm3 = vweird.f32 %v6704_v36  ;;  %v3085_v46 = vand.u32 2147483648, %v6704_v36 }
 0xb59   :  { %v2808_v15 = vsel %vm2807_vm1, %v4772_v2, %v2804_v48  ;;  %v3146_v2 = vpop.f32.mrf.mxu0 }
 0xb5a   :  { %v4776_v27 = vpop.eup %4775  ;;  %v2864_v8 = vadd.f32 %v2862_v52, %v2836_v7  ;;  %v2813_v53 = vsel %vm2810_vm2, %v2812_v25, %v2808_v15  ;;  %v3149_v54 = vadd.f32 %v3146_v2, %v3127_v55  ;;  %vm3251_vm2 = vcmask 1041408  }
 0xb5b   :  { %v2869_v29 = vmul.f32 %v4776_v27, %v2867_v63  ;;  %v4778_v43 = vpop.eup %4777  ;;  %v2868_v11 = vsub.f32 1.0, %v2813_v53  ;;  %v2872_v50 = vmul.f32 %v2813_v53, %v6291_v45 }
 0xb5c   :  { %4781 = vtanh.f32 %v2864_v8  ;;  %v2989_v31 = vadd.f32 1.0, %v4778_v43  ;;  %v3153_v52 = vadd.f32 %v6723_v49, %v3149_v54 }
 0xb5d   :  { %v6712_v12 = vadd.f32 %v2871_v1, %v2869_v29  ;;  %v3192_v16 = vpop.f32.mrf.mxu2  ;;  %v3083_v1 = vand.u32 2147483647, %v6704_v36 }
 0xb5e   :  { %v3193_v10 = vadd.f32 %v3192_v16, %v3172_v44  ;;  %v4780_v13 = vpop.eup %4779  ;;  %4783 = vrcp.f32 %v2989_v31  ;;  %v3001_v27 = vand.u32 2147483648, %v2989_v31  ;;  %v2999_v45 = vand.u32 2147483647, %v2989_v31 }
 0xb5f   :  { %v3075_v57 = vmul.f32 %v4780_v13, %v6704_v36  ;;  %vm3080_vm7 = vweird.f32 %v4780_v13  ;;  %vm2995_vm10 = vweird.f32 %v2989_v31  ;;  %vm3084_vm14 = vcmp.eq.f32.partialorder %v3083_v1, 8.507059e+37 }
 0xb60   :  { %v3215_v17 = vadd.f32 %v3212_v42, %v3193_v10  ;;  %vm3081_vm11 = vmor %vm3079_vm3, %vm3080_vm7  ;;  %v3002_v43 = vor.u32 1.1754944e-38, %v3001_v27  ;;  %v3086_v42 = vor.u32 1.1754944e-38, %v3085_v46  ;;  %vm3000_vm13 = vcmp.eq.f32.partialorder %v2999_v45, 8.507059e+37 }
 0xb61   :  { %v3076_v23 = vsub.f32 1.0, %v3075_v57  ;;  %vm3244_vm3 = vcmask 15360   ;;  %vm3283_vm7 = vcmask 125952  }
 0xb62   :  { %v4782_v51 = vpop.eup %4781  ;;  %v3219_v20 = vadd.f32 %v6717_v40, %v3215_v17 }
 0xb63   :  { %v2870_v22 = vmul.f32 %v4782_v51, %v2868_v11  ;;  %v3077_v37 = vmul.f32 %v4780_v13, %v3076_v23 }
 0xb64   :  { %v4467_v18 = vmul.f32 -1.442695, %v3219_v20  ;;  %v4784_v14 = vpop.eup %4783 }
 0xb65   :  { %v6727_v48 = vadd.f32 %v2872_v50, %v2870_v22  ;;  %v2991_v7 = vmul.f32 %v4784_v14, %v2989_v31  ;;  %v3078_v8 = vadd.f32 %v4780_v13, %v3077_v37  ;;  %vm2996_vm9 = vweird.f32 %v4784_v14 }
 0xb66   :  { %4785 = vpow2.f32 %v4467_v18  ;;  %vm2997_vm12 = vmor %vm2995_vm10, %vm2996_vm9 }
 0xb67   :  { %v2992_v63 = vsub.f32 1.0, %v2991_v7  ;;  %4787 = vtanh.f32 %v3153_v52  ;;  %v3082_v25 = vsel %vm3081_vm11, %v4780_v13, %v3078_v8  ;;  %v6741_v7 = vld [vmem:[%s7135_s12] sm:$0xff]  ;;  %v6757_v52 = vld [vmem:[%s7135_s12 + $0x8] sm:$0xf]  ;;  %vm7048_vm11 = vcmask 11264  }
 0xb68   :  { %v3087_v2 = vsel %vm3084_vm14, %v3086_v42, %v3082_v25  ;;  %vm3287_vm9 = vcmp.gt.f32.partialorder %v6741_v7, 0.5  ;;  %vm3288_vm10 = vcmp.gt.f32.partialorder %v6757_v52, 0.5 }
 0xb69   :  { %v2993_v29 = vmul.f32 %v4784_v14, %v2992_v63  ;;  %v3239_v17 = vmul.f32 0.0, %v3087_v2 }
 0xb6b   :  { %v2994_v44 = vadd.f32 %v4784_v14, %v2993_v29 }
 0xb6c   :  { %v4786_v15 = vpop.eup %4785 }
 0xb6d   :  { %v3223_v16 = vadd.f32 1.0, %v4786_v15  ;;  %v2998_v53 = vsel %vm2997_vm12, %v4784_v14, %v2994_v44  ;;  %v4788_v10 = vpop.eup %4787 }
 0xb6e   :  { %v3003_v55 = vsel %vm3000_vm13, %v3002_v43, %v2998_v53 }
 0xb6f   :  { %4789 = vrcp.f32 %v3223_v16  ;;  %v3240_v57 = vmul.f32 %v4788_v10, %v3003_v55  ;;  %v3235_v23 = vand.u32 2147483648, %v3223_v16  ;;  %v3233_v54 = vand.u32 2147483647, %v3223_v16 }
 0xb70   :  { %vm3229_vm0 = vweird.f32 %v3223_v16 }
 0xb71   :  { %v6733_v36 = vadd.f32 %v3240_v57, %v3239_v17  ;;  %v3236_v22 = vor.u32 1.1754944e-38, %v3235_v23  ;;  %vm3234_vm1 = vcmp.eq.f32.partialorder %v3233_v54, 8.507059e+37 }
 0xb73   :  { %4791 = vtanh.f32 %v6733_v36 }
 0xb75   :  { %v4790_v11 = vpop.eup %4789 }
 0xb76   :  { %v3225_v51 = vmul.f32 %v4790_v11, %v3223_v16  ;;  %vm3230_vm15 = vweird.f32 %v4790_v11 }
 0xb77   :  { %vm3231_vm8 = vmor %vm3229_vm0, %vm3230_vm15 }
 0xb78   :  { %v3226_v31 = vsub.f32 1.0, %v3225_v51 }
 0xb79   :  { %v4792_v18 = vpop.eup %4791 }
 0xb7a   :  { %v3227_v13 = vmul.f32 %v4790_v11, %v3226_v31 }
 0xb7c   :  { %v3228_v20 = vadd.f32 %v4790_v11, %v3227_v13 }
 0xb7e   :  { %v3232_v50 = vsel %vm3231_vm8, %v4790_v11, %v3228_v20 }
 0xb7f   :  { %v3237_v14 = vsel %vm3234_vm1, %v3236_v22, %v3232_v50 }
 0xb80   :  { %v6736_v37 = vmul.f32 %v4792_v18, %v3237_v14 }
 0xb82   :  { %4468 = vmatpush.msk.msrb.mxu0 %vm3251_vm2, %v6736_v37  ;;  %4474 = vmatmul.msk.f32.vlgmr.msrb.gmra.mxu3 %vm985_vm4, %v6736_v37 }
 0xb83   :  { %4469 = vmatmul.msk.f32.vlgmr.msrb.gmra.mxu0 %vm3244_vm3, %v6741_v7  ;;  %3613 = vmatpush.msrb.mxu3 %v6592_v9 }
 0xb84   :  { %3532 = vmatpush.msra.mxu0 %v6567_v32 }
 0xb85   :  { %3614 = vmatpush.msrb.mxu3 %v6599_v41 }
 0xb86   :  { %3533 = vmatpush.msra.mxu0 %v6576_v61 }
 0xb88   :  { %3636 = vmatpush.msrb.mxu0 %v6607_v19 }
 0xb8a   :  { %3637 = vmatpush.msrb.mxu0 %v6611_v47  ;;  %4478 = vmatmul.msk.f32.vlgmr.msra.gmra.mxu3 %vm985_vm4, %v6736_v37 }
 0xb8b   :  { %4470 = vmatmul.msk.f32.gmra.mxu0 %vm3244_vm3, %v6757_v52 }
 0xb92   :  { %4483 = vmatmul.msk.f32.vlgmr.msrb.gmra.mxu3 %vm985_vm4, %v6736_v37 }
 0xb93   :  { %4479 = vmatmul.msk.f32.vlgmr.msra.gmra.mxu0 %vm985_vm4, %v6736_v37 }
 0xc00   :  { %v3272_v32 = vpop.f32.mrf.mxu0 }
 0xc01   :  { %v3278_v63 = vmul.f32 %v3272_v32, %v6712_v12 }
 0xc03   :  { %v3280_v46 = vsel %vm985_vm4, %v3278_v63, 0.0 }
 0xc04   :  { %3281 = vadd.xlane.f32.xlu2 %v3280_v46 }
 0xc08   :  { %v3275_v27 = vpop.f32.mrf.mxu0 }
 0xc09   :  { %v3279_v8 = vmul.f32 %v3275_v27, %v6727_v48 }
 0xc0b   :  { %v3284_v29 = vsel %vm3283_vm7, %v3279_v8, 0.0 }
 0xc0c   :  { %3285 = vadd.xlane.f32.xlu0 %v3284_v29 }
 0xc77   :  { %v3282_v45 = vpop.xlane.xlu2 %3281 }
 0xc78   :  { %v3289_v1 = vsel %vm3287_vm9, %v3282_v45, -1e+30 }
 0xc79   :  { %v3291_v43 = vsel %vm3244_vm3, %v3289_v1, -inf }
 0xc7f   :  { %v3286_v15 = vpop.xlane.xlu0 %3285 }
 0xc80   :  { %v3290_v44 = vsel %vm3288_vm10, %v3286_v15, -1e+30 }
 0xc81   :  { %v3293_v25 = vsel %vm7048_vm11, %v3290_v44, -inf }
 0xc82   :  { %v3294_v16 = vmax.f32 %v3291_v43, %v3293_v25 }
 0xc84   :  { %v3295_v42 = vrot.slane %v3294_v16, 4 }
 0xc86   :  { %v3296_v53 = vmax.f32 %v3294_v16, %v3295_v42 }
 0xc88   :  { %v3297_v55 = vrot.slane %v3296_v53, 2 }
 0xc8a   :  { %v3298_v10 = vmax.f32 %v3296_v53, %v3297_v55 }
 0xc8c   :  { %v3299_v2 = vrot.slane %v3298_v10, 1 }
 0xc8e   :  { %v3300_v57 = vmax.f32 %v3298_v10, %v3299_v2 }
 0xc90   :  { %v3302_v17 = vmul.f32 %v3300_v57, %v6757_v52  ;;  %v3301_v11 = vmul.f32 %v3300_v57, %v6741_v7 }
 0xc92   :  { %v3306_v51 = vsel %vm7048_vm11, %v3302_v17, 0.0  ;;  %v3303_v31 = vsel %vm3244_vm3, %v3301_v11, 0.0 }
 0xc93   :  { %3307 = vadd.xlane.f32.xlu2 %v3306_v51  ;;  %3304 = vadd.xlane.f32.xlu1 %v3303_v31 }
 0xd06   :  { %v3308_v23 = vpop.xlane.xlu2 %3307  ;;  %v3305_v13 = vpop.xlane.xlu1 %3304 }
 0xd07   :  { %v3310_v54 = vsub.f32 %v3286_v15, %v3308_v23  ;;  %v3309_v20 = vsub.f32 %v3282_v45, %v3305_v13 }
 0xd09   :  { %v3313_v22 = vmul.f32 1.442695, %v3310_v54  ;;  %v3311_v50 = vmul.f32 1.442695, %v3309_v20 }
 0xd0b   :  { %4793 = vpow2.f32 %v3313_v22 }
 0xd0c   :  { %4795 = vpow2.f32 %v3311_v50 }
 0xd11   :  { %v4794_v18 = vpop.eup %4793 }
 0xd12   :  { %v4796_v14 = vpop.eup %4795  ;;  %v3316_v32 = vmul.f32 %v4794_v18, %v6757_v52 }
 0xd13   :  { %v3315_v63 = vmul.f32 %v4796_v14, %v6741_v7 }
 0xd14   :  { %v3318_v46 = vsel %vm7048_vm11, %v3316_v32, 0.0 }
 0xd15   :  { %v3317_v27 = vsel %vm3244_vm3, %v3315_v63, 0.0 }
 0xd16   :  { %v3319_v8 = vadd.f32 %v3318_v46, %v3317_v27 }
 0xd18   :  { %v3320_v29 = vrot.slane %v3319_v8, 4 }
 0xd1a   :  { %v3321_v1 = vadd.f32 %v3320_v29, %v3319_v8 }
 0xd1c   :  { %v3322_v44 = vrot.slane %v3321_v1, 2 }
 0xd1e   :  { %v3323_v15 = vadd.f32 %v3322_v44, %v3321_v1 }
 0xd20   :  { %v3324_v45 = vrot.slane %v3323_v15, 1 }
 0xd22   :  { %v3325_v43 = vadd.f32 %v3324_v45, %v3323_v15 }
 0xd24   :  { %v3327_v25 = vmul.f32 %v3325_v43, %v6757_v52  ;;  %v3326_v16 = vmul.f32 %v3325_v43, %v6741_v7 }
 0xd26   :  { %v3331_v42 = vsel %vm7048_vm11, %v3327_v25, 0.0  ;;  %v3328_v53 = vsel %vm3244_vm3, %v3326_v16, 0.0  ;;  %v6795_v16 = vld [vmem:[#allocation2] sm:$0x3] }
 0xd27   :  { %3332 = vadd.xlane.f32.xlu2 %v3331_v42  ;;  %3329 = vadd.xlane.f32.xlu0 %v3328_v53 }
 0xd9a   :  { %v3333_v55 = vpop.xlane.xlu2 %3332  ;;  %v3330_v10 = vpop.xlane.xlu0 %3329 }
 0xd9b   :  { %4797 = vrcp.f32 %v3333_v55  ;;  %v3360_v31 = vand.u32 2147483648, %v3333_v55  ;;  %v3358_v54 = vand.u32 2147483647, %v3333_v55  ;;  %v3345_v20 = vand.u32 2147483648, %v3330_v10 }
 0xd9c   :  { %4799 = vrcp.f32 %v3330_v10  ;;  %v3343_v50 = vand.u32 2147483647, %v3330_v10  ;;  %vm3354_vm14 = vweird.f32 %v3333_v55  ;;  %vm3339_vm0 = vweird.f32 %v3330_v10 }
 0xd9d   :  { %v3361_v63 = vor.u32 1.1754944e-38, %v3360_v31  ;;  %vm3359_vm8 = vcmp.eq.f32.partialorder %v3358_v54, 8.507059e+37  ;;  %v3346_v8 = vor.u32 1.1754944e-38, %v3345_v20 }
 0xd9e   :  { %vm3344_vm11 = vcmp.eq.f32.partialorder %v3343_v50, 8.507059e+37 }
 0xda1   :  { %v4798_v2 = vpop.eup %4797 }
 0xda2   :  { %v4800_v57 = vpop.eup %4799  ;;  %v3350_v17 = vmul.f32 %v4798_v2, %v3333_v55  ;;  %vm3355_vm12 = vweird.f32 %v4798_v2 }
 0xda3   :  { %v3335_v11 = vmul.f32 %v4800_v57, %v3330_v10  ;;  %vm3340_vm13 = vweird.f32 %v4800_v57  ;;  %vm3356_vm15 = vmor %vm3354_vm14, %vm3355_vm12 }
 0xda4   :  { %v3351_v51 = vsub.f32 1.0, %v3350_v17  ;;  %vm3341_vm1 = vmor %vm3339_vm0, %vm3340_vm13 }
 0xda5   :  { %v3336_v23 = vsub.f32 1.0, %v3335_v11 }
 0xda6   :  { %v3352_v13 = vmul.f32 %v4798_v2, %v3351_v51 }
 0xda7   :  { %v3337_v22 = vmul.f32 %v4800_v57, %v3336_v23 }
 0xda8   :  { %v3353_v32 = vadd.f32 %v4798_v2, %v3352_v13 }
 0xda9   :  { %v3338_v46 = vadd.f32 %v4800_v57, %v3337_v22 }
 0xdaa   :  { %v3357_v27 = vsel %vm3356_vm15, %v4798_v2, %v3353_v32 }
 0xdab   :  { %v3362_v29 = vsel %vm3359_vm8, %v3361_v63, %v3357_v27  ;;  %v3342_v1 = vsel %vm3341_vm1, %v4800_v57, %v3338_v46 }
 0xdac   :  { %v3363_v44 = vmul.f32 %v4794_v18, %v3362_v29  ;;  %v3347_v15 = vsel %vm3344_vm11, %v3346_v8, %v3342_v1 }
 0xdad   :  { %v3348_v45 = vmul.f32 %v4796_v14, %v3347_v15 }
 0xdae   :  { %v3365_v43 = vmul.f32 %v3363_v44, %v6727_v48 }
 0xdaf   :  { %v3364_v25 = vmul.f32 %v3348_v45, %v6712_v12 }
 0xdb0   :  { %4471 = vmatpush.msk.msra.mxu1 %vm499_vm5, %v3365_v43 }
 0xdb2   :  { %3387 = vmatpush.msra.mxu1 %v3364_v25 }
 0xdb3   :  { %4472 = vmatmul.msk.f32.vlgmr.msra.gmra.mxu1 %vm489_vm6, %v6795_v16 }
 0xdb4   :  { %3451 = vmatpush.msrb.mxu1 %v6571_v28 }
 0xdb6   :  { %3452 = vmatpush.msrb.mxu1 %v6582_v30 }
 0xdb8   :  { %3573 = vmatpush.msra.mxu1 %v6594_v26 }
 0xdba   :  { %3574 = vmatpush.msra.mxu1 %v6603_v3 }
 0xdbb   :  { %4475 = vmatmul.msk.f32.vlgmr.msrb.gmra.mxu1 %vm985_vm4, %v6736_v37 }
 0xdbc   :  { %3656 = vmatpush.msrb.mxu1 %v6628_v59 }
 0xdbe   :  { %3657 = vmatpush.msrb.mxu1 %v6632_v4 }
 0xe30   :  { %v3389_v18 = vpop.f32.mrf.mxu1 }
 0xe31   :  { %4473 = vmatmul.msk.f32.vlgmr.msrb.gmra.mxu2 %vm985_vm4, %v3389_v18  ;;  %4481 = vmatmul.msk.f32.vlgmr.msra.gmra.mxu1 %vm985_vm4, %v3389_v18 }
 0xe32   :  { %4484 = vmatmul.msk.f32.vlgmr.msrb.gmra.mxu0 %vm985_vm4, %v3389_v18  ;;  %3593 = vmatpush.msrb.mxu2 %v6596_v56 }
 0xe33   :  { %3858 = vmatpush.msra.mxu1 %v6549_v38  ;;  %v3434_v38 = vpop.f32.mrf.mxu3 }
 0xe34   :  { %3594 = vmatpush.msrb.mxu2 %v6605_v33 }
 0xe35   :  { %3859 = vmatpush.msra.mxu1 %v6552_v34 }
 0xe38   :  { %v3454_v28 = vpop.f32.mrf.mxu1 }
 0xe39   :  { %4477 = vmatmul.msk.f32.vlgmr.msra.gmra.mxu2 %vm985_vm4, %v3389_v18  ;;  %4485 = vmatmul.msk.f32.vlgmr.msrb.gmra.mxu1 %vm985_vm4, %v6736_v37 }
 0xe3a   :  { %3676 = vmatpush.msra.mxu2 %v6620_v58  ;;  %3941 = vmatpush.msrb.mxu1 %v6569_v60 }
 0xe3b   :  { %v3515_v56 = vpop.f32.mrf.mxu3 }
 0xe3c   :  { %3677 = vmatpush.msra.mxu2 %v6624_v0  ;;  %3942 = vmatpush.msrb.mxu1 %v6580_v21 }
 0xe41   :  { %4482 = vmatmul.msk.f32.vlgmr.msrb.gmra.mxu2 %vm985_vm4, %v6736_v37 }
 0xe42   :  { %3880 = vmatpush.msrb.mxu2 %v6555_v39 }
 0xe43   :  { %v3616_v31 = vpop.f32.mrf.mxu3 }
 0xe44   :  { %3881 = vmatpush.msrb.mxu2 %v6558_v6  ;;  %v3535_v6 = vpop.f32.mrf.mxu0 }
 0xe49   :  { %4486 = vmatmul.msk.f32.vlgmr.msra.gmra.mxu2 %vm985_vm4, %v6736_v37 }
 0xe4a   :  { %3961 = vmatpush.msra.mxu2 %v6562_v35 }
 0xe4c   :  { %3962 = vmatpush.msra.mxu2 %v6565_v62 }
 0xeae   :  { %v3576_v33 = vpop.f32.mrf.mxu1 }
 0xeaf   :  { %v3639_v14 = vpop.f32.mrf.mxu0 }
 0xeb4   :  { %v3412_v34 = vpop.f32.mrf.mxu2 }
 0xeb5   :  { %v3435_v60 = vadd.f32 %v3434_v38, %v3412_v34 }
 0xeb6   :  { %v3659_v37 = vpop.f32.mrf.mxu1 }
 0xeb7   :  { %v3457_v30 = vadd.f32 %v3454_v28, %v3435_v60  ;;  %v3660_v53 = vadd.f32 %v3659_v37, %v3639_v14  ;;  %v4875_v37 = vld [vmem:[#allocation22 + $0x18] sm:$0xff] }
 0xeb9   :  { %v3458_v21 = vadd.f32 %v6685_v24, %v3457_v30 }
 0xebb   :  { %v4476_v26 = vmul.f32 -1.442695, %v3458_v21 }
 0xebc   :  { %v3495_v3 = vpop.f32.mrf.mxu2 }
 0xebd   :  { %4801 = vpow2.f32 %v4476_v26  ;;  %v3516_v39 = vadd.f32 %v3515_v56, %v3495_v3 }
 0xebf   :  { %v3538_v58 = vadd.f32 %v3535_v6, %v3516_v39 }
 0xec1   :  { %v3539_v0 = vadd.f32 %v6672_v5, %v3538_v58 }
 0xec3   :  { %v4802_v35 = vpop.eup %4801  ;;  %v4480_v59 = vmul.f32 -1.442695, %v3539_v0 }
 0xec4   :  { %v3462_v62 = vadd.f32 1.0, %v4802_v35  ;;  %v3596_v4 = vpop.f32.mrf.mxu2 }
 0xec5   :  { %4803 = vpow2.f32 %v4480_v59  ;;  %v3597_v17 = vadd.f32 %v3596_v4, %v3576_v33 }
 0xec6   :  { %4805 = vrcp.f32 %v3462_v62  ;;  %v3474_v46 = vand.u32 2147483648, %v3462_v62  ;;  %vm3468_vm12 = vweird.f32 %v3462_v62  ;;  %v3472_v8 = vand.u32 2147483647, %v3462_v62 }
 0xec7   :  { %v3619_v23 = vadd.f32 %v3616_v31, %v3597_v17 }
 0xec8   :  { %v3475_v43 = vor.u32 1.1754944e-38, %v3474_v46  ;;  %vm3473_vm8 = vcmp.eq.f32.partialorder %v3472_v8, 8.507059e+37 }
 0xec9   :  { %v3620_v50 = vadd.f32 %v6723_v49, %v3619_v23 }
 0xecb   :  { %v4804_v42 = vpop.eup %4803 }
 0xecc   :  { %v4806_v55 = vpop.eup %4805  ;;  %v3543_v10 = vadd.f32 1.0, %v4804_v42  ;;  %v3679_v2 = vpop.f32.mrf.mxu2 }
 0xecd   :  { %v3464_v57 = vmul.f32 %v4806_v55, %v3462_v62  ;;  %v3682_v11 = vadd.f32 %v3679_v2, %v3660_v53  ;;  %vm3469_vm11 = vweird.f32 %v4806_v55 }
 0xece   :  { %4807 = vrcp.f32 %v3543_v10  ;;  %v3555_v27 = vand.u32 2147483648, %v3543_v10  ;;  %vm3470_vm14 = vmor %vm3468_vm12, %vm3469_vm11  ;;  %v3553_v44 = vand.u32 2147483647, %v3543_v10  ;;  %vm3549_vm15 = vweird.f32 %v3543_v10 }
 0xecf   :  { %v3465_v51 = vsub.f32 1.0, %v3464_v57  ;;  %v3683_v5 = vadd.f32 %v6717_v40, %v3682_v11 }
 0xed0   :  { %v3556_v18 = vor.u32 1.1754944e-38, %v3555_v27  ;;  %vm3554_vm1 = vcmp.eq.f32.partialorder %v3553_v44, 8.507059e+37 }
 0xed1   :  { %v4487_v13 = vmul.f32 -1.442695, %v3683_v5  ;;  %v3466_v54 = vmul.f32 %v4806_v55, %v3465_v51 }
 0xed3   :  { %4809 = vpow2.f32 %v4487_v13  ;;  %v3467_v32 = vadd.f32 %v4806_v55, %v3466_v54 }
 0xed4   :  { %v4808_v20 = vpop.eup %4807  ;;  %4811 = vtanh.f32 %v3620_v50 }
 0xed5   :  { %v3545_v22 = vmul.f32 %v4808_v20, %v3543_v10  ;;  %vm3550_vm13 = vweird.f32 %v4808_v20  ;;  %v3471_v15 = vsel %vm3470_vm14, %v4806_v55, %v3467_v32 }
 0xed6   :  { %vm3551_vm0 = vmor %vm3549_vm15, %vm3550_vm13  ;;  %v3476_v38 = vsel %vm3473_vm8, %v3475_v43, %v3471_v15  ;;  %vm7136_vm15 = vcmask 11264  }
 0xed7   :  { %v3546_v63 = vsub.f32 1.0, %v3545_v22 }
 0xed9   :  { %v4810_v29 = vpop.eup %4809  ;;  %v3547_v1 = vmul.f32 %v4808_v20, %v3546_v63 }
 0xeda   :  { %v3687_v45 = vadd.f32 1.0, %v4810_v29  ;;  %v4812_v28 = vpop.eup %4811 }
 0xedb   :  { %v3548_v25 = vadd.f32 %v4808_v20, %v3547_v1  ;;  %v3704_v21 = vmul.f32 %v4812_v28, %v3476_v38 }
 0xedc   :  { %4813 = vrcp.f32 %v3687_v45  ;;  %v3699_v6 = vand.u32 2147483648, %v3687_v45  ;;  %v3697_v58 = vand.u32 2147483647, %v3687_v45  ;;  %vm3693_vm12 = vweird.f32 %v3687_v45 }
 0xedd   :  { %v3552_v34 = vsel %vm3551_vm0, %v4808_v20, %v3548_v25  ;;  %vm7137_vm0 = vmmov %vm7136_vm15 }
 0xede   :  { %v3557_v60 = vsel %vm3554_vm1, %v3556_v18, %v3552_v34  ;;  %v3700_v35 = vor.u32 1.1754944e-38, %v3699_v6  ;;  %vm3698_vm14 = vcmp.eq.f32.partialorder %v3697_v58, 8.507059e+37  ;;  %vm7138_vm8 = vmmov %vm7137_vm0 }
 0xedf   :  { %v3703_v30 = vmul.f32 %v3557_v60, %v6733_v36  ;;  %vm7139_vm1 = vmmov %vm7137_vm0 }
 0xee1   :  { %v6834_v56 = vadd.f32 %v3704_v21, %v3703_v30 }
 0xee2   :  { %v4814_v26 = vpop.eup %4813 }
 0xee3   :  { %v3689_v3 = vmul.f32 %v4814_v26, %v3687_v45  ;;  %4815 = vtanh.f32 %v6834_v56  ;;  %vm3694_vm11 = vweird.f32 %v4814_v26 }
 0xee4   :  { %vm3695_vm13 = vmor %vm3693_vm12, %vm3694_vm11 }
 0xee5   :  { %v3690_v39 = vsub.f32 1.0, %v3689_v3 }
 0xee7   :  { %v3691_v33 = vmul.f32 %v4814_v26, %v3690_v39 }
 0xee9   :  { %v3692_v0 = vadd.f32 %v4814_v26, %v3691_v33  ;;  %v4816_v62 = vpop.eup %4815 }
 0xeeb   :  { %v3696_v59 = vsel %vm3695_vm13, %v4814_v26, %v3692_v0 }
 0xeec   :  { %v3701_v36 = vsel %vm3698_vm14, %v3700_v35, %v3696_v59 }
 0xeed   :  { %v6837_v4 = vmul.f32 %v4816_v62, %v3701_v36 }
 0xeef   :  { %4488 = vmatpush.msk.msra.mxu3 %vm3251_vm2, %v6837_v4  ;;  %4494 = vmatmul.msk.f32.vlgmr.msrb.gmra.mxu2 %vm985_vm4, %v6837_v4 }
 0xef0   :  { %4489 = vmatmul.msk.f32.vlgmr.msra.gmra.mxu3 %vm3244_vm3, %v6741_v7  ;;  %4062 = vmatpush.msrb.mxu2 %v6592_v9 }
 0xef1   :  { %3981 = vmatpush.msrb.mxu3 %v4875_v37 }
 0xef2   :  { %4063 = vmatpush.msrb.mxu2 %v6599_v41 }
 0xef3   :  { %3982 = vmatpush.msrb.mxu3 %v6576_v61 }
 0xef5   :  { %4085 = vmatpush.msra.mxu3 %v6607_v19 }
 0xef7   :  { %4086 = vmatpush.msra.mxu3 %v6611_v47  ;;  %4498 = vmatmul.msk.f32.vlgmr.msra.gmra.mxu2 %vm985_vm4, %v6837_v4 }
 0xef8   :  { %4490 = vmatmul.msk.f32.gmra.mxu3 %vm3244_vm3, %v6757_v52 }
 0xeff   :  { %4503 = vmatmul.msk.f32.vlgmr.msrb.gmra.mxu2 %vm985_vm4, %v6837_v4 }
 0xf00   :  { %4499 = vmatmul.msk.f32.vlgmr.msrb.gmra.mxu3 %vm985_vm4, %v6837_v4 }
 0xf73   :  { %v3728_v9 = vpop.f32.mrf.mxu3 }
 0xf74   :  { %v3734_v41 = vmul.f32 %v3728_v9, %v6712_v12 }
 0xf76   :  { %v3736_v61 = vsel %vm985_vm4, %v3734_v41, 0.0 }
 0xf77   :  { %3737 = vadd.xlane.f32.xlu1 %v3736_v61 }
 0xf7b   :  { %v3731_v19 = vpop.f32.mrf.mxu3 }
 0xf7c   :  { %v3735_v47 = vmul.f32 %v3731_v19, %v6727_v48 }
 0xf7e   :  { %v3739_v14 = vsel %vm3283_vm7, %v3735_v47, 0.0 }
 0xf7f   :  { %3740 = vadd.xlane.f32.xlu2 %v3739_v14 }
 0xfea   :  { %v3738_v42 = vpop.xlane.xlu1 %3737 }
 0xfeb   :  { %v3742_v53 = vsel %vm3287_vm9, %v3738_v42, -1e+30 }
 0xfec   :  { %v3744_v2 = vsel %vm3244_vm3, %v3742_v53, -inf }
 0xff2   :  { %v3741_v55 = vpop.xlane.xlu2 %3740 }
 0xff3   :  { %v3743_v10 = vsel %vm3288_vm10, %v3741_v55, -1e+30 }
 0xff4   :  { %v3745_v57 = vsel %vm7136_vm15, %v3743_v10, -inf }
 0xff5   :  { %v3746_v17 = vmax.f32 %v3744_v2, %v3745_v57 }
 0xff7   :  { %v3747_v11 = vrot.slane %v3746_v17, 4 }
 0xff9   :  { %v3748_v51 = vmax.f32 %v3746_v17, %v3747_v11 }
 0xffb   :  { %v3749_v5 = vrot.slane %v3748_v51, 2 }
 0xffd   :  { %v3750_v31 = vmax.f32 %v3748_v51, %v3749_v5 }
 0xfff   :  { %v3751_v23 = vrot.slane %v3750_v31, 1 }
0x1001   :  { %v3752_v13 = vmax.f32 %v3750_v31, %v3751_v23 }
0x1003   :  { %v3754_v54 = vmul.f32 %v3752_v13, %v6757_v52  ;;  %v3753_v20 = vmul.f32 %v3752_v13, %v6741_v7  ;;  %v4876_v13 = vld [vmem:[#allocation22 + $0x8] sm:$0xff] }
0x1005   :  { %v3758_v22 = vsel %vm7137_vm0, %v3754_v54, 0.0  ;;  %v3755_v50 = vsel %vm3244_vm3, %v3753_v20, 0.0  ;;  %v4877_v54 = vld [vmem:[#allocation22] sm:$0xff]  ;;  %v4878_v20 = vld [vmem:[#allocation20 + $0x28] sm:$0xff] }
0x1006   :  { %3759 = vadd.xlane.f32.xlu1 %v3758_v22  ;;  %3756 = vadd.xlane.f32.xlu0 %v3755_v50  ;;  %v4879_v22 = vld [vmem:[#allocation20 + $0x20] sm:$0xff]  ;;  %v4880_v50 = vld [vmem:[#allocation19 + $0x38] sm:$0xff] }
0x1079   :  { %v3760_v32 = vpop.xlane.xlu1 %3759  ;;  %v3757_v63 = vpop.xlane.xlu0 %3756 }
0x107a   :  { %v3762_v46 = vsub.f32 %v3741_v55, %v3760_v32  ;;  %v3761_v27 = vsub.f32 %v3738_v42, %v3757_v63  ;;  %v4881_v32 = vld [vmem:[#allocation19 + $0x30] sm:$0xff] }
0x107c   :  { %v3765_v8 = vmul.f32 1.442695, %v3762_v46  ;;  %v3763_v29 = vmul.f32 1.442695, %v3761_v27  ;;  %v4882_v46 = vld [vmem:[#allocation19 + $0x28] sm:$0xff]  ;;  %v4883_v27 = vld [vmem:[#allocation19 + $0x20] sm:$0xff] }
0x107e   :  { %4817 = vpow2.f32 %v3765_v8  ;;  %v4884_v8 = vld [vmem:[#allocation22 + $0x38] sm:$0xff] }
0x107f   :  { %4819 = vpow2.f32 %v3763_v29  ;;  %v4885_v29 = vld [vmem:[#allocation22 + $0x30] sm:$0xff] }
0x1084   :  { %v4818_v1 = vpop.eup %4817 }
0x1085   :  { %v4820_v44 = vpop.eup %4819  ;;  %v3768_v15 = vmul.f32 %v4818_v1, %v6757_v52 }
0x1086   :  { %v3767_v45 = vmul.f32 %v4820_v44, %v6741_v7 }
0x1087   :  { %v3770_v43 = vsel %vm7138_vm8, %v3768_v15, 0.0 }
0x1088   :  { %v3769_v25 = vsel %vm3244_vm3, %v3767_v45, 0.0 }
0x1089   :  { %v3771_v18 = vadd.f32 %v3770_v43, %v3769_v25 }
0x108b   :  { %v3772_v38 = vrot.slane %v3771_v18, 4 }
0x108d   :  { %v3773_v34 = vadd.f32 %v3772_v38, %v3771_v18 }
0x108f   :  { %v3774_v60 = vrot.slane %v3773_v34, 2 }
0x1091   :  { %v3775_v28 = vadd.f32 %v3774_v60, %v3773_v34 }
0x1093   :  { %v3776_v30 = vrot.slane %v3775_v28, 1 }
0x1095   :  { %v3777_v21 = vadd.f32 %v3776_v30, %v3775_v28  ;;  %v3984_v28 = vpop.f32.mrf.mxu3 }
0x1097   :  { %v3779_v26 = vmul.f32 %v3777_v21, %v6757_v52  ;;  %v3778_v3 = vmul.f32 %v3777_v21, %v6741_v7 }
0x1099   :  { %v3783_v39 = vsel %vm7139_vm1, %v3779_v26, 0.0  ;;  %v3780_v6 = vsel %vm3244_vm3, %v3778_v3, 0.0  ;;  %v4886_v26 = vld [vmem:[%s6971_s21 + $0x1] ss:$0 sm:$0xff] }
0x109a   :  { %3784 = vadd.xlane.f32.xlu2 %v3783_v39  ;;  %3781 = vadd.xlane.f32.xlu0 %v3780_v6 }
0x110d   :  { %v3785_v33 = vpop.xlane.xlu2 %3784  ;;  %v3782_v58 = vpop.xlane.xlu0 %3781 }
0x110e   :  { %4821 = vrcp.f32 %v3785_v33  ;;  %v3812_v37 = vand.u32 2147483648, %v3785_v33  ;;  %v3810_v61 = vand.u32 2147483647, %v3785_v33  ;;  %v3797_v19 = vand.u32 2147483648, %v3782_v58 }
0x110f   :  { %4823 = vrcp.f32 %v3782_v58  ;;  %v3795_v14 = vand.u32 2147483647, %v3782_v58  ;;  %vm3806_vm13 = vweird.f32 %v3785_v33  ;;  %vm3791_vm15 = vweird.f32 %v3782_v58 }
0x1110   :  { %v3813_v53 = vor.u32 1.1754944e-38, %v3812_v37  ;;  %vm3811_vm0 = vcmp.eq.f32.partialorder %v3810_v61, 8.507059e+37  ;;  %v3798_v2 = vor.u32 1.1754944e-38, %v3797_v19 }
0x1111   :  { %vm3796_vm1 = vcmp.eq.f32.partialorder %v3795_v14, 8.507059e+37 }
0x1114   :  { %v4822_v0 = vpop.eup %4821 }
0x1115   :  { %v4824_v35 = vpop.eup %4823  ;;  %v3802_v59 = vmul.f32 %v4822_v0, %v3785_v33  ;;  %vm3807_vm11 = vweird.f32 %v4822_v0 }
0x1116   :  { %v3787_v62 = vmul.f32 %v4824_v35, %v3782_v58  ;;  %vm3792_vm12 = vweird.f32 %v4824_v35  ;;  %vm3808_vm14 = vmor %vm3806_vm13, %vm3807_vm11  ;;  %v4290_v58 = vld [vmem:[%s6972_s22] sm:$0xff] }
0x1117   :  { %v3803_v36 = vsub.f32 1.0, %v3802_v59  ;;  %vm3793_vm8 = vmor %vm3791_vm15, %vm3792_vm12 }
0x1118   :  { %v3788_v9 = vsub.f32 1.0, %v3787_v62 }
0x1119   :  { %v3804_v41 = vmul.f32 %v4822_v0, %v3803_v36 }
0x111a   :  { %v3789_v47 = vmul.f32 %v4824_v35, %v3788_v9 }
0x111b   :  { %v3805_v42 = vadd.f32 %v4822_v0, %v3804_v41 }
0x111c   :  { %v3790_v55 = vadd.f32 %v4824_v35, %v3789_v47 }
0x111d   :  { %v3809_v10 = vsel %vm3808_vm14, %v4822_v0, %v3805_v42 }
0x111e   :  { %v3814_v57 = vsel %vm3811_vm0, %v3813_v53, %v3809_v10  ;;  %v3794_v17 = vsel %vm3793_vm8, %v4824_v35, %v3790_v55 }
0x111f   :  { %v3815_v11 = vmul.f32 %v4818_v1, %v3814_v57  ;;  %v3799_v51 = vsel %vm3796_vm1, %v3798_v2, %v3794_v17  ;;  %v3883_v1 = vpop.f32.mrf.mxu2 }
0x1120   :  { %v3800_v5 = vmul.f32 %v4820_v44, %v3799_v51 }
0x1121   :  { %v3817_v31 = vmul.f32 %v3815_v11, %v6727_v48 }
0x1122   :  { %v3816_v23 = vmul.f32 %v3800_v5, %v6712_v12 }
0x1123   :  { %4491 = vmatpush.msk.msra.mxu0 %vm499_vm5, %v3817_v31 }
0x1125   :  { %3836 = vmatpush.msra.mxu0 %v3816_v23 }
0x1126   :  { %4492 = vmatmul.msk.f32.vlgmr.msra.gmra.mxu0 %vm489_vm6, %v6795_v16 }
0x1127   :  { %3900 = vmatpush.msrb.mxu0 %v4876_v13  ;;  %v3964_v38 = vpop.f32.mrf.mxu2 }
0x1129   :  { %3901 = vmatpush.msrb.mxu0 %v4877_v54 }
0x112b   :  { %4022 = vmatpush.msra.mxu0 %v4878_v20 }
0x112d   :  { %4023 = vmatpush.msra.mxu0 %v4879_v22 }
0x112e   :  { %4495 = vmatmul.msk.f32.vlgmr.msrb.gmra.mxu0 %vm985_vm4, %v6837_v4 }
0x112f   :  { %4105 = vmatpush.msrb.mxu0 %v4880_v50  ;;  %v4065_v42 = vpop.f32.mrf.mxu2 }
0x1131   :  { %4106 = vmatpush.msrb.mxu0 %v4881_v32 }
0x11a3   :  { %v3838_v63 = vpop.f32.mrf.mxu0 }
0x11a4   :  { %4493 = vmatmul.msk.f32.vlgmr.msra.gmra.mxu1 %vm985_vm4, %v3838_v63  ;;  %4501 = vmatmul.msk.f32.vlgmr.msra.gmra.mxu0 %vm985_vm4, %v3838_v63 }
0x11a5   :  { %4504 = vmatmul.msk.f32.vlgmr.msra.gmra.mxu3 %vm985_vm4, %v3838_v63  ;;  %4042 = vmatpush.msra.mxu1 %v4882_v46 }
0x11a7   :  { %4043 = vmatpush.msra.mxu1 %v4883_v27 }
0x11ab   :  { %v3903_v45 = vpop.f32.mrf.mxu0 }
0x11ac   :  { %4497 = vmatmul.msk.f32.vlgmr.msrb.gmra.mxu1 %vm985_vm4, %v3838_v63  ;;  %4505 = vmatmul.msk.f32.vlgmr.msrb.gmra.mxu0 %vm985_vm4, %v6837_v4 }
0x11ad   :  { %4125 = vmatpush.msrb.mxu1 %v4884_v8 }
0x11af   :  { %4126 = vmatpush.msrb.mxu1 %v4885_v29 }
0x11b4   :  { %4502 = vmatmul.msk.f32.vlgmr.msra.gmra.mxu1 %vm985_vm4, %v6837_v4 }
0x11bc   :  { %4506 = vmatmul.msk.f32.vlgmr.msrb.gmra.mxu1 %vm985_vm4, %v6837_v4 }
0x1221   :  { %v3861_v44 = vpop.f32.mrf.mxu1  ;;  %v4025_v30 = vpop.f32.mrf.mxu0 }
0x1222   :  { %v3884_v15 = vadd.f32 %v3883_v1, %v3861_v44 }
0x1224   :  { %v3906_v43 = vadd.f32 %v3903_v45, %v3884_v15 }
0x1226   :  { %v3907_v25 = vadd.f32 %v6685_v24, %v3906_v43  ;;  %v4291_v24 = vld [vmem:[%s6972_s22 + $0x8] sm:$0xff] }
0x1227   :  { %4333 = vmatpush.msra.mxu1 %v4291_v24 }
0x1228   :  { %v4496_v18 = vmul.f32 -1.442695, %v3907_v25  ;;  %v4088_v35 = vpop.f32.mrf.mxu3 }
0x1229   :  { %v3944_v34 = vpop.f32.mrf.mxu1  ;;  %v4108_v0 = vpop.f32.mrf.mxu0  ;;  %4334 = vmatpush.msra.mxu1 %v4290_v58 }
0x122a   :  { %4825 = vpow2.f32 %v4496_v18  ;;  %v3965_v60 = vadd.f32 %v3964_v38, %v3944_v34  ;;  %v4109_v62 = vadd.f32 %v4108_v0, %v4088_v35 }
0x122c   :  { %v3987_v21 = vadd.f32 %v3984_v28, %v3965_v60 }
0x122e   :  { %v3988_v4 = vadd.f32 %v4886_v26, %v3987_v21 }
0x1230   :  { %v4826_v3 = vpop.eup %4825  ;;  %v4500_v39 = vmul.f32 -1.442695, %v3988_v4 }
0x1231   :  { %v3911_v6 = vadd.f32 1.0, %v4826_v3  ;;  %v4045_v33 = vpop.f32.mrf.mxu1 }
0x1232   :  { %4827 = vpow2.f32 %v4500_v39  ;;  %v4046_v61 = vadd.f32 %v4045_v33, %v4025_v30 }
0x1233   :  { %4829 = vrcp.f32 %v3911_v6  ;;  %v3923_v5 = vand.u32 2147483648, %v3911_v6  ;;  %vm3917_vm12 = vweird.f32 %v3911_v6  ;;  %v3921_v23 = vand.u32 2147483647, %v3911_v6 }
0x1234   :  { %v4068_v53 = vadd.f32 %v4065_v42, %v4046_v61 }
0x1235   :  { %v3924_v50 = vor.u32 1.1754944e-38, %v3923_v5  ;;  %vm3922_vm8 = vcmp.eq.f32.partialorder %v3921_v23, 8.507059e+37 }
0x1236   :  { %v4069_v17 = vadd.f32 %v6723_v49, %v4068_v53 }
0x1238   :  { %v4828_v59 = vpop.eup %4827 }
0x1239   :  { %v4830_v36 = vpop.eup %4829  ;;  %v3992_v37 = vadd.f32 1.0, %v4828_v59  ;;  %v4128_v9 = vpop.f32.mrf.mxu1 }
0x123a   :  { %v3913_v41 = vmul.f32 %v4830_v36, %v3911_v6  ;;  %v4131_v19 = vadd.f32 %v4128_v9, %v4109_v62  ;;  %vm3918_vm11 = vweird.f32 %v4830_v36 }
0x123b   :  { %4831 = vrcp.f32 %v3992_v37  ;;  %v4004_v31 = vand.u32 2147483648, %v3992_v37  ;;  %vm3919_vm14 = vmor %vm3917_vm12, %vm3918_vm11  ;;  %vm3998_vm15 = vweird.f32 %v3992_v37 }
0x123c   :  { %v3914_v47 = vsub.f32 1.0, %v3913_v41  ;;  %v4132_v14 = vadd.f32 %v6717_v40, %v4131_v19  ;;  %v4002_v40 = vand.u32 2147483647, %v3992_v37 }
0x123d   :  { %v4005_v49 = vor.u32 1.1754944e-38, %v4004_v31 }
0x123e   :  { %v4507_v55 = vmul.f32 -1.442695, %v4132_v14  ;;  %v3915_v10 = vmul.f32 %v4830_v36, %v3914_v47  ;;  %vm4003_vm1 = vcmp.eq.f32.partialorder %v4002_v40, 8.507059e+37 }
0x1240   :  { %4833 = vpow2.f32 %v4507_v55  ;;  %v3916_v11 = vadd.f32 %v4830_v36, %v3915_v10 }
0x1241   :  { %v4832_v2 = vpop.eup %4831  ;;  %4835 = vtanh.f32 %v4069_v17 }
0x1242   :  { %v3994_v57 = vmul.f32 %v4832_v2, %v3992_v37  ;;  %vm3999_vm13 = vweird.f32 %v4832_v2  ;;  %v3920_v20 = vsel %vm3919_vm14, %v4830_v36, %v3916_v11 }
0x1243   :  { %vm4000_vm0 = vmor %vm3998_vm15, %vm3999_vm13  ;;  %v3925_v63 = vsel %vm3922_vm8, %v3924_v50, %v3920_v20 }
0x1244   :  { %v3995_v51 = vsub.f32 1.0, %v3994_v57 }
0x1246   :  { %v4834_v13 = vpop.eup %4833  ;;  %v3996_v54 = vmul.f32 %v4832_v2, %v3995_v51 }
0x1247   :  { %v4136_v22 = vadd.f32 1.0, %v4834_v13  ;;  %v4836_v8 = vpop.eup %4835 }
0x1248   :  { %v3997_v32 = vadd.f32 %v4832_v2, %v3996_v54  ;;  %v4153_v1 = vmul.f32 %v4836_v8, %v3925_v63 }
0x1249   :  { %4837 = vrcp.f32 %v4136_v22  ;;  %v4148_v25 = vand.u32 2147483648, %v4136_v22  ;;  %v4146_v38 = vand.u32 2147483647, %v4136_v22  ;;  %vm4142_vm12 = vweird.f32 %v4136_v22 }
0x124a   :  { %v4001_v46 = vsel %vm4000_vm0, %v4832_v2, %v3997_v32 }
0x124b   :  { %v4006_v27 = vsel %vm4003_vm1, %v4005_v49, %v4001_v46  ;;  %v4149_v60 = vor.u32 1.1754944e-38, %v4148_v25  ;;  %vm4147_vm14 = vcmp.eq.f32.partialorder %v4146_v38, 8.507059e+37 }
0x124c   :  { %v4152_v29 = vmul.f32 %v4006_v27, %v6834_v56 }
0x124e   :  { %v4154_v15 = vadd.f32 %v4153_v1, %v4152_v29 }
0x124f   :  { %v4838_v44 = vpop.eup %4837 }
0x1250   :  { %v4138_v45 = vmul.f32 %v4838_v44, %v4136_v22  ;;  %4839 = vtanh.f32 %v4154_v15  ;;  %vm4143_vm11 = vweird.f32 %v4838_v44 }
0x1251   :  { %vm4144_vm13 = vmor %vm4142_vm12, %vm4143_vm11 }
0x1252   :  { %v4139_v43 = vsub.f32 1.0, %v4138_v45 }
0x1254   :  { %v4140_v18 = vmul.f32 %v4838_v44, %v4139_v43 }
0x1256   :  { %v4141_v34 = vadd.f32 %v4838_v44, %v4140_v18  ;;  %v4840_v30 = vpop.eup %4839 }
0x1258   :  { %v4145_v28 = vsel %vm4144_vm13, %v4838_v44, %v4141_v34  ;;  %v4293_v44 = vld [vmem:[#allocation23 + $0x8] sm:$0xff] }
0x1259   :  { %v4150_v21 = vsel %vm4147_vm14, %v4149_v60, %v4145_v28  ;;  %4311 = vmatpush.msra.mxu0 %v4293_v44 }
0x125a   :  { %v4156_v26 = vmul.f32 %v4840_v30, %v4150_v21 }
0x125c   :  { %4508 = vmatpush.msk.msra.mxu2 %vm3251_vm2, %v4156_v26  ;;  %4514 = vmatmul.msk.f32.vlgmr.msra.gmra.mxu1 %vm985_vm4, %v4156_v26  ;;  %vm7140_vm2 = vcmask 11264  }
0x125d   :  { %4509 = vmatmul.msk.f32.vlgmr.msra.gmra.mxu2 %vm3244_vm3, %v6741_v7 }
0x1265   :  { %4510 = vmatmul.msk.f32.gmra.mxu2 %vm3244_vm3, %v6757_v52 }
0x12e0   :  { %v4177_v56 = vpop.f32.mrf.mxu2 }
0x12e1   :  { %v4183_v4 = vmul.f32 %v4177_v56, %v6712_v12 }
0x12e3   :  { %v4185_v3 = vsel %vm985_vm4, %v4183_v4, 0.0 }
0x12e4   :  { %4186 = vadd.xlane.f32.xlu1 %v4185_v3 }
0x12e8   :  { %v4180_v39 = vpop.f32.mrf.mxu2 }
0x12e9   :  { %v4184_v6 = vmul.f32 %v4180_v39, %v6727_v48 }
0x12eb   :  { %v4188_v33 = vsel %vm3283_vm7, %v4184_v6, 0.0  ;;  %vm7141_vm7 = vmmov %vm7140_vm2 }
0x12ec   :  { %4189 = vadd.xlane.f32.xlu2 %v4188_v33 }
0x1357   :  { %v4187_v24 = vpop.xlane.xlu1 %4186 }
0x1358   :  { %v4191_v58 = vsel %vm3287_vm9, %v4187_v24, -1e+30  ;;  %vm7142_vm9 = vmmov %vm7140_vm2 }
0x1359   :  { %v4193_v59 = vsel %vm3244_vm3, %v4191_v58, -inf }
0x135f   :  { %v4190_v0 = vpop.xlane.xlu2 %4189 }
0x1360   :  { %v4192_v35 = vsel %vm3288_vm10, %v4190_v0, -1e+30  ;;  %vm7143_vm10 = vmmov %vm7140_vm2 }
0x1361   :  { %v4194_v62 = vsel %vm7140_vm2, %v4192_v35, -inf }
0x1362   :  { %v4195_v36 = vmax.f32 %v4193_v59, %v4194_v62 }
0x1364   :  { %v4196_v37 = vrot.slane %v4195_v36, 4 }
0x1366   :  { %v4197_v9 = vmax.f32 %v4195_v36, %v4196_v37  ;;  %v4292_v36 = vld [vmem:[#allocation23] sm:$0xff] }
0x1367   :  { %4312 = vmatpush.msra.mxu0 %v4292_v36 }
0x1368   :  { %v4198_v41 = vrot.slane %v4197_v9, 2 }
0x136a   :  { %v4199_v61 = vmax.f32 %v4197_v9, %v4198_v41  ;;  %v4716_v9 = vld [vmem:[%s6974_s24] ss:$0 sm:$0xff]  ;;  %v4336_v41 = vpop.f32.mrf.mxu1 }
0x136c   :  { %v4200_v19 = vrot.slane %v4199_v61, 1 }
0x136e   :  { %v4201_v47 = vmax.f32 %v4199_v61, %v4200_v19 }
0x1370   :  { %v4203_v14 = vmul.f32 %v4201_v47, %v6757_v52  ;;  %v4202_v42 = vmul.f32 %v4201_v47, %v6741_v7 }
0x1372   :  { %v4207_v53 = vsel %vm7141_vm7, %v4203_v14, 0.0  ;;  %v4204_v55 = vsel %vm3244_vm3, %v4202_v42, 0.0 }
0x1373   :  { %4208 = vadd.xlane.f32.xlu1 %v4207_v53  ;;  %4205 = vadd.xlane.f32.xlu0 %v4204_v55 }
0x13e6   :  { %v4209_v10 = vpop.xlane.xlu1 %4208  ;;  %v4206_v2 = vpop.xlane.xlu0 %4205 }
0x13e7   :  { %v4211_v57 = vsub.f32 %v4190_v0, %v4209_v10  ;;  %v4210_v17 = vsub.f32 %v4187_v24, %v4206_v2 }
0x13e9   :  { %v4214_v11 = vmul.f32 1.442695, %v4211_v57  ;;  %v4212_v51 = vmul.f32 1.442695, %v4210_v17 }
0x13eb   :  { %4841 = vpow2.f32 %v4214_v11 }
0x13ec   :  { %4843 = vpow2.f32 %v4212_v51 }
0x13f1   :  { %v4842_v5 = vpop.eup %4841 }
0x13f2   :  { %v4844_v31 = vpop.eup %4843  ;;  %v4217_v23 = vmul.f32 %v4842_v5, %v6757_v52 }
0x13f3   :  { %v4216_v13 = vmul.f32 %v4844_v31, %v6741_v7 }
0x13f4   :  { %v4219_v54 = vsel %vm7142_vm9, %v4217_v23, 0.0 }
0x13f5   :  { %v4218_v40 = vsel %vm3244_vm3, %v4216_v13, 0.0 }
0x13f6   :  { %v4220_v20 = vadd.f32 %v4219_v54, %v4218_v40 }
0x13f8   :  { %v4221_v22 = vrot.slane %v4220_v20, 4 }
0x13fa   :  { %v4222_v50 = vadd.f32 %v4221_v22, %v4220_v20 }
0x13fc   :  { %v4223_v32 = vrot.slane %v4222_v50, 2 }
0x13fe   :  { %v4224_v49 = vadd.f32 %v4223_v32, %v4222_v50 }
0x1400   :  { %v4225_v63 = vrot.slane %v4224_v49, 1 }
0x1402   :  { %v4226_v46 = vadd.f32 %v4225_v63, %v4224_v49 }
0x1404   :  { %v4228_v27 = vmul.f32 %v4226_v46, %v6757_v52  ;;  %v4227_v8 = vmul.f32 %v4226_v46, %v6741_v7 }
0x1406   :  { %v4232_v29 = vsel %vm7143_vm10, %v4228_v27, 0.0  ;;  %v4229_v1 = vsel %vm3244_vm3, %v4227_v8, 0.0 }
0x1407   :  { %4233 = vadd.xlane.f32.xlu2 %v4232_v29  ;;  %4230 = vadd.xlane.f32.xlu0 %v4229_v1 }
0x147a   :  { %v4234_v15 = vpop.xlane.xlu2 %4233  ;;  %v4231_v45 = vpop.xlane.xlu0 %4230 }
0x147b   :  { %4845 = vrcp.f32 %v4234_v15  ;;  %v4261_v52 = vand.u32 2147483648, %v4234_v15  ;;  %v4259_v28 = vand.u32 2147483647, %v4234_v15  ;;  %v4246_v30 = vand.u32 2147483648, %v4231_v45 }
0x147c   :  { %4847 = vrcp.f32 %v4231_v45  ;;  %v4244_v26 = vand.u32 2147483647, %v4231_v45  ;;  %vm4255_vm0 = vweird.f32 %v4234_v15  ;;  %vm4240_vm1 = vweird.f32 %v4231_v45 }
0x147d   :  { %v4262_v4 = vor.u32 1.1754944e-38, %v4261_v52  ;;  %vm4260_vm11 = vcmp.eq.f32.partialorder %v4259_v28, 8.507059e+37  ;;  %v4247_v6 = vor.u32 1.1754944e-38, %v4246_v30 }
0x147e   :  { %vm4245_vm13 = vcmp.eq.f32.partialorder %v4244_v26, 8.507059e+37 }
0x1481   :  { %v4846_v43 = vpop.eup %4845 }
0x1482   :  { %v4848_v25 = vpop.eup %4847  ;;  %v4251_v18 = vmul.f32 %v4846_v43, %v4234_v15  ;;  %vm4256_vm15 = vweird.f32 %v4846_v43 }
0x1483   :  { %v4236_v38 = vmul.f32 %v4848_v25, %v4231_v45  ;;  %vm4241_vm3 = vweird.f32 %v4848_v25  ;;  %vm4257_vm8 = vmor %vm4255_vm0, %vm4256_vm15 }
0x1484   :  { %v4252_v34 = vsub.f32 1.0, %v4251_v18  ;;  %vm4242_vm12 = vmor %vm4240_vm1, %vm4241_vm3 }
0x1485   :  { %v4237_v60 = vsub.f32 1.0, %v4236_v38 }
0x1486   :  { %v4253_v7 = vmul.f32 %v4846_v43, %v4252_v34 }
0x1487   :  { %v4238_v21 = vmul.f32 %v4848_v25, %v4237_v60 }
0x1488   :  { %v4254_v56 = vadd.f32 %v4846_v43, %v4253_v7 }
0x1489   :  { %v4239_v3 = vadd.f32 %v4848_v25, %v4238_v21 }
0x148a   :  { %v4258_v39 = vsel %vm4257_vm8, %v4846_v43, %v4254_v56 }
0x148b   :  { %v4263_v33 = vsel %vm4260_vm11, %v4262_v4, %v4258_v39  ;;  %v4243_v24 = vsel %vm4242_vm12, %v4848_v25, %v4239_v3 }
0x148c   :  { %v4264_v58 = vmul.f32 %v4842_v5, %v4263_v33  ;;  %v4248_v0 = vsel %vm4245_vm13, %v4247_v6, %v4243_v24 }
0x148d   :  { %v4249_v35 = vmul.f32 %v4844_v31, %v4248_v0 }
0x148e   :  { %v4266_v59 = vmul.f32 %v4264_v58, %v6727_v48 }
0x148f   :  { %v4265_v62 = vmul.f32 %v4249_v35, %v6712_v12 }
0x1490   :  { %4511 = vmatpush.msk.msrb.mxu3 %vm499_vm5, %v4266_v59  ;;  %vm4345_vm5 = vcmask 91136  }
0x1492   :  { %4285 = vmatpush.msrb.mxu3 %v4265_v62 }
0x1493   :  { %4512 = vmatmul.msk.f32.vlgmr.msrb.gmra.mxu3 %vm489_vm6, %v6795_v16 }
0x1516   :  { %v4287_v37 = vpop.f32.mrf.mxu3 }
0x1517   :  { %4513 = vmatmul.msk.f32.vlgmr.msra.gmra.mxu0 %vm985_vm4, %v4287_v37 }
0x1594   :  { %v4314_v61 = vpop.f32.mrf.mxu0 }
0x1595   :  { %v4337_v48 = vadd.f32 %v4336_v41, %v4314_v61 }
0x1597   :  { %v4343_v12 = vadd.f32 %v4716_v9, %v4337_v48 }
0x1599   :  { %v4344_v16 = vmax.f32 %v4343_v12, 0.0 }
0x159b   :  { %4346 = vst.msk [vmem:[#allocation25] sm:$0x3] %vm4345_vm5, %v4344_v16 }
0x159c   :  { %4357 = dma.vmem_to_hbm [thread:$0]  %s4353_s5, 32, %s4355_s4, [#allocation4]  }
0x159d   :  { %5263 = dma.done.wait [#allocation4], 32  }
0x159e   :  { %5264 = vsyncadd [#allocation4], 4294967264 }
0x159f   :  { %4362 = vsyncpa [#allocation3], 1 }
0x15a0   :  { %4363 = vsyncpa [#allocation6], 1 }
0x15a1   :  { %4364 = vsyncpa [#allocation9], 1 }
0x15a2   :  { %4365 = vsyncpa [#allocation12], 1 }
0x15a3   :  { %4366 = vsyncpa [#allocation15], 1 }
0x15a4   :  { %4367 = vsyncpa [#allocation18], 1 }
0x15a5   :  { %4368 = vsyncpa [#allocation21], 1 }
0x15a6   :  { %4369 = vsyncpa [#allocation24], 1 }
0x15a7   :  { %4370 = vsyncpa [#allocation4], 1 }

</bundles_post_ra>
